<compile_context>
chip_gen: v7x
topology: tpu7x:2x2x1
jax: 0.10.0
libtpu: 0.0.40
codegen_flags: <defaults>
</compile_context>

<pallas_src>
import functools

import numpy as np

import jax
import jax.numpy as jnp
from jax.experimental import pallas as pl
from jax.experimental.pallas import tpu as pltpu


# --------------------------- static configuration -------------------------- #

def _critic_cfg(channels_img, features_c):
    f = features_c
    # (C_in, C_out, kernel, stride, pad, has_norm_act, has_bias)
    return [
        (channels_img + 1, 2 * f, 3, 2, 1, True, False),
        (2 * f,            4 * f, 4, 2, 1, True, False),
        (4 * f,            8 * f, 4, 2, 1, True, False),
        (8 * f,           16 * f, 3, 1, 1, True, False),
        (16 * f,               1, 4, 2, 1, False, True),
    ]


def _build_plan(channels_img, features_c, img_size):
    """Static per-layer geometry + tiny numpy selector constants."""
    hin, win = img_size
    plan = []
    for (cin, cout, k, s, p, na, hb) in _critic_cfg(channels_img, features_c):
        hout = (hin + 2 * p - k) // s + 1
        wout = (win + 2 * p - k) // s + 1
        # Row selectors (k, H_out, H_in): pick input row oh*s - p + i, rows
        # falling into the padding are simply all-zero (== zero padding).
        rowsel = np.zeros((k, hout, hin), np.float32)
        for i in range(k):
            for oh in range(hout):
                ih = oh * s - p + i
                if 0 <= ih < hin:
                    rowsel[i, oh, ih] = 1.0
        # Tap placement (W_in, W_out, k) used to build the banded weight
        # matrix on the parameter side (column padding is implicit).
        tap = np.zeros((win, wout, k), np.float32)
        for ow in range(wout):
            for j in range(k):
                iw = ow * s - p + j
                if 0 <= iw < win:
                    tap[iw, ow, j] = 1.0
        # Channel-group selector (W_out*C_out, C_out) for InstanceNorm stats
        # in the (H_out, W_out*C_out) channels-last layout.
        sgrp = np.tile(np.eye(cout, dtype=np.float32), (wout, 1))
        plan.append(dict(cin=cin, cout=cout, k=k, s=s, p=p, norm_act=na,
                         bias=hb, hin=hin, win=win, hout=hout, wout=wout,
                         rowsel=rowsel, tap=tap, sgrp=sgrp))
        hin, win = hout, wout
    return plan


def _vmem_limit_bytes():
    """Generation-aware VMEM scoped limit (64 MiB on v7x vs 128 MiB v5e/v6e)."""
    cap = 128 * 1024 * 1024
    try:
        info = pltpu.get_tpu_info()
        cap = int(getattr(info, "vmem_capacity_bytes", cap))
    except Exception:
        pass
    return min((cap * 3) // 4, 100 * 1024 * 1024)


# ------------------------------- fused kernel ------------------------------ #

def _critic_kernel(*refs, meta):
    """One grid step == one sample; the whole conv stack stays in VMEM."""
    it = iter(refs)
    x_ref = next(it)
    layers = []
    for m in meta:
        d = dict(rowsel=next(it), ball=next(it))
        if m["norm_act"]:
            d["sg"] = next(it)
            d["sgt"] = next(it)
            d["gamma"] = next(it)
            d["beta"] = next(it)
        if m["bias"]:
            d["bias"] = next(it)
        layers.append(d)
    out_ref = next(it)

    cur = x_ref[0]                                   # (H_in, W_in*C_in) bf16
    for m, lr in zip(meta, layers):
        wc = m["wout"] * m["cout"]
        # One wide bf16 MXU matmul fuses every kernel-column tap and the full
        # input-channel contraction: N = k * W_out * C_out.
        z = jnp.dot(cur, lr["ball"][...], preferred_element_type=jnp.float32)
        acc = None
        for i in range(m["k"]):                      # k = 3..4 tap rows
            zi = z[:, i * wc:(i + 1) * wc]           # static lane slice
            t = jnp.dot(lr["rowsel"][i], zi,         # row gather + row padding
                        preferred_element_type=jnp.float32)
            acc = t if acc is None else acc + t      # (H_out, W_out*C_out) f32
        if m["norm_act"]:
            # InstanceNorm2d (biased var, eps=1e-5, affine) + LeakyReLU(0.2),
            # all statistics in f32; grouped channel reduce/broadcast via tiny
            # 0/1 selector matmuls (no in-kernel reshape needed).
            inv_p = 1.0 / float(m["hout"] * m["wout"])
            srow = jnp.sum(acc, axis=0, keepdims=True)                 # (1, wc)
            mu = jnp.dot(srow, lr["sg"][...],
                         preferred_element_type=jnp.float32) * inv_p   # (1, C)
            mu_f = jnp.dot(mu, lr["sgt"][...],
                           preferred_element_type=jnp.float32)         # (1, wc)
            cent = acc - mu_f
            ssq = jnp.sum(cent * cent, axis=0, keepdims=True)
            var = jnp.dot(ssq, lr["sg"][...],
                          preferred_element_type=jnp.float32) * inv_p
            inv_sig = jax.lax.rsqrt(var + 1e-5)
            inv_f = jnp.dot(inv_sig, lr["sgt"][...],
                            preferred_element_type=jnp.float32)
            yn = cent * inv_f * lr["gamma"][...] + lr["beta"][...]
            cur = jnp.maximum(yn, 0.2 * yn).astype(jnp.bfloat16)
        else:
            cur = acc + lr["bias"][...]              # final conv bias (f32)
    out_ref[0] = cur                                 # (H_last, W_last) f32


# ------------------------------ forward wrapper ----------------------------- #

def make_critic_forward(channels_img, features_c, img_size, n_cond):
    del n_cond  # shapes are taken from the arrays themselves
    H, W = img_size
    plan = _build_plan(channels_img, features_c, img_size)
    cin0 = channels_img + 1
    h_last, w_last = plan[-1]["hout"], plan[-1]["wout"]
    vmem_limit = _vmem_limit_bytes()

    meta = tuple(dict(k=l["k"], hout=l["hout"], wout=l["wout"], cout=l["cout"],
                      norm_act=l["norm_act"], bias=l["bias"]) for l in plan)

    rowsel_c = [jnp.asarray(l["rowsel"]) for l in plan]
    sgrp_c = [jnp.asarray(l["sgrp"]) for l in plan]
    sgrpt_c = [jnp.asarray(np.ascontiguousarray(l["sgrp"].T)) for l in plan]

    def pack_params(params):
        """One-time weight repacking (banded conv matrices, tiled affine/bias);
        runs OUTSIDE the per-call hot path."""
        packed = dict(fc_w1=params["fc_w1"].astype(jnp.float32),
                      fc_b1=params["fc_b1"].astype(jnp.float32),
                      fc_w2=params["fc_w2"].astype(jnp.float32),
                      fc_b2=params["fc_b2"].astype(jnp.float32),
                      layers=[])
        for l, lp in zip(plan, params["convs"]):
            tap = jnp.asarray(l["tap"])                   # (W_in, W_out, k)
            w = lp["w"].astype(jnp.float32)               # (C_out, C_in, k, k)
            # B[(iw,ci),(i,ow,co)] = w[co,ci,i, iw-(ow*s-p)]; 0 outside band.
            b = jnp.einsum("woj,cdij->wdioc", tap, w)
            b = b.reshape(l["win"] * l["cin"],
                          l["k"] * l["wout"] * l["cout"]).astype(jnp.bfloat16)
            entry = dict(ball=b)
            if l["norm_act"]:
                entry["gamma"] = jnp.tile(lp["gamma"].astype(jnp.float32),
                                          l["wout"]).reshape(1, -1)
                entry["beta"] = jnp.tile(lp["beta"].astype(jnp.float32),
                                         l["wout"]).reshape(1, -1)
            if l["bias"]:
                entry["bias"] = jnp.tile(lp["bias"].astype(jnp.float32),
                                         l["wout"]).reshape(1, -1)
            packed["layers"].append(entry)
        return packed

    def forward(packed, x, cond):
        n = x.shape[0]
        # Conditioning MLP + channel concat: tiny XLA ops feeding the fused
        # conv kernel (see TODO(synk) in the header).
        h1 = jnp.maximum(jnp.dot(cond, packed["fc_w1"]) + packed["fc_b1"], 0.0)
        plane = jnp.dot(h1, packed["fc_w2"]) + packed["fc_b2"]
        plane = plane.reshape(n, 1, H, W)
        xc = jnp.concatenate([x, plane], axis=1)               # (N, C+1, H, W)
        x_cl = jnp.transpose(xc, (0, 2, 3, 1)).reshape(n, H, W * cin0)
        x_cl = x_cl.astype(jnp.bfloat16)

        ops = [x_cl]
        in_specs = [pl.BlockSpec((1, H, W * cin0), lambda b: (b, 0, 0))]

        def const(a):
            ops.append(a)
            zeros = (0,) * a.ndim
            in_specs.append(pl.BlockSpec(a.shape, lambda b, _z=zeros: _z))

        for li, (l, lw) in enumerate(zip(plan, packed["layers"])):
            const(rowsel_c[li])
            const(lw["ball"])
            if l["norm_act"]:
                const(sgrp_c[li])
                const(sgrpt_c[li])
                const(lw["gamma"])
                const(lw["beta"])
            if l["bias"]:
                const(lw["bias"])

        out = pl.pallas_call(
            functools.partial(_critic_kernel, meta=meta),
            out_shape=jax.ShapeDtypeStruct((n, h_last, w_last), jnp.float32),
            grid=(n,),
            in_specs=in_specs,
            out_specs=pl.BlockSpec((1, h_last, w_last), lambda b: (b, 0, 0)),
            compiler_params=pltpu.CompilerParams(
                dimension_semantics=("parallel",),
                vmem_limit_bytes=vmem_limit),
        )(*ops)
        return out.reshape(n, 1, h_last, w_last)

    return pack_params, forward


# -------------------------------- parameters ------------------------------- #

def init_critic_params(key, channels_img, features_c, img_size, n_cond):
    H, W = img_size
    keys = iter(jax.random.split(key, 32))

    def nrm(shape, scale):
        return (scale * jax.random.normal(next(keys), shape)).astype(jnp.float32)

    params = {
        "fc_w1": nrm((n_cond, 100), 0.3),
        "fc_b1": nrm((100,), 0.1),
        "fc_w2": nrm((100, H * W), 0.1),
        "fc_b2": nrm((H * W,), 0.1),
        "convs": [],
    }
    for (cin, cout, k, _s, _p, na, hb) in _critic_cfg(channels_img, features_c):
        layer = {"w": nrm((cout, cin, k, k), 0.05)}
        if na:
            layer["gamma"] = 1.0 + nrm((cout,), 0.1)
            layer["beta"] = nrm((cout,), 0.1)
        if hb:
            layer["bias"] = nrm((cout,), 0.1)
        params["convs"].append(layer)
    return params


# ------------------------- pure-JAX reference check ------------------------- #

def reference_forward(params, x, cond, channels_img, features_c, img_size):
    """XLA reference, numerically faithful to the PyTorch module."""
    H, W = img_size
    n = x.shape[0]
    hi = jnp.maximum(
        jnp.dot(cond, params["fc_w1"], precision=jax.lax.Precision.HIGHEST)
        + params["fc_b1"], 0.0)
    plane = (jnp.dot(hi, params["fc_w2"], precision=jax.lax.Precision.HIGHEST)
             + params["fc_b2"]).reshape(n, 1, H, W)
    h = jnp.concatenate([x, plane], axis=1)
    for lpar, (cin, cout, k, s, pad, na, hb) in zip(
            params["convs"], _critic_cfg(channels_img, features_c)):
        y = jax.lax.conv_general_dilated(
            h, lpar["w"], window_strides=(s, s),
            padding=[(pad, pad), (pad, pad)],
            dimension_numbers=("NCHW", "OIHW", "NCHW"),
            precision=jax.lax.Precision.HIGHEST)
        if hb:
            y = y + lpar["bias"].reshape(1, -1, 1, 1)
        if na:
            mu = jnp.mean(y, axis=(2, 3), keepdims=True)
            var = jnp.mean((y - mu) ** 2, axis=(2, 3), keepdims=True)
            y = (y - mu) * jax.lax.rsqrt(var + 1e-5)
            y = (y * lpar["gamma"].reshape(1, -1, 1, 1)
                 + lpar["beta"].reshape(1, -1, 1, 1))
            y = jnp.where(y > 0, y, 0.2 * y)
        h = y
    return h


# ----------------------------------- main ----------------------------------- #

if __name__ == "__main__":
    key = jax.random.PRNGKey(0)
    k_par, k_x, k_c = jax.random.split(key, 3)

    batch = 2
    channels_img = 3
    features_c = 4
    img_size = (16, 16)   # small, instead of the default [64, 50]
    n_cond = 1

    params = init_critic_params(k_par, channels_img, features_c,
                                img_size, n_cond)
    x = jax.random.normal(
        k_x, (batch, channels_img, img_size[0], img_size[1]),
        dtype=jnp.float32)
    cond = jax.random.normal(k_c, (batch, n_cond), dtype=jnp.float32)

    pack_params, forward = make_critic_forward(channels_img, features_c,
                                               img_size, n_cond)
    packed = pack_params(params)          # one-time weight repacking
    fwd = jax.jit(forward)
    out = fwd(packed, x, cond)
    jax.block_until_ready(out)

    # Expected output shape for 16x16 input: (batch, 1, 1, 1)
    assert out.shape == (batch, 1, 1, 1), out.shape

    ref = reference_forward(params, x, cond, channels_img, features_c,
                            img_size)
    err = float(jnp.max(jnp.abs(out - ref)))
    # bf16 MXU operands vs a Precision.HIGHEST reference -> small rounding.
    assert err < 5e-2, f"max abs error vs reference: {err}"

    print("KERNEL_OK")
</pallas_src>

<mosaic_0001>
module attributes {stable_mosaic.version = 11 : i64} {
  func.func @_critic_kernel(%arg0: i32, %arg1: memref<1x16x64xbf16, #tpu.memory_space<vmem>>, %arg2: memref<3x8x16xf32, #tpu.memory_space<vmem>>, %arg3: memref<64x192xbf16, #tpu.memory_space<vmem>>, %arg4: memref<64x8xf32, #tpu.memory_space<vmem>>, %arg5: memref<8x64xf32, #tpu.memory_space<vmem>>, %arg6: memref<1x64xf32, #tpu.memory_space<vmem>>, %arg7: memref<1x64xf32, #tpu.memory_space<vmem>>, %arg8: memref<4x4x8xf32, #tpu.memory_space<vmem>>, %arg9: memref<64x256xbf16, #tpu.memory_space<vmem>>, %arg10: memref<64x16xf32, #tpu.memory_space<vmem>>, %arg11: memref<16x64xf32, #tpu.memory_space<vmem>>, %arg12: memref<1x64xf32, #tpu.memory_space<vmem>>, %arg13: memref<1x64xf32, #tpu.memory_space<vmem>>, %arg14: memref<4x2x4xf32, #tpu.memory_space<vmem>>, %arg15: memref<64x256xbf16, #tpu.memory_space<vmem>>, %arg16: memref<64x32xf32, #tpu.memory_space<vmem>>, %arg17: memref<32x64xf32, #tpu.memory_space<vmem>>, %arg18: memref<1x64xf32, #tpu.memory_space<vmem>>, %arg19: memref<1x64xf32, #tpu.memory_space<vmem>>, %arg20: memref<3x2x2xf32, #tpu.memory_space<vmem>>, %arg21: memref<64x384xbf16, #tpu.memory_space<vmem>>, %arg22: memref<128x64xf32, #tpu.memory_space<vmem>>, %arg23: memref<64x128xf32, #tpu.memory_space<vmem>>, %arg24: memref<1x128xf32, #tpu.memory_space<vmem>>, %arg25: memref<1x128xf32, #tpu.memory_space<vmem>>, %arg26: memref<4x1x2xf32, #tpu.memory_space<vmem>>, %arg27: memref<128x4xbf16, #tpu.memory_space<vmem>>, %arg28: memref<1x1xf32, #tpu.memory_space<vmem>>, %arg29: memref<1x1x1xf32, #tpu.memory_space<vmem>>) attributes {dimension_semantics = [#tpu.dimension_semantics<parallel>], iteration_bounds = array<i64: 2>, scalar_prefetch = 0 : i64, scratch_operands = 0 : i64, tpu.core_type = #tpu.core_type<tc>, window_params = [{transform_indices = @transform_0, window_bounds = array<i64: 1, 16, 64>}, {pipeline_mode = #tpu.pipeline_mode<synchronous>, transform_indices = @transform_1, window_bounds = array<i64: 3, 8, 16>}, {pipeline_mode = #tpu.pipeline_mode<synchronous>, transform_indices = @transform_2, window_bounds = array<i64: 64, 192>}, {pipeline_mode = #tpu.pipeline_mode<synchronous>, transform_indices = @transform_3, window_bounds = array<i64: 64, 8>}, {pipeline_mode = #tpu.pipeline_mode<synchronous>, transform_indices = @transform_4, window_bounds = array<i64: 8, 64>}, {pipeline_mode = #tpu.pipeline_mode<synchronous>, transform_indices = @transform_5, window_bounds = array<i64: 1, 64>}, {pipeline_mode = #tpu.pipeline_mode<synchronous>, transform_indices = @transform_6, window_bounds = array<i64: 1, 64>}, {pipeline_mode = #tpu.pipeline_mode<synchronous>, transform_indices = @transform_7, window_bounds = array<i64: 4, 4, 8>}, {pipeline_mode = #tpu.pipeline_mode<synchronous>, transform_indices = @transform_8, window_bounds = array<i64: 64, 256>}, {pipeline_mode = #tpu.pipeline_mode<synchronous>, transform_indices = @transform_9, window_bounds = array<i64: 64, 16>}, {pipeline_mode = #tpu.pipeline_mode<synchronous>, transform_indices = @transform_10, window_bounds = array<i64: 16, 64>}, {pipeline_mode = #tpu.pipeline_mode<synchronous>, transform_indices = @transform_11, window_bounds = array<i64: 1, 64>}, {pipeline_mode = #tpu.pipeline_mode<synchronous>, transform_indices = @transform_12, window_bounds = array<i64: 1, 64>}, {pipeline_mode = #tpu.pipeline_mode<synchronous>, transform_indices = @transform_13, window_bounds = array<i64: 4, 2, 4>}, {pipeline_mode = #tpu.pipeline_mode<synchronous>, transform_indices = @transform_14, window_bounds = array<i64: 64, 256>}, {pipeline_mode = #tpu.pipeline_mode<synchronous>, transform_indices = @transform_15, window_bounds = array<i64: 64, 32>}, {pipeline_mode = #tpu.pipeline_mode<synchronous>, transform_indices = @transform_16, window_bounds = array<i64: 32, 64>}, {pipeline_mode = #tpu.pipeline_mode<synchronous>, transform_indices = @transform_17, window_bounds = array<i64: 1, 64>}, {pipeline_mode = #tpu.pipeline_mode<synchronous>, transform_indices = @transform_18, window_bounds = array<i64: 1, 64>}, {pipeline_mode = #tpu.pipeline_mode<synchronous>, transform_indices = @transform_19, window_bounds = array<i64: 3, 2, 2>}, {pipeline_mode = #tpu.pipeline_mode<synchronous>, transform_indices = @transform_20, window_bounds = array<i64: 64, 384>}, {pipeline_mode = #tpu.pipeline_mode<synchronous>, transform_indices = @transform_21, window_bounds = array<i64: 128, 64>}, {pipeline_mode = #tpu.pipeline_mode<synchronous>, transform_indices = @transform_22, window_bounds = array<i64: 64, 128>}, {pipeline_mode = #tpu.pipeline_mode<synchronous>, transform_indices = @transform_23, window_bounds = array<i64: 1, 128>}, {pipeline_mode = #tpu.pipeline_mode<synchronous>, transform_indices = @transform_24, window_bounds = array<i64: 1, 128>}, {pipeline_mode = #tpu.pipeline_mode<synchronous>, transform_indices = @transform_25, window_bounds = array<i64: 4, 1, 2>}, {pipeline_mode = #tpu.pipeline_mode<synchronous>, transform_indices = @transform_26, window_bounds = array<i64: 128, 4>}, {pipeline_mode = #tpu.pipeline_mode<synchronous>, transform_indices = @transform_27, window_bounds = array<i64: 1, 1>}, {transform_indices = @transform_28, window_bounds = array<i64: 1, 1, 1>}]} {
    %c0 = arith.constant 0 : index
    %c0_0 = arith.constant 0 : index
    %c0_1 = arith.constant 0 : index
    %0 = vector.load %arg1[%c0, %c0_0, %c0_1] : memref<1x16x64xbf16, #tpu.memory_space<vmem>>, vector<1x16x64xbf16>
    %1 = vector.shape_cast %0 : vector<1x16x64xbf16> to vector<16x64xbf16>
    %c0_2 = arith.constant 0 : index
    %c0_3 = arith.constant 0 : index
    %2 = vector.load %arg3[%c0_2, %c0_3] : memref<64x192xbf16, #tpu.memory_space<vmem>>, vector<64x192xbf16>
    %cst = arith.constant dense<0.000000e+00> : vector<16x192xf32>
    %3 = tpu.matmul %1, %2, %cst {dimension_numbers = #tpu.dot_dimension_numbers<[1], [0], [0], [1], [0, 0, 1, 1], [], []>} : vector<16x64xbf16>, vector<64x192xbf16>, vector<16x192xf32> -> vector<16x192xf32>
    %4 = vector.extract_strided_slice %3 {offsets = [0, 0], sizes = [16, 64], strides = [1, 1]} : vector<16x192xf32> to vector<16x64xf32>
    %c0_4 = arith.constant 0 : index
    %c0_5 = arith.constant 0 : index
    %c0_6 = arith.constant 0 : index
    %5 = vector.load %arg2[%c0_4, %c0_5, %c0_6] : memref<3x8x16xf32, #tpu.memory_space<vmem>>, vector<1x8x16xf32>
    %6 = vector.shape_cast %5 : vector<1x8x16xf32> to vector<8x16xf32>
    %cst_7 = arith.constant dense<0.000000e+00> : vector<8x64xf32>
    %7 = tpu.matmul %6, %4, %cst_7 {dimension_numbers = #tpu.dot_dimension_numbers<[1], [0], [0], [1], [0, 0, 1, 1], [], []>} : vector<8x16xf32>, vector<16x64xf32>, vector<8x64xf32> -> vector<8x64xf32>
    %8 = vector.extract_strided_slice %3 {offsets = [0, 64], sizes = [16, 64], strides = [1, 1]} : vector<16x192xf32> to vector<16x64xf32>
    %c1 = arith.constant 1 : index
    %c0_8 = arith.constant 0 : index
    %c0_9 = arith.constant 0 : index
    %9 = vector.load %arg2[%c1, %c0_8, %c0_9] : memref<3x8x16xf32, #tpu.memory_space<vmem>>, vector<1x8x16xf32>
    %10 = vector.shape_cast %9 : vector<1x8x16xf32> to vector<8x16xf32>
    %cst_10 = arith.constant dense<0.000000e+00> : vector<8x64xf32>
    %11 = tpu.matmul %10, %8, %cst_10 {dimension_numbers = #tpu.dot_dimension_numbers<[1], [0], [0], [1], [0, 0, 1, 1], [], []>} : vector<8x16xf32>, vector<16x64xf32>, vector<8x64xf32> -> vector<8x64xf32>
    %12 = arith.addf %7, %11 : vector<8x64xf32>
    %13 = vector.extract_strided_slice %3 {offsets = [0, 128], sizes = [16, 64], strides = [1, 1]} : vector<16x192xf32> to vector<16x64xf32>
    %c2 = arith.constant 2 : index
    %c0_11 = arith.constant 0 : index
    %c0_12 = arith.constant 0 : index
    %14 = vector.load %arg2[%c2, %c0_11, %c0_12] : memref<3x8x16xf32, #tpu.memory_space<vmem>>, vector<1x8x16xf32>
    %15 = vector.shape_cast %14 : vector<1x8x16xf32> to vector<8x16xf32>
    %cst_13 = arith.constant dense<0.000000e+00> : vector<8x64xf32>
    %16 = tpu.matmul %15, %13, %cst_13 {dimension_numbers = #tpu.dot_dimension_numbers<[1], [0], [0], [1], [0, 0, 1, 1], [], []>} : vector<8x16xf32>, vector<16x64xf32>, vector<8x64xf32> -> vector<8x64xf32>
    %17 = arith.addf %12, %16 : vector<8x64xf32>
    %cst_14 = arith.constant dense<0.000000e+00> : vector<64xf32>
    %18 = vector.multi_reduction <add>, %17, %cst_14 [0] : vector<8x64xf32> to vector<64xf32>
    %19 = vector.shape_cast %18 : vector<64xf32> to vector<1x64xf32>
    %c0_15 = arith.constant 0 : index
    %c0_16 = arith.constant 0 : index
    %20 = vector.load %arg4[%c0_15, %c0_16] : memref<64x8xf32, #tpu.memory_space<vmem>>, vector<64x8xf32>
    %cst_17 = arith.constant dense<0.000000e+00> : vector<1x8xf32>
    %21 = tpu.matmul %19, %20, %cst_17 {dimension_numbers = #tpu.dot_dimension_numbers<[1], [0], [0], [1], [0, 0, 1, 1], [], []>} : vector<1x64xf32>, vector<64x8xf32>, vector<1x8xf32> -> vector<1x8xf32>
    %cst_18 = arith.constant 1.562500e-02 : f32
    %22 = vector.broadcast %cst_18 : f32 to vector<1x8xf32>
    %23 = arith.mulf %21, %22 : vector<1x8xf32>
    %c0_19 = arith.constant 0 : index
    %c0_20 = arith.constant 0 : index
    %24 = vector.load %arg5[%c0_19, %c0_20] : memref<8x64xf32, #tpu.memory_space<vmem>>, vector<8x64xf32>
    %cst_21 = arith.constant dense<0.000000e+00> : vector<1x64xf32>
    %25 = tpu.matmul %23, %24, %cst_21 {dimension_numbers = #tpu.dot_dimension_numbers<[1], [0], [0], [1], [0, 0, 1, 1], [], []>} : vector<1x8xf32>, vector<8x64xf32>, vector<1x64xf32> -> vector<1x64xf32>
    %26 = vector.broadcast %25 : vector<1x64xf32> to vector<8x64xf32>
    %27 = arith.subf %17, %26 : vector<8x64xf32>
    %28 = arith.mulf %27, %27 : vector<8x64xf32>
    %cst_22 = arith.constant dense<0.000000e+00> : vector<64xf32>
    %29 = vector.multi_reduction <add>, %28, %cst_22 [0] : vector<8x64xf32> to vector<64xf32>
    %30 = vector.shape_cast %29 : vector<64xf32> to vector<1x64xf32>
    %c0_23 = arith.constant 0 : index
    %c0_24 = arith.constant 0 : index
    %31 = vector.load %arg4[%c0_23, %c0_24] : memref<64x8xf32, #tpu.memory_space<vmem>>, vector<64x8xf32>
    %cst_25 = arith.constant dense<0.000000e+00> : vector<1x8xf32>
    %32 = tpu.matmul %30, %31, %cst_25 {dimension_numbers = #tpu.dot_dimension_numbers<[1], [0], [0], [1], [0, 0, 1, 1], [], []>} : vector<1x64xf32>, vector<64x8xf32>, vector<1x8xf32> -> vector<1x8xf32>
    %cst_26 = arith.constant 1.562500e-02 : f32
    %33 = vector.broadcast %cst_26 : f32 to vector<1x8xf32>
    %34 = arith.mulf %32, %33 : vector<1x8xf32>
    %cst_27 = arith.constant 9.99999974E-6 : f32
    %35 = vector.broadcast %cst_27 : f32 to vector<1x8xf32>
    %36 = arith.addf %34, %35 : vector<1x8xf32>
    %37 = math.rsqrt %36 : vector<1x8xf32>
    %c0_28 = arith.constant 0 : index
    %c0_29 = arith.constant 0 : index
    %38 = vector.load %arg5[%c0_28, %c0_29] : memref<8x64xf32, #tpu.memory_space<vmem>>, vector<8x64xf32>
    %cst_30 = arith.constant dense<0.000000e+00> : vector<1x64xf32>
    %39 = tpu.matmul %37, %38, %cst_30 {dimension_numbers = #tpu.dot_dimension_numbers<[1], [0], [0], [1], [0, 0, 1, 1], [], []>} : vector<1x8xf32>, vector<8x64xf32>, vector<1x64xf32> -> vector<1x64xf32>
    %40 = vector.broadcast %39 : vector<1x64xf32> to vector<8x64xf32>
    %41 = arith.mulf %27, %40 : vector<8x64xf32>
    %c0_31 = arith.constant 0 : index
    %c0_32 = arith.constant 0 : index
    %42 = vector.load %arg6[%c0_31, %c0_32] : memref<1x64xf32, #tpu.memory_space<vmem>>, vector<1x64xf32>
    %43 = vector.broadcast %42 : vector<1x64xf32> to vector<8x64xf32>
    %44 = arith.mulf %41, %43 : vector<8x64xf32>
    %c0_33 = arith.constant 0 : index
    %c0_34 = arith.constant 0 : index
    %45 = vector.load %arg7[%c0_33, %c0_34] : memref<1x64xf32, #tpu.memory_space<vmem>>, vector<1x64xf32>
    %46 = vector.broadcast %45 : vector<1x64xf32> to vector<8x64xf32>
    %47 = arith.addf %44, %46 : vector<8x64xf32>
    %cst_35 = arith.constant 2.000000e-01 : f32
    %48 = vector.broadcast %cst_35 : f32 to vector<8x64xf32>
    %49 = arith.mulf %48, %47 : vector<8x64xf32>
    %50 = arith.maximumf %47, %49 : vector<8x64xf32>
    %51 = arith.truncf %50 : vector<8x64xf32> to vector<8x64xbf16>
    %c0_36 = arith.constant 0 : index
    %c0_37 = arith.constant 0 : index
    %52 = vector.load %arg9[%c0_36, %c0_37] : memref<64x256xbf16, #tpu.memory_space<vmem>>, vector<64x256xbf16>
    %cst_38 = arith.constant dense<0.000000e+00> : vector<8x256xf32>
    %53 = tpu.matmul %51, %52, %cst_38 {dimension_numbers = #tpu.dot_dimension_numbers<[1], [0], [0], [1], [0, 0, 1, 1], [], []>} : vector<8x64xbf16>, vector<64x256xbf16>, vector<8x256xf32> -> vector<8x256xf32>
    %54 = vector.extract_strided_slice %53 {offsets = [0, 0], sizes = [8, 64], strides = [1, 1]} : vector<8x256xf32> to vector<8x64xf32>
    %c0_39 = arith.constant 0 : index
    %c0_40 = arith.constant 0 : index
    %c0_41 = arith.constant 0 : index
    %55 = vector.load %arg8[%c0_39, %c0_40, %c0_41] : memref<4x4x8xf32, #tpu.memory_space<vmem>>, vector<1x4x8xf32>
    %56 = vector.shape_cast %55 : vector<1x4x8xf32> to vector<4x8xf32>
    %cst_42 = arith.constant dense<0.000000e+00> : vector<4x64xf32>
    %57 = tpu.matmul %56, %54, %cst_42 {dimension_numbers = #tpu.dot_dimension_numbers<[1], [0], [0], [1], [0, 0, 1, 1], [], []>} : vector<4x8xf32>, vector<8x64xf32>, vector<4x64xf32> -> vector<4x64xf32>
    %58 = vector.extract_strided_slice %53 {offsets = [0, 64], sizes = [8, 64], strides = [1, 1]} : vector<8x256xf32> to vector<8x64xf32>
    %c1_43 = arith.constant 1 : index
    %c0_44 = arith.constant 0 : index
    %c0_45 = arith.constant 0 : index
    %59 = vector.load %arg8[%c1_43, %c0_44, %c0_45] : memref<4x4x8xf32, #tpu.memory_space<vmem>>, vector<1x4x8xf32>
    %60 = vector.shape_cast %59 : vector<1x4x8xf32> to vector<4x8xf32>
    %cst_46 = arith.constant dense<0.000000e+00> : vector<4x64xf32>
    %61 = tpu.matmul %60, %58, %cst_46 {dimension_numbers = #tpu.dot_dimension_numbers<[1], [0], [0], [1], [0, 0, 1, 1], [], []>} : vector<4x8xf32>, vector<8x64xf32>, vector<4x64xf32> -> vector<4x64xf32>
    %62 = arith.addf %57, %61 : vector<4x64xf32>
    %63 = vector.extract_strided_slice %53 {offsets = [0, 128], sizes = [8, 64], strides = [1, 1]} : vector<8x256xf32> to vector<8x64xf32>
    %c2_47 = arith.constant 2 : index
    %c0_48 = arith.constant 0 : index
    %c0_49 = arith.constant 0 : index
    %64 = vector.load %arg8[%c2_47, %c0_48, %c0_49] : memref<4x4x8xf32, #tpu.memory_space<vmem>>, vector<1x4x8xf32>
    %65 = vector.shape_cast %64 : vector<1x4x8xf32> to vector<4x8xf32>
    %cst_50 = arith.constant dense<0.000000e+00> : vector<4x64xf32>
    %66 = tpu.matmul %65, %63, %cst_50 {dimension_numbers = #tpu.dot_dimension_numbers<[1], [0], [0], [1], [0, 0, 1, 1], [], []>} : vector<4x8xf32>, vector<8x64xf32>, vector<4x64xf32> -> vector<4x64xf32>
    %67 = arith.addf %62, %66 : vector<4x64xf32>
    %68 = vector.extract_strided_slice %53 {offsets = [0, 192], sizes = [8, 64], strides = [1, 1]} : vector<8x256xf32> to vector<8x64xf32>
    %c3 = arith.constant 3 : index
    %c0_51 = arith.constant 0 : index
    %c0_52 = arith.constant 0 : index
    %69 = vector.load %arg8[%c3, %c0_51, %c0_52] : memref<4x4x8xf32, #tpu.memory_space<vmem>>, vector<1x4x8xf32>
    %70 = vector.shape_cast %69 : vector<1x4x8xf32> to vector<4x8xf32>
    %cst_53 = arith.constant dense<0.000000e+00> : vector<4x64xf32>
    %71 = tpu.matmul %70, %68, %cst_53 {dimension_numbers = #tpu.dot_dimension_numbers<[1], [0], [0], [1], [0, 0, 1, 1], [], []>} : vector<4x8xf32>, vector<8x64xf32>, vector<4x64xf32> -> vector<4x64xf32>
    %72 = arith.addf %67, %71 : vector<4x64xf32>
    %cst_54 = arith.constant dense<0.000000e+00> : vector<64xf32>
    %73 = vector.multi_reduction <add>, %72, %cst_54 [0] : vector<4x64xf32> to vector<64xf32>
    %74 = vector.shape_cast %73 : vector<64xf32> to vector<1x64xf32>
    %c0_55 = arith.constant 0 : index
    %c0_56 = arith.constant 0 : index
    %75 = vector.load %arg10[%c0_55, %c0_56] : memref<64x16xf32, #tpu.memory_space<vmem>>, vector<64x16xf32>
    %cst_57 = arith.constant dense<0.000000e+00> : vector<1x16xf32>
    %76 = tpu.matmul %74, %75, %cst_57 {dimension_numbers = #tpu.dot_dimension_numbers<[1], [0], [0], [1], [0, 0, 1, 1], [], []>} : vector<1x64xf32>, vector<64x16xf32>, vector<1x16xf32> -> vector<1x16xf32>
    %cst_58 = arith.constant 6.250000e-02 : f32
    %77 = vector.broadcast %cst_58 : f32 to vector<1x16xf32>
    %78 = arith.mulf %76, %77 : vector<1x16xf32>
    %c0_59 = arith.constant 0 : index
    %c0_60 = arith.constant 0 : index
    %79 = vector.load %arg11[%c0_59, %c0_60] : memref<16x64xf32, #tpu.memory_space<vmem>>, vector<16x64xf32>
    %cst_61 = arith.constant dense<0.000000e+00> : vector<1x64xf32>
    %80 = tpu.matmul %78, %79, %cst_61 {dimension_numbers = #tpu.dot_dimension_numbers<[1], [0], [0], [1], [0, 0, 1, 1], [], []>} : vector<1x16xf32>, vector<16x64xf32>, vector<1x64xf32> -> vector<1x64xf32>
    %81 = vector.broadcast %80 : vector<1x64xf32> to vector<4x64xf32>
    %82 = arith.subf %72, %81 : vector<4x64xf32>
    %83 = arith.mulf %82, %82 : vector<4x64xf32>
    %cst_62 = arith.constant dense<0.000000e+00> : vector<64xf32>
    %84 = vector.multi_reduction <add>, %83, %cst_62 [0] : vector<4x64xf32> to vector<64xf32>
    %85 = vector.shape_cast %84 : vector<64xf32> to vector<1x64xf32>
    %c0_63 = arith.constant 0 : index
    %c0_64 = arith.constant 0 : index
    %86 = vector.load %arg10[%c0_63, %c0_64] : memref<64x16xf32, #tpu.memory_space<vmem>>, vector<64x16xf32>
    %cst_65 = arith.constant dense<0.000000e+00> : vector<1x16xf32>
    %87 = tpu.matmul %85, %86, %cst_65 {dimension_numbers = #tpu.dot_dimension_numbers<[1], [0], [0], [1], [0, 0, 1, 1], [], []>} : vector<1x64xf32>, vector<64x16xf32>, vector<1x16xf32> -> vector<1x16xf32>
    %cst_66 = arith.constant 6.250000e-02 : f32
    %88 = vector.broadcast %cst_66 : f32 to vector<1x16xf32>
    %89 = arith.mulf %87, %88 : vector<1x16xf32>
    %cst_67 = arith.constant 9.99999974E-6 : f32
    %90 = vector.broadcast %cst_67 : f32 to vector<1x16xf32>
    %91 = arith.addf %89, %90 : vector<1x16xf32>
    %92 = math.rsqrt %91 : vector<1x16xf32>
    %c0_68 = arith.constant 0 : index
    %c0_69 = arith.constant 0 : index
    %93 = vector.load %arg11[%c0_68, %c0_69] : memref<16x64xf32, #tpu.memory_space<vmem>>, vector<16x64xf32>
    %cst_70 = arith.constant dense<0.000000e+00> : vector<1x64xf32>
    %94 = tpu.matmul %92, %93, %cst_70 {dimension_numbers = #tpu.dot_dimension_numbers<[1], [0], [0], [1], [0, 0, 1, 1], [], []>} : vector<1x16xf32>, vector<16x64xf32>, vector<1x64xf32> -> vector<1x64xf32>
    %95 = vector.broadcast %94 : vector<1x64xf32> to vector<4x64xf32>
    %96 = arith.mulf %82, %95 : vector<4x64xf32>
    %c0_71 = arith.constant 0 : index
    %c0_72 = arith.constant 0 : index
    %97 = vector.load %arg12[%c0_71, %c0_72] : memref<1x64xf32, #tpu.memory_space<vmem>>, vector<1x64xf32>
    %98 = vector.broadcast %97 : vector<1x64xf32> to vector<4x64xf32>
    %99 = arith.mulf %96, %98 : vector<4x64xf32>
    %c0_73 = arith.constant 0 : index
    %c0_74 = arith.constant 0 : index
    %100 = vector.load %arg13[%c0_73, %c0_74] : memref<1x64xf32, #tpu.memory_space<vmem>>, vector<1x64xf32>
    %101 = vector.broadcast %100 : vector<1x64xf32> to vector<4x64xf32>
    %102 = arith.addf %99, %101 : vector<4x64xf32>
    %cst_75 = arith.constant 2.000000e-01 : f32
    %103 = vector.broadcast %cst_75 : f32 to vector<4x64xf32>
    %104 = arith.mulf %103, %102 : vector<4x64xf32>
    %105 = arith.maximumf %102, %104 : vector<4x64xf32>
    %106 = arith.truncf %105 : vector<4x64xf32> to vector<4x64xbf16>
    %c0_76 = arith.constant 0 : index
    %c0_77 = arith.constant 0 : index
    %107 = vector.load %arg15[%c0_76, %c0_77] : memref<64x256xbf16, #tpu.memory_space<vmem>>, vector<64x256xbf16>
    %cst_78 = arith.constant dense<0.000000e+00> : vector<4x256xf32>
    %108 = tpu.matmul %106, %107, %cst_78 {dimension_numbers = #tpu.dot_dimension_numbers<[1], [0], [0], [1], [0, 0, 1, 1], [], []>} : vector<4x64xbf16>, vector<64x256xbf16>, vector<4x256xf32> -> vector<4x256xf32>
    %109 = vector.extract_strided_slice %108 {offsets = [0, 0], sizes = [4, 64], strides = [1, 1]} : vector<4x256xf32> to vector<4x64xf32>
    %c0_79 = arith.constant 0 : index
    %c0_80 = arith.constant 0 : index
    %c0_81 = arith.constant 0 : index
    %110 = vector.load %arg14[%c0_79, %c0_80, %c0_81] : memref<4x2x4xf32, #tpu.memory_space<vmem>>, vector<1x2x4xf32>
    %111 = vector.shape_cast %110 : vector<1x2x4xf32> to vector<2x4xf32>
    %cst_82 = arith.constant dense<0.000000e+00> : vector<2x64xf32>
    %112 = tpu.matmul %111, %109, %cst_82 {dimension_numbers = #tpu.dot_dimension_numbers<[1], [0], [0], [1], [0, 0, 1, 1], [], []>} : vector<2x4xf32>, vector<4x64xf32>, vector<2x64xf32> -> vector<2x64xf32>
    %113 = vector.extract_strided_slice %108 {offsets = [0, 64], sizes = [4, 64], strides = [1, 1]} : vector<4x256xf32> to vector<4x64xf32>
    %c1_83 = arith.constant 1 : index
    %c0_84 = arith.constant 0 : index
    %c0_85 = arith.constant 0 : index
    %114 = vector.load %arg14[%c1_83, %c0_84, %c0_85] : memref<4x2x4xf32, #tpu.memory_space<vmem>>, vector<1x2x4xf32>
    %115 = vector.shape_cast %114 : vector<1x2x4xf32> to vector<2x4xf32>
    %cst_86 = arith.constant dense<0.000000e+00> : vector<2x64xf32>
    %116 = tpu.matmul %115, %113, %cst_86 {dimension_numbers = #tpu.dot_dimension_numbers<[1], [0], [0], [1], [0, 0, 1, 1], [], []>} : vector<2x4xf32>, vector<4x64xf32>, vector<2x64xf32> -> vector<2x64xf32>
    %117 = arith.addf %112, %116 : vector<2x64xf32>
    %118 = vector.extract_strided_slice %108 {offsets = [0, 128], sizes = [4, 64], strides = [1, 1]} : vector<4x256xf32> to vector<4x64xf32>
    %c2_87 = arith.constant 2 : index
    %c0_88 = arith.constant 0 : index
    %c0_89 = arith.constant 0 : index
    %119 = vector.load %arg14[%c2_87, %c0_88, %c0_89] : memref<4x2x4xf32, #tpu.memory_space<vmem>>, vector<1x2x4xf32>
    %120 = vector.shape_cast %119 : vector<1x2x4xf32> to vector<2x4xf32>
    %cst_90 = arith.constant dense<0.000000e+00> : vector<2x64xf32>
    %121 = tpu.matmul %120, %118, %cst_90 {dimension_numbers = #tpu.dot_dimension_numbers<[1], [0], [0], [1], [0, 0, 1, 1], [], []>} : vector<2x4xf32>, vector<4x64xf32>, vector<2x64xf32> -> vector<2x64xf32>
    %122 = arith.addf %117, %121 : vector<2x64xf32>
    %123 = vector.extract_strided_slice %108 {offsets = [0, 192], sizes = [4, 64], strides = [1, 1]} : vector<4x256xf32> to vector<4x64xf32>
    %c3_91 = arith.constant 3 : index
    %c0_92 = arith.constant 0 : index
    %c0_93 = arith.constant 0 : index
    %124 = vector.load %arg14[%c3_91, %c0_92, %c0_93] : memref<4x2x4xf32, #tpu.memory_space<vmem>>, vector<1x2x4xf32>
    %125 = vector.shape_cast %124 : vector<1x2x4xf32> to vector<2x4xf32>
    %cst_94 = arith.constant dense<0.000000e+00> : vector<2x64xf32>
    %126 = tpu.matmul %125, %123, %cst_94 {dimension_numbers = #tpu.dot_dimension_numbers<[1], [0], [0], [1], [0, 0, 1, 1], [], []>} : vector<2x4xf32>, vector<4x64xf32>, vector<2x64xf32> -> vector<2x64xf32>
    %127 = arith.addf %122, %126 : vector<2x64xf32>
    %cst_95 = arith.constant dense<0.000000e+00> : vector<64xf32>
    %128 = vector.multi_reduction <add>, %127, %cst_95 [0] : vector<2x64xf32> to vector<64xf32>
    %129 = vector.shape_cast %128 : vector<64xf32> to vector<1x64xf32>
    %c0_96 = arith.constant 0 : index
    %c0_97 = arith.constant 0 : index
    %130 = vector.load %arg16[%c0_96, %c0_97] : memref<64x32xf32, #tpu.memory_space<vmem>>, vector<64x32xf32>
    %cst_98 = arith.constant dense<0.000000e+00> : vector<1x32xf32>
    %131 = tpu.matmul %129, %130, %cst_98 {dimension_numbers = #tpu.dot_dimension_numbers<[1], [0], [0], [1], [0, 0, 1, 1], [], []>} : vector<1x64xf32>, vector<64x32xf32>, vector<1x32xf32> -> vector<1x32xf32>
    %cst_99 = arith.constant 2.500000e-01 : f32
    %132 = vector.broadcast %cst_99 : f32 to vector<1x32xf32>
    %133 = arith.mulf %131, %132 : vector<1x32xf32>
    %c0_100 = arith.constant 0 : index
    %c0_101 = arith.constant 0 : index
    %134 = vector.load %arg17[%c0_100, %c0_101] : memref<32x64xf32, #tpu.memory_space<vmem>>, vector<32x64xf32>
    %cst_102 = arith.constant dense<0.000000e+00> : vector<1x64xf32>
    %135 = tpu.matmul %133, %134, %cst_102 {dimension_numbers = #tpu.dot_dimension_numbers<[1], [0], [0], [1], [0, 0, 1, 1], [], []>} : vector<1x32xf32>, vector<32x64xf32>, vector<1x64xf32> -> vector<1x64xf32>
    %136 = vector.broadcast %135 : vector<1x64xf32> to vector<2x64xf32>
    %137 = arith.subf %127, %136 : vector<2x64xf32>
    %138 = arith.mulf %137, %137 : vector<2x64xf32>
    %cst_103 = arith.constant dense<0.000000e+00> : vector<64xf32>
    %139 = vector.multi_reduction <add>, %138, %cst_103 [0] : vector<2x64xf32> to vector<64xf32>
    %140 = vector.shape_cast %139 : vector<64xf32> to vector<1x64xf32>
    %c0_104 = arith.constant 0 : index
    %c0_105 = arith.constant 0 : index
    %141 = vector.load %arg16[%c0_104, %c0_105] : memref<64x32xf32, #tpu.memory_space<vmem>>, vector<64x32xf32>
    %cst_106 = arith.constant dense<0.000000e+00> : vector<1x32xf32>
    %142 = tpu.matmul %140, %141, %cst_106 {dimension_numbers = #tpu.dot_dimension_numbers<[1], [0], [0], [1], [0, 0, 1, 1], [], []>} : vector<1x64xf32>, vector<64x32xf32>, vector<1x32xf32> -> vector<1x32xf32>
    %cst_107 = arith.constant 2.500000e-01 : f32
    %143 = vector.broadcast %cst_107 : f32 to vector<1x32xf32>
    %144 = arith.mulf %142, %143 : vector<1x32xf32>
    %cst_108 = arith.constant 9.99999974E-6 : f32
    %145 = vector.broadcast %cst_108 : f32 to vector<1x32xf32>
    %146 = arith.addf %144, %145 : vector<1x32xf32>
    %147 = math.rsqrt %146 : vector<1x32xf32>
    %c0_109 = arith.constant 0 : index
    %c0_110 = arith.constant 0 : index
    %148 = vector.load %arg17[%c0_109, %c0_110] : memref<32x64xf32, #tpu.memory_space<vmem>>, vector<32x64xf32>
    %cst_111 = arith.constant dense<0.000000e+00> : vector<1x64xf32>
    %149 = tpu.matmul %147, %148, %cst_111 {dimension_numbers = #tpu.dot_dimension_numbers<[1], [0], [0], [1], [0, 0, 1, 1], [], []>} : vector<1x32xf32>, vector<32x64xf32>, vector<1x64xf32> -> vector<1x64xf32>
    %150 = vector.broadcast %149 : vector<1x64xf32> to vector<2x64xf32>
    %151 = arith.mulf %137, %150 : vector<2x64xf32>
    %c0_112 = arith.constant 0 : index
    %c0_113 = arith.constant 0 : index
    %152 = vector.load %arg18[%c0_112, %c0_113] : memref<1x64xf32, #tpu.memory_space<vmem>>, vector<1x64xf32>
    %153 = vector.broadcast %152 : vector<1x64xf32> to vector<2x64xf32>
    %154 = arith.mulf %151, %153 : vector<2x64xf32>
    %c0_114 = arith.constant 0 : index
    %c0_115 = arith.constant 0 : index
    %155 = vector.load %arg19[%c0_114, %c0_115] : memref<1x64xf32, #tpu.memory_space<vmem>>, vector<1x64xf32>
    %156 = vector.broadcast %155 : vector<1x64xf32> to vector<2x64xf32>
    %157 = arith.addf %154, %156 : vector<2x64xf32>
    %cst_116 = arith.constant 2.000000e-01 : f32
    %158 = vector.broadcast %cst_116 : f32 to vector<2x64xf32>
    %159 = arith.mulf %158, %157 : vector<2x64xf32>
    %160 = arith.maximumf %157, %159 : vector<2x64xf32>
    %161 = arith.truncf %160 : vector<2x64xf32> to vector<2x64xbf16>
    %c0_117 = arith.constant 0 : index
    %c0_118 = arith.constant 0 : index
    %162 = vector.load %arg21[%c0_117, %c0_118] : memref<64x384xbf16, #tpu.memory_space<vmem>>, vector<64x384xbf16>
    %cst_119 = arith.constant dense<0.000000e+00> : vector<2x384xf32>
    %163 = tpu.matmul %161, %162, %cst_119 {dimension_numbers = #tpu.dot_dimension_numbers<[1], [0], [0], [1], [0, 0, 1, 1], [], []>} : vector<2x64xbf16>, vector<64x384xbf16>, vector<2x384xf32> -> vector<2x384xf32>
    %164 = vector.extract_strided_slice %163 {offsets = [0, 0], sizes = [2, 128], strides = [1, 1]} : vector<2x384xf32> to vector<2x128xf32>
    %c0_120 = arith.constant 0 : index
    %c0_121 = arith.constant 0 : index
    %c0_122 = arith.constant 0 : index
    %165 = vector.load %arg20[%c0_120, %c0_121, %c0_122] : memref<3x2x2xf32, #tpu.memory_space<vmem>>, vector<1x2x2xf32>
    %166 = vector.shape_cast %165 : vector<1x2x2xf32> to vector<2x2xf32>
    %cst_123 = arith.constant dense<0.000000e+00> : vector<2x128xf32>
    %167 = tpu.matmul %166, %164, %cst_123 {dimension_numbers = #tpu.dot_dimension_numbers<[1], [0], [0], [1], [0, 0, 1, 1], [], []>} : vector<2x2xf32>, vector<2x128xf32>, vector<2x128xf32> -> vector<2x128xf32>
    %168 = vector.extract_strided_slice %163 {offsets = [0, 128], sizes = [2, 128], strides = [1, 1]} : vector<2x384xf32> to vector<2x128xf32>
    %c1_124 = arith.constant 1 : index
    %c0_125 = arith.constant 0 : index
    %c0_126 = arith.constant 0 : index
    %169 = vector.load %arg20[%c1_124, %c0_125, %c0_126] : memref<3x2x2xf32, #tpu.memory_space<vmem>>, vector<1x2x2xf32>
    %170 = vector.shape_cast %169 : vector<1x2x2xf32> to vector<2x2xf32>
    %cst_127 = arith.constant dense<0.000000e+00> : vector<2x128xf32>
    %171 = tpu.matmul %170, %168, %cst_127 {dimension_numbers = #tpu.dot_dimension_numbers<[1], [0], [0], [1], [0, 0, 1, 1], [], []>} : vector<2x2xf32>, vector<2x128xf32>, vector<2x128xf32> -> vector<2x128xf32>
    %172 = arith.addf %167, %171 : vector<2x128xf32>
    %173 = vector.extract_strided_slice %163 {offsets = [0, 256], sizes = [2, 128], strides = [1, 1]} : vector<2x384xf32> to vector<2x128xf32>
    %c2_128 = arith.constant 2 : index
    %c0_129 = arith.constant 0 : index
    %c0_130 = arith.constant 0 : index
    %174 = vector.load %arg20[%c2_128, %c0_129, %c0_130] : memref<3x2x2xf32, #tpu.memory_space<vmem>>, vector<1x2x2xf32>
    %175 = vector.shape_cast %174 : vector<1x2x2xf32> to vector<2x2xf32>
    %cst_131 = arith.constant dense<0.000000e+00> : vector<2x128xf32>
    %176 = tpu.matmul %175, %173, %cst_131 {dimension_numbers = #tpu.dot_dimension_numbers<[1], [0], [0], [1], [0, 0, 1, 1], [], []>} : vector<2x2xf32>, vector<2x128xf32>, vector<2x128xf32> -> vector<2x128xf32>
    %177 = arith.addf %172, %176 : vector<2x128xf32>
    %cst_132 = arith.constant dense<0.000000e+00> : vector<128xf32>
    %178 = vector.multi_reduction <add>, %177, %cst_132 [0] : vector<2x128xf32> to vector<128xf32>
    %179 = vector.shape_cast %178 : vector<128xf32> to vector<1x128xf32>
    %c0_133 = arith.constant 0 : index
    %c0_134 = arith.constant 0 : index
    %180 = vector.load %arg22[%c0_133, %c0_134] : memref<128x64xf32, #tpu.memory_space<vmem>>, vector<128x64xf32>
    %cst_135 = arith.constant dense<0.000000e+00> : vector<1x64xf32>
    %181 = tpu.matmul %179, %180, %cst_135 {dimension_numbers = #tpu.dot_dimension_numbers<[1], [0], [0], [1], [0, 0, 1, 1], [], []>} : vector<1x128xf32>, vector<128x64xf32>, vector<1x64xf32> -> vector<1x64xf32>
    %cst_136 = arith.constant 2.500000e-01 : f32
    %182 = vector.broadcast %cst_136 : f32 to vector<1x64xf32>
    %183 = arith.mulf %181, %182 : vector<1x64xf32>
    %c0_137 = arith.constant 0 : index
    %c0_138 = arith.constant 0 : index
    %184 = vector.load %arg23[%c0_137, %c0_138] : memref<64x128xf32, #tpu.memory_space<vmem>>, vector<64x128xf32>
    %cst_139 = arith.constant dense<0.000000e+00> : vector<1x128xf32>
    %185 = tpu.matmul %183, %184, %cst_139 {dimension_numbers = #tpu.dot_dimension_numbers<[1], [0], [0], [1], [0, 0, 1, 1], [], []>} : vector<1x64xf32>, vector<64x128xf32>, vector<1x128xf32> -> vector<1x128xf32>
    %186 = vector.broadcast %185 : vector<1x128xf32> to vector<2x128xf32>
    %187 = arith.subf %177, %186 : vector<2x128xf32>
    %188 = arith.mulf %187, %187 : vector<2x128xf32>
    %cst_140 = arith.constant dense<0.000000e+00> : vector<128xf32>
    %189 = vector.multi_reduction <add>, %188, %cst_140 [0] : vector<2x128xf32> to vector<128xf32>
    %190 = vector.shape_cast %189 : vector<128xf32> to vector<1x128xf32>
    %c0_141 = arith.constant 0 : index
    %c0_142 = arith.constant 0 : index
    %191 = vector.load %arg22[%c0_141, %c0_142] : memref<128x64xf32, #tpu.memory_space<vmem>>, vector<128x64xf32>
    %cst_143 = arith.constant dense<0.000000e+00> : vector<1x64xf32>
    %192 = tpu.matmul %190, %191, %cst_143 {dimension_numbers = #tpu.dot_dimension_numbers<[1], [0], [0], [1], [0, 0, 1, 1], [], []>} : vector<1x128xf32>, vector<128x64xf32>, vector<1x64xf32> -> vector<1x64xf32>
    %cst_144 = arith.constant 2.500000e-01 : f32
    %193 = vector.broadcast %cst_144 : f32 to vector<1x64xf32>
    %194 = arith.mulf %192, %193 : vector<1x64xf32>
    %cst_145 = arith.constant 9.99999974E-6 : f32
    %195 = vector.broadcast %cst_145 : f32 to vector<1x64xf32>
    %196 = arith.addf %194, %195 : vector<1x64xf32>
    %197 = math.rsqrt %196 : vector<1x64xf32>
    %c0_146 = arith.constant 0 : index
    %c0_147 = arith.constant 0 : index
    %198 = vector.load %arg23[%c0_146, %c0_147] : memref<64x128xf32, #tpu.memory_space<vmem>>, vector<64x128xf32>
    %cst_148 = arith.constant dense<0.000000e+00> : vector<1x128xf32>
    %199 = tpu.matmul %197, %198, %cst_148 {dimension_numbers = #tpu.dot_dimension_numbers<[1], [0], [0], [1], [0, 0, 1, 1], [], []>} : vector<1x64xf32>, vector<64x128xf32>, vector<1x128xf32> -> vector<1x128xf32>
    %200 = vector.broadcast %199 : vector<1x128xf32> to vector<2x128xf32>
    %201 = arith.mulf %187, %200 : vector<2x128xf32>
    %c0_149 = arith.constant 0 : index
    %c0_150 = arith.constant 0 : index
    %202 = vector.load %arg24[%c0_149, %c0_150] : memref<1x128xf32, #tpu.memory_space<vmem>>, vector<1x128xf32>
    %203 = vector.broadcast %202 : vector<1x128xf32> to vector<2x128xf32>
    %204 = arith.mulf %201, %203 : vector<2x128xf32>
    %c0_151 = arith.constant 0 : index
    %c0_152 = arith.constant 0 : index
    %205 = vector.load %arg25[%c0_151, %c0_152] : memref<1x128xf32, #tpu.memory_space<vmem>>, vector<1x128xf32>
    %206 = vector.broadcast %205 : vector<1x128xf32> to vector<2x128xf32>
    %207 = arith.addf %204, %206 : vector<2x128xf32>
    %cst_153 = arith.constant 2.000000e-01 : f32
    %208 = vector.broadcast %cst_153 : f32 to vector<2x128xf32>
    %209 = arith.mulf %208, %207 : vector<2x128xf32>
    %210 = arith.maximumf %207, %209 : vector<2x128xf32>
    %211 = arith.truncf %210 : vector<2x128xf32> to vector<2x128xbf16>
    %c0_154 = arith.constant 0 : index
    %c0_155 = arith.constant 0 : index
    %212 = vector.load %arg27[%c0_154, %c0_155] : memref<128x4xbf16, #tpu.memory_space<vmem>>, vector<128x4xbf16>
    %cst_156 = arith.constant dense<0.000000e+00> : vector<2x4xf32>
    %213 = tpu.matmul %211, %212, %cst_156 {dimension_numbers = #tpu.dot_dimension_numbers<[1], [0], [0], [1], [0, 0, 1, 1], [], []>} : vector<2x128xbf16>, vector<128x4xbf16>, vector<2x4xf32> -> vector<2x4xf32>
    %214 = vector.extract_strided_slice %213 {offsets = [0, 0], sizes = [2, 1], strides = [1, 1]} : vector<2x4xf32> to vector<2x1xf32>
    %c0_157 = arith.constant 0 : index
    %c0_158 = arith.constant 0 : index
    %c0_159 = arith.constant 0 : index
    %215 = vector.load %arg26[%c0_157, %c0_158, %c0_159] : memref<4x1x2xf32, #tpu.memory_space<vmem>>, vector<1x1x2xf32>
    %216 = vector.shape_cast %215 : vector<1x1x2xf32> to vector<1x2xf32>
    %cst_160 = arith.constant dense<0.000000e+00> : vector<1x1xf32>
    %217 = tpu.matmul %216, %214, %cst_160 {dimension_numbers = #tpu.dot_dimension_numbers<[1], [0], [0], [1], [0, 0, 1, 1], [], []>} : vector<1x2xf32>, vector<2x1xf32>, vector<1x1xf32> -> vector<1x1xf32>
    %218 = vector.extract_strided_slice %213 {offsets = [0, 1], sizes = [2, 1], strides = [1, 1]} : vector<2x4xf32> to vector<2x1xf32>
    %c1_161 = arith.constant 1 : index
    %c0_162 = arith.constant 0 : index
    %c0_163 = arith.constant 0 : index
    %219 = vector.load %arg26[%c1_161, %c0_162, %c0_163] : memref<4x1x2xf32, #tpu.memory_space<vmem>>, vector<1x1x2xf32>
    %220 = vector.shape_cast %219 : vector<1x1x2xf32> to vector<1x2xf32>
    %cst_164 = arith.constant dense<0.000000e+00> : vector<1x1xf32>
    %221 = tpu.matmul %220, %218, %cst_164 {dimension_numbers = #tpu.dot_dimension_numbers<[1], [0], [0], [1], [0, 0, 1, 1], [], []>} : vector<1x2xf32>, vector<2x1xf32>, vector<1x1xf32> -> vector<1x1xf32>
    %222 = arith.addf %217, %221 : vector<1x1xf32>
    %223 = vector.extract_strided_slice %213 {offsets = [0, 2], sizes = [2, 1], strides = [1, 1]} : vector<2x4xf32> to vector<2x1xf32>
    %c2_165 = arith.constant 2 : index
    %c0_166 = arith.constant 0 : index
    %c0_167 = arith.constant 0 : index
    %224 = vector.load %arg26[%c2_165, %c0_166, %c0_167] : memref<4x1x2xf32, #tpu.memory_space<vmem>>, vector<1x1x2xf32>
    %225 = vector.shape_cast %224 : vector<1x1x2xf32> to vector<1x2xf32>
    %cst_168 = arith.constant dense<0.000000e+00> : vector<1x1xf32>
    %226 = tpu.matmul %225, %223, %cst_168 {dimension_numbers = #tpu.dot_dimension_numbers<[1], [0], [0], [1], [0, 0, 1, 1], [], []>} : vector<1x2xf32>, vector<2x1xf32>, vector<1x1xf32> -> vector<1x1xf32>
    %227 = arith.addf %222, %226 : vector<1x1xf32>
    %228 = vector.extract_strided_slice %213 {offsets = [0, 3], sizes = [2, 1], strides = [1, 1]} : vector<2x4xf32> to vector<2x1xf32>
    %c3_169 = arith.constant 3 : index
    %c0_170 = arith.constant 0 : index
    %c0_171 = arith.constant 0 : index
    %229 = vector.load %arg26[%c3_169, %c0_170, %c0_171] : memref<4x1x2xf32, #tpu.memory_space<vmem>>, vector<1x1x2xf32>
    %230 = vector.shape_cast %229 : vector<1x1x2xf32> to vector<1x2xf32>
    %cst_172 = arith.constant dense<0.000000e+00> : vector<1x1xf32>
    %231 = tpu.matmul %230, %228, %cst_172 {dimension_numbers = #tpu.dot_dimension_numbers<[1], [0], [0], [1], [0, 0, 1, 1], [], []>} : vector<1x2xf32>, vector<2x1xf32>, vector<1x1xf32> -> vector<1x1xf32>
    %232 = arith.addf %227, %231 : vector<1x1xf32>
    %c0_173 = arith.constant 0 : index
    %c0_174 = arith.constant 0 : index
    %233 = vector.load %arg28[%c0_173, %c0_174] : memref<1x1xf32, #tpu.memory_space<vmem>>, vector<1x1xf32>
    %234 = arith.addf %232, %233 : vector<1x1xf32>
    %c0_175 = arith.constant 0 : index
    %c0_176 = arith.constant 0 : index
    %c0_177 = arith.constant 0 : index
    %235 = vector.load %arg29[%c0_175, %c0_176, %c0_177] : memref<1x1x1xf32, #tpu.memory_space<vmem>>, vector<1x1x1xf32>
    %236 = vector.shape_cast %235 : vector<1x1x1xf32> to vector<1x1xf32>
    %237 = vector.shape_cast %234 : vector<1x1xf32> to vector<1x1x1xf32>
    tpu.vector_store %arg29[%c0_175, %c0_176, %c0_177], %237 {strides = array<i32>} : memref<1x1x1xf32, #tpu.memory_space<vmem>>, vector<1x1x1xf32>,
    return
  }
  func.func @transform_0(%arg0: i32) -> (i32, i32, i32) {
    %c0_i32 = arith.constant 0 : i32
    %c0_i32_0 = arith.constant 0 : i32
    %c0_i32_1 = arith.constant 0 : i32
    return %arg0, %c0_i32, %c0_i32_0 : i32, i32, i32
  }
  func.func @transform_1(%arg0: i32) -> (i32, i32, i32) {
    %c0_i32 = arith.constant 0 : i32
    %c0_i32_0 = arith.constant 0 : i32
    %c0_i32_1 = arith.constant 0 : i32
    %c0_i32_2 = arith.constant 0 : i32
    return %c0_i32, %c0_i32_0, %c0_i32_1 : i32, i32, i32
  }
  func.func @transform_2(%arg0: i32) -> (i32, i32) {
    %c0_i32 = arith.constant 0 : i32
    %c0_i32_0 = arith.constant 0 : i32
    %c0_i32_1 = arith.constant 0 : i32
    return %c0_i32, %c0_i32_0 : i32, i32
  }
  func.func @transform_3(%arg0: i32) -> (i32, i32) {
    %c0_i32 = arith.constant 0 : i32
    %c0_i32_0 = arith.constant 0 : i32
    %c0_i32_1 = arith.constant 0 : i32
    return %c0_i32, %c0_i32_0 : i32, i32
  }
  func.func @transform_4(%arg0: i32) -> (i32, i32) {
    %c0_i32 = arith.constant 0 : i32
    %c0_i32_0 = arith.constant 0 : i32
    %c0_i32_1 = arith.constant 0 : i32
    return %c0_i32, %c0_i32_0 : i32, i32
  }
  func.func @transform_5(%arg0: i32) -> (i32, i32) {
    %c0_i32 = arith.constant 0 : i32
    %c0_i32_0 = arith.constant 0 : i32
    %c0_i32_1 = arith.constant 0 : i32
    return %c0_i32, %c0_i32_0 : i32, i32
  }
  func.func @transform_6(%arg0: i32) -> (i32, i32) {
    %c0_i32 = arith.constant 0 : i32
    %c0_i32_0 = arith.constant 0 : i32
    %c0_i32_1 = arith.constant 0 : i32
    return %c0_i32, %c0_i32_0 : i32, i32
  }
  func.func @transform_7(%arg0: i32) -> (i32, i32, i32) {
    %c0_i32 = arith.constant 0 : i32
    %c0_i32_0 = arith.constant 0 : i32
    %c0_i32_1 = arith.constant 0 : i32
    %c0_i32_2 = arith.constant 0 : i32
    return %c0_i32, %c0_i32_0, %c0_i32_1 : i32, i32, i32
  }
  func.func @transform_8(%arg0: i32) -> (i32, i32) {
    %c0_i32 = arith.constant 0 : i32
    %c0_i32_0 = arith.constant 0 : i32
    %c0_i32_1 = arith.constant 0 : i32
    return %c0_i32, %c0_i32_0 : i32, i32
  }
  func.func @transform_9(%arg0: i32) -> (i32, i32) {
    %c0_i32 = arith.constant 0 : i32
    %c0_i32_0 = arith.constant 0 : i32
    %c0_i32_1 = arith.constant 0 : i32
    return %c0_i32, %c0_i32_0 : i32, i32
  }
  func.func @transform_10(%arg0: i32) -> (i32, i32) {
    %c0_i32 = arith.constant 0 : i32
    %c0_i32_0 = arith.constant 0 : i32
    %c0_i32_1 = arith.constant 0 : i32
    return %c0_i32, %c0_i32_0 : i32, i32
  }
  func.func @transform_11(%arg0: i32) -> (i32, i32) {
    %c0_i32 = arith.constant 0 : i32
    %c0_i32_0 = arith.constant 0 : i32
    %c0_i32_1 = arith.constant 0 : i32
    return %c0_i32, %c0_i32_0 : i32, i32
  }
  func.func @transform_12(%arg0: i32) -> (i32, i32) {
    %c0_i32 = arith.constant 0 : i32
    %c0_i32_0 = arith.constant 0 : i32
    %c0_i32_1 = arith.constant 0 : i32
    return %c0_i32, %c0_i32_0 : i32, i32
  }
  func.func @transform_13(%arg0: i32) -> (i32, i32, i32) {
    %c0_i32 = arith.constant 0 : i32
    %c0_i32_0 = arith.constant 0 : i32
    %c0_i32_1 = arith.constant 0 : i32
    %c0_i32_2 = arith.constant 0 : i32
    return %c0_i32, %c0_i32_0, %c0_i32_1 : i32, i32, i32
  }
  func.func @transform_14(%arg0: i32) -> (i32, i32) {
    %c0_i32 = arith.constant 0 : i32
    %c0_i32_0 = arith.constant 0 : i32
    %c0_i32_1 = arith.constant 0 : i32
    return %c0_i32, %c0_i32_0 : i32, i32
  }
  func.func @transform_15(%arg0: i32) -> (i32, i32) {
    %c0_i32 = arith.constant 0 : i32
    %c0_i32_0 = arith.constant 0 : i32
    %c0_i32_1 = arith.constant 0 : i32
    return %c0_i32, %c0_i32_0 : i32, i32
  }
  func.func @transform_16(%arg0: i32) -> (i32, i32) {
    %c0_i32 = arith.constant 0 : i32
    %c0_i32_0 = arith.constant 0 : i32
    %c0_i32_1 = arith.constant 0 : i32
    return %c0_i32, %c0_i32_0 : i32, i32
  }
  func.func @transform_17(%arg0: i32) -> (i32, i32) {
    %c0_i32 = arith.constant 0 : i32
    %c0_i32_0 = arith.constant 0 : i32
    %c0_i32_1 = arith.constant 0 : i32
    return %c0_i32, %c0_i32_0 : i32, i32
  }
  func.func @transform_18(%arg0: i32) -> (i32, i32) {
    %c0_i32 = arith.constant 0 : i32
    %c0_i32_0 = arith.constant 0 : i32
    %c0_i32_1 = arith.constant 0 : i32
    return %c0_i32, %c0_i32_0 : i32, i32
  }
  func.func @transform_19(%arg0: i32) -> (i32, i32, i32) {
    %c0_i32 = arith.constant 0 : i32
    %c0_i32_0 = arith.constant 0 : i32
    %c0_i32_1 = arith.constant 0 : i32
    %c0_i32_2 = arith.constant 0 : i32
    return %c0_i32, %c0_i32_0, %c0_i32_1 : i32, i32, i32
  }
  func.func @transform_20(%arg0: i32) -> (i32, i32) {
    %c0_i32 = arith.constant 0 : i32
    %c0_i32_0 = arith.constant 0 : i32
    %c0_i32_1 = arith.constant 0 : i32
    return %c0_i32, %c0_i32_0 : i32, i32
  }
  func.func @transform_21(%arg0: i32) -> (i32, i32) {
    %c0_i32 = arith.constant 0 : i32
    %c0_i32_0 = arith.constant 0 : i32
    %c0_i32_1 = arith.constant 0 : i32
    return %c0_i32, %c0_i32_0 : i32, i32
  }
  func.func @transform_22(%arg0: i32) -> (i32, i32) {
    %c0_i32 = arith.constant 0 : i32
    %c0_i32_0 = arith.constant 0 : i32
    %c0_i32_1 = arith.constant 0 : i32
    return %c0_i32, %c0_i32_0 : i32, i32
  }
  func.func @transform_23(%arg0: i32) -> (i32, i32) {
    %c0_i32 = arith.constant 0 : i32
    %c0_i32_0 = arith.constant 0 : i32
    %c0_i32_1 = arith.constant 0 : i32
    return %c0_i32, %c0_i32_0 : i32, i32
  }
  func.func @transform_24(%arg0: i32) -> (i32, i32) {
    %c0_i32 = arith.constant 0 : i32
    %c0_i32_0 = arith.constant 0 : i32
    %c0_i32_1 = arith.constant 0 : i32
    return %c0_i32, %c0_i32_0 : i32, i32
  }
  func.func @transform_25(%arg0: i32) -> (i32, i32, i32) {
    %c0_i32 = arith.constant 0 : i32
    %c0_i32_0 = arith.constant 0 : i32
    %c0_i32_1 = arith.constant 0 : i32
    %c0_i32_2 = arith.constant 0 : i32
    return %c0_i32, %c0_i32_0, %c0_i32_1 : i32, i32, i32
  }
  func.func @transform_26(%arg0: i32) -> (i32, i32) {
    %c0_i32 = arith.constant 0 : i32
    %c0_i32_0 = arith.constant 0 : i32
    %c0_i32_1 = arith.constant 0 : i32
    return %c0_i32, %c0_i32_0 : i32, i32
  }
  func.func @transform_27(%arg0: i32) -> (i32, i32) {
    %c0_i32 = arith.constant 0 : i32
    %c0_i32_0 = arith.constant 0 : i32
    %c0_i32_1 = arith.constant 0 : i32
    return %c0_i32, %c0_i32_0 : i32, i32
  }
  func.func @transform_28(%arg0: i32) -> (i32, i32, i32) {
    %c0_i32 = arith.constant 0 : i32
    %c0_i32_0 = arith.constant 0 : i32
    %c0_i32_1 = arith.constant 0 : i32
    return %arg0, %c0_i32, %c0_i32_0 : i32, i32, i32
  }
}

</mosaic_0001>

<bundles_post_ra>
// kernel: forward.1
= control target key start
LH: loop header
LB: loop body
LE: loop exit
PB: predicated region body
PF: predicated region fallthrough
CT: control target
= control target key end

     0   :  { %s8385_s0 = inlined_call_operand.hbm [shape: bf16[2,16,64], index: 0, kind: input, shape index: {}]   ;;  %s8386_s1 = inlined_call_operand.hbm [shape: f32[3,8,16], index: 1, kind: input, shape index: {}]   ;;  %s8387_s2 = inlined_call_operand.hbm [shape: bf16[64,192], index: 2, kind: input, shape index: {}]   ;;  %s8388_s3 = inlined_call_operand.hbm [shape: f32[64,8], index: 3, kind: input, shape index: {}]   ;;  %s8389_s4 = inlined_call_operand.hbm [shape: f32[8,64], index: 4, kind: input, shape index: {}]   ;;  %s8390_s5 = inlined_call_operand.hbm [shape: f32[1,64], index: 5, kind: input, shape index: {}]   ;;  %s8391_s6 = inlined_call_operand.hbm [shape: f32[1,64], index: 6, kind: input, shape index: {}]   ;;  %s8392_s7 = inlined_call_operand.hbm [shape: f32[4,4,8], index: 7, kind: input, shape index: {}]   ;;  %s8393_s8 = inlined_call_operand.hbm [shape: bf16[64,256], index: 8, kind: input, shape index: {}]   ;;  %s8394_s9 = inlined_call_operand.hbm [shape: f32[64,16], index: 9, kind: input, shape index: {}]   ;;  %s8395_s10 = inlined_call_operand.hbm [shape: f32[16,64], index: 10, kind: input, shape index: {}]   ;;  %s8396_s11 = inlined_call_operand.hbm [shape: f32[1,64], index: 11, kind: input, shape index: {}]   ;;  %s8397_s12 = inlined_call_operand.hbm [shape: f32[1,64], index: 12, kind: input, shape index: {}]   ;;  %s8398_s13 = inlined_call_operand.hbm [shape: f32[4,2,4], index: 13, kind: input, shape index: {}]   ;;  %s8399_s14 = inlined_call_operand.hbm [shape: bf16[64,256], index: 14, kind: input, shape index: {}]   ;;  %s8400_s15 = inlined_call_operand.hbm [shape: f32[64,32], index: 15, kind: input, shape index: {}]   ;;  %s8401_s16 = inlined_call_operand.hbm [shape: f32[32,64], index: 16, kind: input, shape index: {}]   ;;  %s8402_s17 = inlined_call_operand.hbm [shape: f32[1,64], index: 17, kind: input, shape index: {}]   ;;  %s8403_s18 = inlined_call_operand.hbm [shape: f32[1,64], index: 18, kind: input, shape index: {}]   ;;  %s8404_s19 = inlined_call_operand.hbm [shape: f32[3,2,2], index: 19, kind: input, shape index: {}]   ;;  %s8405_s20 = inlined_call_operand.hbm [shape: bf16[64,384], index: 20, kind: input, shape index: {}]   ;;  %s8406_s21 = inlined_call_operand.hbm [shape: f32[128,64], index: 21, kind: input, shape index: {}]   ;;  %s8407_s22 = inlined_call_operand.hbm [shape: f32[64,128], index: 22, kind: input, shape index: {}]   ;;  %s8408_s23 = inlined_call_operand.hbm [shape: f32[1,128], index: 23, kind: input, shape index: {}]   ;;  %s8409_s24 = inlined_call_operand.hbm [shape: f32[1,128], index: 24, kind: input, shape index: {}]   ;;  %s8410_s25 = inlined_call_operand.hbm [shape: f32[4,1,2], index: 25, kind: input, shape index: {}]   ;;  %s8411_s26 = inlined_call_operand.hbm [shape: bf16[128,4], index: 26, kind: input, shape index: {}]   ;;  %s8412_s27 = inlined_call_operand.<no memory space> [shape: f32[1,1], index: 27, kind: input, shape index: {}]   ;;  %s8413_s28 = inlined_call_operand.hbm [shape: f32[2,1,1], index: 28, kind: output, shape index: {}]  }
   0x1   :  { %8459 = sst [smem:[#allocation67_spill]] %s8385_s0  ;;  %v33_v0 = vstv %s8412_s27 }
   0x2   :  { %8460 = sst [smem:[#allocation68_spill]] %s8386_s1  ;;  %34 = vst [vmem:[#allocation2] sm:$0x1] %v33_v0 }
   0x3   :  { %8461 = sst [smem:[#allocation69_spill]] %s8387_s2 }
   0x4   :  { %8462 = sst [smem:[#allocation70_spill]] %s8388_s3 }
   0x5   :  { %8463 = sst [smem:[#allocation71_spill]] %s8389_s4 }
   0x6   :  { %8464 = sst [smem:[#allocation72_spill]] %s8390_s5 }
   0x7   :  { %8465 = sst [smem:[#allocation73_spill]] %s8391_s6 }
   0x8   :  { %8466 = sst [smem:[#allocation74_spill]] %s8392_s7 }
   0x9   :  { %8467 = sst [smem:[#allocation75_spill]] %s8393_s8 }
   0xa   :  { %8468 = sst [smem:[#allocation76_spill]] %s8394_s9 }
   0xb   :  { %8469 = sst [smem:[#allocation77_spill]] %s8395_s10 }
   0xc   :  { %8470 = sst [smem:[#allocation78_spill]] %s8396_s11 }
   0xd   :  { %8471 = sst [smem:[#allocation79_spill]] %s8397_s12 }
   0xe   :  { %8472 = sst [smem:[#allocation80_spill]] %s8398_s13 }
   0xf   :  { %8473 = sst [smem:[#allocation81_spill]] %s8399_s14 }
  0x10   :  { %8474 = sst [smem:[#allocation82_spill]] %s8400_s15 }
  0x11   :  { %8475 = sst [smem:[#allocation83_spill]] %s8401_s16 }
  0x12   :  { %8476 = sst [smem:[#allocation84_spill]] %s8402_s17 }
  0x13   :  { %8477 = sst [smem:[#allocation85_spill]] %s8403_s18 }
  0x14   :  { %8478 = sst [smem:[#allocation86_spill]] %s8407_s22 }
  0x15   :  { %8479 = sst [smem:[#allocation87_spill]] %s8409_s24 }
  0x16   :  { %8480 = sst [smem:[#allocation88_spill]] %s8411_s26 }
  0x17   :  { %8481 = sst [smem:[#allocation89_spill]] %s8413_s28 }
  0x18   :  { %35 = vsyncpa [#allocation4], 0 }
  0x19   :  { %37 = vsyncpa [#allocation4 + $0x1], 0 }
  0x1a   :  { %38 = vsyncpa [#allocation7], 0 }
  0x1b   :  { %39 = vsyncpa [#allocation10], 0 }
  0x1c   :  { %40 = vsyncpa [#allocation13], 0 }
  0x1d   :  { %41 = vsyncpa [#allocation16], 0 }
  0x1e   :  { %42 = vsyncpa [#allocation19], 0 }
  0x1f   :  { %43 = vsyncpa [#allocation22], 0 }
  0x20   :  { %44 = vsyncpa [#allocation25], 0 }
  0x21   :  { %45 = vsyncpa [#allocation28], 0 }
  0x22   :  { %46 = vsyncpa [#allocation31], 0 }
  0x23   :  { %47 = vsyncpa [#allocation34], 0 }
  0x24   :  { %48 = vsyncpa [#allocation37], 0 }
  0x25   :  { %49 = vsyncpa [#allocation40], 0 }
  0x26   :  { %50 = vsyncpa [#allocation43], 0 }
  0x27   :  { %51 = vsyncpa [#allocation5], 0 }
  0x28   :  { %53 = vsyncpa [#allocation5 + $0x1], 0  ;;  %s7336_s9 = smov 0   ;;  %s7338_s27 = smov 0  }
  0x29   :  { %s7340_s30 = smov 0   ;;  %s7342_s3 = smov 0  }
  0x2a LB: > { %8482 = sst [smem:[#allocation61_spill]] %s7128_s9  ;;  %s7142_s6 = smov [#allocation6]   ;;  %s7140_s3 = sphi %s7342_s3, %s7926_s3   ;;  %s7136_s30 = sphi %s7340_s30, %s8571_s30   ;;  %s7132_s27 = sphi %s7338_s27, %s8570_s27   ;;  %s7128_s9 = sphi %s7336_s9, %s8569_s9  }
  0x2b   : > { %8483 = sst [smem:[#allocation62_spill]] %s7132_s27  ;;  %s695_s10 = sshll.u32 %s7142_s6, 4  ;;  %s7362_s10 = int_to_ptr.vmem [resolvable:$true] %s695_s10 }
  0x2c   : > { %8484 = sst [smem:[#allocation63_spill]] %s7136_s30  ;;  %s7357_s0 = sadd.s32 4294967295, %s7140_s3  }
  0x2d   : > { %8485 = sst [smem:[#allocation64_spill]] %s7140_s3  ;;  %p4935_p0 = scmp.ge.s32.totalorder %s7140_s3, 1 }
  0x2e   : > { %8486 = sst [smem:[#allocation65_spill]] %s7357_s0  ;;  %p8440_p1 = scmp.eq.s32.totalorder %s7357_s0, 0 }
  0x2f   : > { %p683_p2 = scmp.lt.s32.totalorder %s7140_s3, 3  ;;  %s7143_s29 = smov [#allocation9]  }
  0x30   : > { %s721_s2 = sshll.u32 %s7143_s29, 4  ;;  %s7144_s12 = smov [#allocation12]   ;;  %s7377_s2 = int_to_ptr.vmem [resolvable:$true] %s721_s2 }
  0x31   : > { %p7364_p3 = pnand %p4935_p0, %p683_p2  ;;  %s746_s1 = sshll.u32 %s7144_s12, 4  ;;  %s7379_s1 = int_to_ptr.vmem [resolvable:$true] %s746_s1 }
  0x32   : > { %s8490_s5 = sld [smem:[#allocation68_spill]] }
  0x33   : > { %s8487_s11 = scalar_select %p7364_p3, 1, 0 }
  0x34   : > { %p5973_p5 = pneg %p7364_p3 }
  0x35   : > { %8488 = sst [smem:[#allocation66_spill]] %s8487_s11 }
  0x36   : > { %p7373_p6 = pnand %p5973_p5, %p8440_p1 }
  0x38   : > { %s6264_s6 = scalar_lea.hbm %s8490_s5, 384  ;;  %p7389_p8 = pneg %p7373_p6 }
  0x39   : > { %p6265_p7 = scmp.ne.s32.totalorder %s8490_s5, %s6264_s6  ;;  %p6271_p11 = scmp.lt.u32.totalorder %s6264_s6, %s8490_s5 }
  0x3b   : > { %p6267_p9 = pnand %p7389_p8, %p6265_p7 }
  0x3d   : > { %p6268_p10 = pneg %p6267_p9 }
  0x3f   : > { %p6273_p12 = pnand %p6271_p11, %p6268_p10 }
  0x41   : > { %6276 = shalt.err (!%p6273_p12)
}
  0x42   : > { %s6277_s28 = scalar_lea.vmem %s7362_s10, 384  ;;  %p6285_p5 = scmp.lt.s32.totalorder %s7362_s10, %s7362_s10 }
  0x43   : > { %p6278_p13 = scmp.ne.s32.totalorder %s7362_s10, %s6277_s28  ;;  %p6286_p4 = scmp.lt.s32.totalorder %s6277_s28, %s6277_s28 }
  0x45   : > { %p6280_p0 = pnand %p6278_p13, %p7389_p8  ;;  %p6287_p7 = por %p6286_p4, %p6285_p5 }
  0x47   : > { %p6281_p2 = pneg %p6280_p0 }
  0x49   : > { %p6288_p9 = pnand %p6287_p7, %p6281_p2 }
  0x4b   : > { %6291 = shalt.err (!%p6288_p9)
}
  0x4c   : > { %s8438_s11 = smov 128   ;;  %s8442_s0 = smov 8  }
  0x4d   : > { %5976 = dma.hbm_to_vmem [thread:$0]  (!%p7373_p6), %s8490_s5, 384, %s7362_s10, [#allocation7], %s8438_s11, %s8438_s11, %s8442_s0  }
  0x4e   : > { %s8492_s9 = sld [smem:[#allocation70_spill]] }
  0x54   : > { %s8493_s26 = smov %s8492_s9  ;;  %s6292_s28 = scalar_lea.hbm %s8492_s9, 1024 }
  0x55   : > { %p6293_p4 = scmp.ne.s32.totalorder %s8493_s26, %s6292_s28  ;;  %p6299_p12 = scmp.lt.u32.totalorder %s6292_s28, %s8493_s26 }
  0x57   : > { %p6295_p10 = pnand %p6293_p4, %p7389_p8 }
  0x59   : > { %p6296_p11 = pneg %p6295_p10 }
  0x5b   : > { %p6301_p13 = pnand %p6299_p12, %p6296_p11 }
  0x5d   : > { %6304 = shalt.err (!%p6301_p13)
}
  0x5e   : > { %s6305_s10 = scalar_lea.vmem %s7377_s2, 1024  ;;  %p6313_p7 = scmp.lt.s32.totalorder %s7377_s2, %s7377_s2 }
  0x5f   : > { %p6306_p0 = scmp.ne.s32.totalorder %s7377_s2, %s6305_s10  ;;  %p6314_p9 = scmp.lt.s32.totalorder %s6305_s10, %s6305_s10 }
  0x61   : > { %p6308_p2 = pnand %p6306_p0, %p7389_p8  ;;  %p6315_p4 = por %p6314_p9, %p6313_p7 }
  0x63   : > { %p6309_p5 = pneg %p6308_p2 }
  0x65   : > { %p6316_p10 = pnand %p6315_p4, %p6309_p5 }
  0x67   : > { %6319 = shalt.err (!%p6316_p10)
}
  0x68   : > { %5982 = dma.hbm_to_vmem [thread:$0]  (!%p7373_p6), %s8493_s26, 1024, %s7377_s2, [#allocation10], %s8438_s11, %s8438_s11, %s8442_s0  }
  0x69   : > { %s8494_s3 = sld [smem:[#allocation72_spill]] }
  0x6f   : > { %s8495_s4 = smov %s8494_s3  ;;  %s6320_s8 = scalar_lea.hbm %s8494_s3, 16 }
  0x70   : > { %p6321_p11 = scmp.ne.s32.totalorder %s8495_s4, %s6320_s8  ;;  %p6327_p0 = scmp.lt.u32.totalorder %s6320_s8, %s8495_s4 }
  0x72   : > { %p6323_p12 = pnand %p6321_p11, %p7389_p8 }
  0x74   : > { %p6324_p13 = pneg %p6323_p12 }
  0x76   : > { %p6329_p2 = pnand %p6327_p0, %p6324_p13 }
  0x78   : > { %6332 = shalt.err (!%p6329_p2)
}
  0x79   : > { %s6333_s2 = scalar_lea.vmem %s7379_s1, 16  ;;  %s6340_s24 = scalar_lea.vmem %s7379_s1, 32 }
  0x7a   : > { %p6334_p5 = scmp.ne.s32.totalorder %s7379_s1, %s6333_s2  ;;  %p6341_p4 = scmp.lt.s32.totalorder %s7379_s1, %s7379_s1 }
  0x7b   : > { %p6342_p10 = scmp.lt.s32.totalorder %s6340_s24, %s6333_s2 }
  0x7c   : > { %p6336_p7 = pnand %p6334_p5, %p7389_p8 }
  0x7d   : > { %p6343_p11 = por %p6342_p10, %p6341_p4 }
  0x7e   : > { %p6337_p9 = pneg %p6336_p7 }
  0x80   : > { %p6344_p12 = pnand %p6343_p11, %p6337_p9 }
  0x82   : > { %6347 = shalt.err (!%p6344_p12)
}
  0x83   : > { %5988 = dma.hbm_to_vmem [thread:$0]  (!%p7373_p6), %s8495_s4, 16, %s7379_s1, [#allocation13]  }
  0x84   : > { %s7147_s30 = smov [#allocation15]   ;;  %s8496_s12 = sld [smem:[#allocation74_spill]] }
  0x85   : > { %s767_s3 = sshll.u32 %s7147_s30, 4  ;;  %s768_s3 = int_to_ptr.vmem [resolvable:$true] %s767_s3 }
  0x8a   : > { %s6348_s28 = scalar_lea.hbm %s8496_s12, 256 }
  0x8b   : > { %p6349_p13 = scmp.ne.s32.totalorder %s8496_s12, %s6348_s28  ;;  %p6355_p5 = scmp.lt.u32.totalorder %s6348_s28, %s8496_s12 }
  0x8d   : > { %p6351_p0 = pnand %p6349_p13, %p7389_p8 }
  0x8f   : > { %p6352_p2 = pneg %p6351_p0 }
  0x91   : > { %p6357_p7 = pnand %p6355_p5, %p6352_p2 }
  0x93   : > { %6360 = shalt.err (!%p6357_p7)
}
  0x94   : > { %s6361_s1 = scalar_lea.vmem %s768_s3, 256  ;;  %p6369_p11 = scmp.lt.s32.totalorder %s768_s3, %s768_s3 }
  0x95   : > { %p6362_p9 = scmp.ne.s32.totalorder %s768_s3, %s6361_s1  ;;  %p6370_p12 = scmp.lt.s32.totalorder %s6361_s1, %s6361_s1 }
  0x97   : > { %p6364_p4 = pnand %p6362_p9, %p7389_p8  ;;  %p6371_p1 = por %p6370_p12, %p6369_p11 }
  0x99   : > { %p6365_p10 = pneg %p6364_p4 }
  0x9b   : > { %p6372_p3 = pnand %p6371_p1, %p6365_p10 }
  0x9d   : > { %6375 = shalt.err (!%p6372_p3)
}
  0x9e   : > { %s8446_s9 = smov 64   ;;  %s8448_s27 = smov 4  }
  0x9f   : > { %5994 = dma.hbm_to_vmem [thread:$0]  (!%p7373_p6), %s8496_s12, 256, %s768_s3, [#allocation16], %s8446_s9, %s8446_s9, %s8448_s27  }
  0xa0   : > { %s7150_s8 = smov [#allocation18]   ;;  %s7151_s28 = smov [#allocation21]  }
  0xa1   : > { %s793_s6 = sshll.u32 %s7150_s8, 4  ;;  %s820_s10 = sshll.u32 %s7151_s28, 4  ;;  %s794_s6 = int_to_ptr.vmem [resolvable:$true] %s793_s6  ;;  %s7484_s10 = int_to_ptr.vmem [resolvable:$true] %s820_s10 }
  0xa2   : > { %s8497_s1 = sld [smem:[#allocation76_spill]] }
  0xa8   : > { %s6376_s0 = scalar_lea.hbm %s8497_s1, 1024 }
  0xa9   : > { %p6377_p1 = scmp.ne.s32.totalorder %s8497_s1, %s6376_s0  ;;  %p6383_p0 = scmp.lt.u32.totalorder %s6376_s0, %s8497_s1 }
  0xab   : > { %p6379_p3 = pnand %p6377_p1, %p7389_p8 }
  0xad   : > { %p6380_p13 = pneg %p6379_p3 }
  0xaf   : > { %p6385_p2 = pnand %p6383_p0, %p6380_p13 }
  0xb1   : > { %6388 = shalt.err (!%p6385_p2)
}
  0xb2   : > { %s6389_s30 = scalar_lea.vmem %s794_s6, 1024  ;;  %p6397_p4 = scmp.lt.s32.totalorder %s794_s6, %s794_s6 }
  0xb3   : > { %p6390_p5 = scmp.ne.s32.totalorder %s794_s6, %s6389_s30  ;;  %p6398_p10 = scmp.lt.s32.totalorder %s6389_s30, %s6389_s30 }
  0xb5   : > { %p6392_p7 = pnand %p6390_p5, %p7389_p8  ;;  %p6399_p11 = por %p6398_p10, %p6397_p4 }
  0xb7   : > { %p6393_p9 = pneg %p6392_p7 }
  0xb9   : > { %p6400_p12 = pnand %p6399_p11, %p6393_p9 }
  0xbb   : > { %6403 = shalt.err (!%p6400_p12)
}
  0xbc   : > { %s8498_s5 = smov 8   ;;  %s8499_s4 = smov 128  }
  0xbd   : > { %6000 = dma.hbm_to_vmem [thread:$0]  (!%p7373_p6), %s8497_s1, 1024, %s794_s6, [#allocation19], %s8499_s4, %s8499_s4, %s8498_s5  }
  0xbe   : > { %s8500_s24 = sld [smem:[#allocation78_spill]] }
  0xc4   : > { %s6404_s11 = scalar_lea.hbm %s8500_s24, 16 }
  0xc5   : > { %p6405_p1 = scmp.ne.s32.totalorder %s8500_s24, %s6404_s11  ;;  %p6411_p0 = scmp.lt.u32.totalorder %s6404_s11, %s8500_s24 }
  0xc7   : > { %p6407_p3 = pnand %p6405_p1, %p7389_p8 }
  0xc9   : > { %p6408_p13 = pneg %p6407_p3 }
  0xcb   : > { %p6413_p2 = pnand %p6411_p0, %p6408_p13 }
  0xcd   : > { %6416 = shalt.err (!%p6413_p2)
}
  0xce   : > { %s6417_s6 = scalar_lea.vmem %s7484_s10, 16  ;;  %s6424_s9 = scalar_lea.vmem %s7484_s10, 32 }
  0xcf   : > { %p6418_p5 = scmp.ne.s32.totalorder %s7484_s10, %s6417_s6  ;;  %p6425_p4 = scmp.lt.s32.totalorder %s7484_s10, %s7484_s10 }
  0xd0   : > { %p6426_p10 = scmp.lt.s32.totalorder %s6424_s9, %s6417_s6 }
  0xd1   : > { %p6420_p7 = pnand %p6418_p5, %p7389_p8 }
  0xd2   : > { %p6427_p11 = por %p6426_p10, %p6425_p4 }
  0xd3   : > { %p6421_p9 = pneg %p6420_p7 }
  0xd5   : > { %p6428_p12 = pnand %p6427_p11, %p6421_p9 }
  0xd7   : > { %6431 = shalt.err (!%p6428_p12)
}
  0xd8   : > { %6006 = dma.hbm_to_vmem [thread:$0]  (!%p7373_p6), %s8500_s24, 16, %s7484_s10, [#allocation22]  }
  0xd9   : > { %s7152_s0 = smov [#allocation24]   ;;  %s8501_s13 = sld [smem:[#allocation80_spill]] }
  0xda   : > { %s841_s28 = sshll.u32 %s7152_s0, 4  ;;  %s842_s28 = int_to_ptr.vmem [resolvable:$true] %s841_s28 }
  0xdf   : > { %s6432_s3 = scalar_lea.hbm %s8501_s13, 128 }
  0xe0   : > { %p6433_p1 = scmp.ne.s32.totalorder %s8501_s13, %s6432_s3  ;;  %p6439_p0 = scmp.lt.u32.totalorder %s6432_s3, %s8501_s13 }
  0xe2   : > { %p6435_p3 = pnand %p6433_p1, %p7389_p8 }
  0xe4   : > { %p6436_p13 = pneg %p6435_p3 }
  0xe6   : > { %p6441_p2 = pnand %p6439_p0, %p6436_p13 }
  0xe8   : > { %6444 = shalt.err (!%p6441_p2)
}
  0xe9   : > { %s6445_s10 = scalar_lea.vmem %s842_s28, 128  ;;  %p6453_p4 = scmp.lt.s32.totalorder %s842_s28, %s842_s28 }
  0xea   : > { %p6446_p5 = scmp.ne.s32.totalorder %s842_s28, %s6445_s10  ;;  %p6454_p10 = scmp.lt.s32.totalorder %s6445_s10, %s6445_s10 }
  0xec   : > { %p6448_p7 = pnand %p6446_p5, %p7389_p8  ;;  %p6455_p11 = por %p6454_p10, %p6453_p4 }
  0xee   : > { %p6449_p9 = pneg %p6448_p7 }
  0xf0   : > { %p6456_p12 = pnand %p6455_p11, %p6449_p9 }
  0xf2   : > { %6459 = shalt.err (!%p6456_p12)
}
  0xf3   : > { %s7153_s27 = smov 32   ;;  %s7154_s8 = smov 2  }
  0xf4   : > { %6012 = dma.hbm_to_vmem [thread:$0]  (!%p7373_p6), %s8501_s13, 128, %s842_s28, [#allocation25], %s7153_s27, %s7153_s27, %s7154_s8  }
  0xf5   : > { %s7155_s2 = smov [#allocation27]   ;;  %s7156_s3 = smov [#allocation30]  }
  0xf6   : > { %s867_s11 = sshll.u32 %s7155_s2, 4  ;;  %s894_s30 = sshll.u32 %s7156_s3, 4  ;;  %s868_s11 = int_to_ptr.vmem [resolvable:$true] %s867_s11  ;;  %s895_s30 = int_to_ptr.vmem [resolvable:$true] %s894_s30 }
  0xf7   : > { %s8502_s15 = sld [smem:[#allocation82_spill]] }
  0xfd   : > { %s6460_s10 = scalar_lea.hbm %s8502_s15, 1024 }
  0xfe   : > { %p6461_p1 = scmp.ne.s32.totalorder %s8502_s15, %s6460_s10  ;;  %p6467_p0 = scmp.lt.u32.totalorder %s6460_s10, %s8502_s15 }
 0x100   : > { %p6463_p3 = pnand %p6461_p1, %p7389_p8 }
 0x102   : > { %p6464_p13 = pneg %p6463_p3 }
 0x104   : > { %p6469_p2 = pnand %p6467_p0, %p6464_p13 }
 0x106   : > { %6472 = shalt.err (!%p6469_p2)
}
 0x107   : > { %s6473_s28 = scalar_lea.vmem %s868_s11, 1024  ;;  %p6481_p4 = scmp.lt.s32.totalorder %s868_s11, %s868_s11 }
 0x108   : > { %p6474_p5 = scmp.ne.s32.totalorder %s868_s11, %s6473_s28  ;;  %p6482_p10 = scmp.lt.s32.totalorder %s6473_s28, %s6473_s28 }
 0x10a   : > { %p6476_p7 = pnand %p6474_p5, %p7389_p8  ;;  %p6483_p11 = por %p6482_p10, %p6481_p4 }
 0x10c   : > { %p6477_p9 = pneg %p6476_p7 }
 0x10e   : > { %p6484_p12 = pnand %p6483_p11, %p6477_p9 }
 0x110   : > { %6487 = shalt.err (!%p6484_p12)
}
 0x111   : > { %6018 = dma.hbm_to_vmem [thread:$0]  (!%p7373_p6), %s8502_s15, 1024, %s868_s11, [#allocation28], %s8499_s4, %s8499_s4, %s8498_s5  }
 0x112   : > { %s8503_s17 = sld [smem:[#allocation84_spill]] }
 0x118   : > { %s6488_s1 = scalar_lea.hbm %s8503_s17, 16 }
 0x119   : > { %p6489_p1 = scmp.ne.s32.totalorder %s8503_s17, %s6488_s1  ;;  %p6495_p0 = scmp.lt.u32.totalorder %s6488_s1, %s8503_s17 }
 0x11b   : > { %p6491_p3 = pnand %p6489_p1, %p7389_p8 }
 0x11d   : > { %p6492_p13 = pneg %p6491_p3 }
 0x11f   : > { %p6497_p2 = pnand %p6495_p0, %p6492_p13 }
 0x121   : > { %6500 = shalt.err (!%p6497_p2)
}
 0x122   : > { %s6501_s9 = scalar_lea.vmem %s895_s30, 16  ;;  %s6508_s11 = scalar_lea.vmem %s895_s30, 32 }
 0x123   : > { %p6502_p5 = scmp.ne.s32.totalorder %s895_s30, %s6501_s9  ;;  %p6509_p4 = scmp.lt.s32.totalorder %s895_s30, %s895_s30 }
 0x124   : > { %p6510_p10 = scmp.lt.s32.totalorder %s6508_s11, %s6501_s9 }
 0x125   : > { %p6504_p7 = pnand %p6502_p5, %p7389_p8 }
 0x126   : > { %p6511_p11 = por %p6510_p10, %p6509_p4 }
 0x127   : > { %p6505_p9 = pneg %p6504_p7 }
 0x129   : > { %p6512_p12 = pnand %p6511_p11, %p6505_p9 }
 0x12b   : > { %6515 = shalt.err (!%p6512_p12)
}
 0x12c   : > { %6024 = dma.hbm_to_vmem [thread:$0]  (!%p7373_p6), %s8503_s17, 16, %s895_s30, [#allocation31]  }
 0x12d   : > { %s7157_s22 = smov [#allocation33]   ;;  %s7158_s12 = smov [#allocation36]  }
 0x12e   : > { %s915_s26 = sshll.u32 %s7157_s22, 4  ;;  %s941_s24 = sshll.u32 %s7158_s12, 4  ;;  %s916_s26 = int_to_ptr.vmem [resolvable:$true] %s915_s26  ;;  %s942_s24 = int_to_ptr.vmem [resolvable:$true] %s941_s24 }
 0x12f   : > { %s6516_s2 = scalar_lea.hbm %s8404_s19, 96 }
 0x130   : > { %p6517_p1 = scmp.ne.s32.totalorder %s8404_s19, %s6516_s2  ;;  %p6523_p0 = scmp.lt.u32.totalorder %s6516_s2, %s8404_s19 }
 0x132   : > { %p6519_p3 = pnand %p6517_p1, %p7389_p8 }
 0x134   : > { %p6520_p13 = pneg %p6519_p3 }
 0x136   : > { %p6525_p2 = pnand %p6523_p0, %p6520_p13 }
 0x138   : > { %6528 = shalt.err (!%p6525_p2)
}
 0x139   : > { %s6529_s30 = scalar_lea.vmem %s916_s26, 96  ;;  %p6537_p4 = scmp.lt.s32.totalorder %s916_s26, %s916_s26 }
 0x13a   : > { %p6530_p5 = scmp.ne.s32.totalorder %s916_s26, %s6529_s30  ;;  %p6538_p10 = scmp.lt.s32.totalorder %s6529_s30, %s6529_s30 }
 0x13c   : > { %p6532_p7 = pnand %p6530_p5, %p7389_p8  ;;  %p6539_p11 = por %p6538_p10, %p6537_p4 }
 0x13e   : > { %p6533_p9 = pneg %p6532_p7 }
 0x140   : > { %p6540_p12 = pnand %p6539_p11, %p6533_p9 }
 0x142   : > { %6543 = shalt.err (!%p6540_p12)
}
 0x143   : > { %6030 = dma.hbm_to_vmem [thread:$0]  (!%p7373_p6), %s8404_s19, 96, %s916_s26, [#allocation34], %s7153_s27, %s7153_s27, %s7154_s8  }
 0x144   : > { %s6544_s1 = scalar_lea.hbm %s8406_s21, 2048 }
 0x145   : > { %p6545_p1 = scmp.ne.s32.totalorder %s8406_s21, %s6544_s1  ;;  %p6551_p0 = scmp.lt.u32.totalorder %s6544_s1, %s8406_s21 }
 0x147   : > { %p6547_p3 = pnand %p6545_p1, %p7389_p8 }
 0x149   : > { %p6548_p13 = pneg %p6547_p3 }
 0x14b   : > { %p6553_p2 = pnand %p6551_p0, %p6548_p13 }
 0x14d   : > { %6556 = shalt.err (!%p6553_p2)
}
 0x14e   : > { %s6557_s9 = scalar_lea.vmem %s942_s24, 2048  ;;  %p6565_p4 = scmp.lt.s32.totalorder %s942_s24, %s942_s24 }
 0x14f   : > { %p6558_p5 = scmp.ne.s32.totalorder %s942_s24, %s6557_s9  ;;  %p6566_p10 = scmp.lt.s32.totalorder %s6557_s9, %s6557_s9 }
 0x151   : > { %p6560_p7 = pnand %p6558_p5, %p7389_p8  ;;  %p6567_p11 = por %p6566_p10, %p6565_p4 }
 0x153   : > { %p6561_p9 = pneg %p6560_p7 }
 0x155   : > { %p6568_p12 = pnand %p6567_p11, %p6561_p9 }
 0x157   : > { %6571 = shalt.err (!%p6568_p12)
}
 0x158   : > { %6036 = dma.hbm_to_vmem [thread:$0]  (!%p7373_p6), %s8406_s21, 2048, %s942_s24, [#allocation37], %s8499_s4, %s8499_s4, %s8498_s5  }
 0x159   : > { %s7159_s26 = smov [#allocation39]   ;;  %s7160_s30 = smov [#allocation42]  }
 0x15a   : > { %s968_s11 = sshll.u32 %s7159_s26, 4  ;;  %s989_s10 = sshll.u32 %s7160_s30, 4  ;;  %s969_s11 = int_to_ptr.vmem [resolvable:$true] %s968_s11  ;;  %s990_s10 = int_to_ptr.vmem [resolvable:$true] %s989_s10 }
 0x15b   : > { %s6572_s12 = scalar_lea.hbm %s8408_s23, 16 }
 0x15c   : > { %p6573_p1 = scmp.ne.s32.totalorder %s8408_s23, %s6572_s12  ;;  %p6579_p0 = scmp.lt.u32.totalorder %s6572_s12, %s8408_s23 }
 0x15e   : > { %p6575_p3 = pnand %p6573_p1, %p7389_p8 }
 0x160   : > { %p6576_p13 = pneg %p6575_p3 }
 0x162   : > { %p6581_p2 = pnand %p6579_p0, %p6576_p13 }
 0x164   : > { %6584 = shalt.err (!%p6581_p2)
}
 0x165   : > { %s6585_s24 = scalar_lea.vmem %s969_s11, 16  ;;  %s6592_s6 = scalar_lea.vmem %s969_s11, 32 }
 0x166   : > { %p6586_p5 = scmp.ne.s32.totalorder %s969_s11, %s6585_s24  ;;  %p6593_p4 = scmp.lt.s32.totalorder %s969_s11, %s969_s11 }
 0x167   : > { %p6594_p10 = scmp.lt.s32.totalorder %s6592_s6, %s6585_s24 }
 0x168   : > { %p6588_p7 = pnand %p6586_p5, %p7389_p8 }
 0x169   : > { %p6595_p11 = por %p6594_p10, %p6593_p4 }
 0x16a   : > { %p6589_p9 = pneg %p6588_p7 }
 0x16c   : > { %p6596_p12 = pnand %p6595_p11, %p6589_p9 }
 0x16e   : > { %6599 = shalt.err (!%p6596_p12)
}
 0x16f   : > { %6042 = dma.hbm_to_vmem [thread:$0]  (!%p7373_p6), %s8408_s23, 16, %s969_s11, [#allocation40]  }
 0x170   : > { %s6600_s30 = scalar_lea.hbm %s8410_s25, 64 }
 0x171   : > { %p6601_p1 = scmp.ne.s32.totalorder %s8410_s25, %s6600_s30  ;;  %p6607_p0 = scmp.lt.u32.totalorder %s6600_s30, %s8410_s25 }
 0x173   : > { %p6603_p3 = pnand %p6601_p1, %p7389_p8 }
 0x175   : > { %p6604_p13 = pneg %p6603_p3 }
 0x177   : > { %p6609_p2 = pnand %p6607_p0, %p6604_p13 }
 0x179   : > { %6612 = shalt.err (!%p6609_p2)
}
 0x17a   : > { %s6613_s0 = scalar_lea.vmem %s990_s10, 64  ;;  %p6621_p4 = scmp.lt.s32.totalorder %s990_s10, %s990_s10 }
 0x17b   : > { %p6614_p5 = scmp.ne.s32.totalorder %s990_s10, %s6613_s0  ;;  %p6622_p10 = scmp.lt.s32.totalorder %s6613_s0, %s6613_s0 }
 0x17d   : > { %p6616_p7 = pnand %p6614_p5, %p7389_p8  ;;  %p6623_p11 = por %p6622_p10, %p6621_p4 }
 0x17f   : > { %p6617_p9 = pneg %p6616_p7 }
 0x181   : > { %p6624_p12 = pnand %p6623_p11, %p6617_p9 }
 0x183   : > { %6627 = shalt.err (!%p6624_p12)
}
 0x184   : > { %s7161_s11 = smov 16   ;;  %s7162_s2 = smov 1  }
 0x185   : > { %6048 = dma.hbm_to_vmem [thread:$0]  (!%p7373_p6), %s8410_s25, 64, %s990_s10, [#allocation43], %s7161_s11, %s7161_s11, %s7162_s2  }
 0x186   : > { %s7163_s6 = smov [#allocation8]   ;;  %s7164_s27 = smov [#allocation11]  }
 0x187   : > { %s708_s9 = sshll.u32 %s7163_s6, 4  ;;  %s735_s8 = sshll.u32 %s7164_s27, 4  ;;  %s709_s9 = int_to_ptr.vmem [resolvable:$true] %s708_s9  ;;  %s736_s8 = int_to_ptr.vmem [resolvable:$true] %s735_s8 }
 0x188   : > { %s8504_s28 = sld [smem:[#allocation69_spill]] }
 0x18e   : > { %s6628_s22 = scalar_lea.hbm %s8504_s28, 1024 }
 0x18f   : > { %p6629_p1 = scmp.ne.s32.totalorder %s8504_s28, %s6628_s22  ;;  %p6635_p0 = scmp.lt.u32.totalorder %s6628_s22, %s8504_s28 }
 0x191   : > { %p6631_p3 = pnand %p6629_p1, %p7389_p8 }
 0x193   : > { %p6632_p13 = pneg %p6631_p3 }
 0x195   : > { %p6637_p2 = pnand %p6635_p0, %p6632_p13 }
 0x197   : > { %6640 = shalt.err (!%p6637_p2)
}
 0x198   : > { %s6641_s10 = scalar_lea.vmem %s709_s9, 1024  ;;  %p6649_p4 = scmp.lt.s32.totalorder %s709_s9, %s709_s9 }
 0x199   : > { %p6642_p5 = scmp.ne.s32.totalorder %s709_s9, %s6641_s10  ;;  %p6650_p10 = scmp.lt.s32.totalorder %s6641_s10, %s6641_s10 }
 0x19b   : > { %p6644_p7 = pnand %p6642_p5, %p7389_p8  ;;  %p6651_p11 = por %p6650_p10, %p6649_p4 }
 0x19d   : > { %p6645_p9 = pneg %p6644_p7 }
 0x19f   : > { %p6652_p12 = pnand %p6651_p11, %p6645_p9 }
 0x1a1   : > { %6655 = shalt.err (!%p6652_p12)
}
 0x1a2   : > { %5979 = dma.hbm_to_vmem [thread:$0]  (!%p7373_p6), %s8504_s28, 1024, %s709_s9, [#allocation7], %s8499_s4, %s8499_s4, %s8498_s5  }
 0x1a3   : > { %s8505_s24 = sld [smem:[#allocation71_spill]] }
 0x1a9   : > { %s6656_s6 = scalar_lea.hbm %s8505_s24, 128 }
 0x1aa   : > { %p6657_p1 = scmp.ne.s32.totalorder %s8505_s24, %s6656_s6  ;;  %p6663_p0 = scmp.lt.u32.totalorder %s6656_s6, %s8505_s24 }
 0x1ac   : > { %p6659_p3 = pnand %p6657_p1, %p7389_p8 }
 0x1ae   : > { %p6660_p13 = pneg %p6659_p3 }
 0x1b0   : > { %p6665_p2 = pnand %p6663_p0, %p6660_p13 }
 0x1b2   : > { %6668 = shalt.err (!%p6665_p2)
}
 0x1b3   : > { %s6669_s12 = scalar_lea.vmem %s736_s8, 128  ;;  %p6677_p4 = scmp.lt.s32.totalorder %s736_s8, %s736_s8 }
 0x1b4   : > { %p6670_p5 = scmp.ne.s32.totalorder %s736_s8, %s6669_s12  ;;  %p6678_p10 = scmp.lt.s32.totalorder %s6669_s12, %s6669_s12 }
 0x1b6   : > { %p6672_p7 = pnand %p6670_p5, %p7389_p8  ;;  %p6679_p11 = por %p6678_p10, %p6677_p4 }
 0x1b8   : > { %p6673_p9 = pneg %p6672_p7 }
 0x1ba   : > { %p6680_p12 = pnand %p6679_p11, %p6673_p9 }
 0x1bc   : > { %6683 = shalt.err (!%p6680_p12)
}
 0x1bd   : > { %5985 = dma.hbm_to_vmem [thread:$0]  (!%p7373_p6), %s8505_s24, 128, %s736_s8, [#allocation10]  }
 0x1be   : > { %s7165_s0 = smov [#allocation14]   ;;  %s7166_s13 = smov [#allocation17]  }
 0x1bf   : > { %s757_s10 = sshll.u32 %s7165_s0, 4  ;;  %s780_s11 = sshll.u32 %s7166_s13, 4  ;;  %s758_s10 = int_to_ptr.vmem [resolvable:$true] %s757_s10  ;;  %s781_s11 = int_to_ptr.vmem [resolvable:$true] %s780_s11 }
 0x1c0   : > { %s8506_s6 = sld [smem:[#allocation73_spill]] }
 0x1c6   : > { %s6684_s27 = scalar_lea.hbm %s8506_s6, 16 }
 0x1c7   : > { %p6685_p1 = scmp.ne.s32.totalorder %s8506_s6, %s6684_s27  ;;  %p6691_p0 = scmp.lt.u32.totalorder %s6684_s27, %s8506_s6 }
 0x1c9   : > { %p6687_p3 = pnand %p6685_p1, %p7389_p8 }
 0x1cb   : > { %p6688_p13 = pneg %p6687_p3 }
 0x1cd   : > { %p6693_p2 = pnand %p6691_p0, %p6688_p13 }
 0x1cf   : > { %6696 = shalt.err (!%p6693_p2)
}
 0x1d0   : > { %s6697_s8 = scalar_lea.vmem %s758_s10, 16  ;;  %s6704_s9 = scalar_lea.vmem %s758_s10, 32 }
 0x1d1   : > { %p6698_p5 = scmp.ne.s32.totalorder %s758_s10, %s6697_s8  ;;  %p6705_p4 = scmp.lt.s32.totalorder %s758_s10, %s758_s10 }
 0x1d2   : > { %p6706_p10 = scmp.lt.s32.totalorder %s6704_s9, %s6697_s8 }
 0x1d3   : > { %p6700_p7 = pnand %p6698_p5, %p7389_p8 }
 0x1d4   : > { %p6707_p11 = por %p6706_p10, %p6705_p4 }
 0x1d5   : > { %p6701_p9 = pneg %p6700_p7 }
 0x1d7   : > { %p6708_p12 = pnand %p6707_p11, %p6701_p9 }
 0x1d9   : > { %6711 = shalt.err (!%p6708_p12)
}
 0x1da   : > { %5991 = dma.hbm_to_vmem [thread:$0]  (!%p7373_p6), %s8506_s6, 16, %s758_s10, [#allocation13]  }
 0x1db   : > { %s8507_s3 = sld [smem:[#allocation75_spill]] }
 0x1e1   : > { %s8508_s26 = smov %s8507_s3  ;;  %s6712_s27 = scalar_lea.hbm %s8507_s3, 1024 }
 0x1e2   : > { %p6713_p1 = scmp.ne.s32.totalorder %s8508_s26, %s6712_s27  ;;  %p6719_p0 = scmp.lt.u32.totalorder %s6712_s27, %s8508_s26 }
 0x1e4   : > { %p6715_p3 = pnand %p6713_p1, %p7389_p8 }
 0x1e6   : > { %p6716_p13 = pneg %p6715_p3 }
 0x1e8   : > { %p6721_p2 = pnand %p6719_p0, %p6716_p13 }
 0x1ea   : > { %6724 = shalt.err (!%p6721_p2)
}
 0x1eb   : > { %s6725_s9 = scalar_lea.vmem %s781_s11, 1024  ;;  %p6733_p4 = scmp.lt.s32.totalorder %s781_s11, %s781_s11 }
 0x1ec   : > { %p6726_p5 = scmp.ne.s32.totalorder %s781_s11, %s6725_s9  ;;  %p6734_p10 = scmp.lt.s32.totalorder %s6725_s9, %s6725_s9 }
 0x1ee   : > { %p6728_p7 = pnand %p6726_p5, %p7389_p8  ;;  %p6735_p11 = por %p6734_p10, %p6733_p4 }
 0x1f0   : > { %p6729_p9 = pneg %p6728_p7 }
 0x1f2   : > { %p6736_p12 = pnand %p6735_p11, %p6729_p9 }
 0x1f4   : > { %6739 = shalt.err (!%p6736_p12)
}
 0x1f5   : > { %5997 = dma.hbm_to_vmem [thread:$0]  (!%p7373_p6), %s8508_s26, 1024, %s781_s11, [#allocation16], %s8499_s4, %s8499_s4, %s8498_s5  }
 0x1f6   : > { %s7167_s0 = smov [#allocation20]   ;;  %s7168_s2 = smov [#allocation23]  }
 0x1f7   : > { %s806_s13 = sshll.u32 %s7167_s0, 4  ;;  %s831_s3 = sshll.u32 %s7168_s2, 4  ;;  %s807_s13 = int_to_ptr.vmem [resolvable:$true] %s806_s13  ;;  %s832_s3 = int_to_ptr.vmem [resolvable:$true] %s831_s3 }
 0x1f8   : > { %s8509_s22 = sld [smem:[#allocation77_spill]] }
 0x1fe   : > { %s6740_s12 = scalar_lea.hbm %s8509_s22, 256 }
 0x1ff   : > { %p6741_p1 = scmp.ne.s32.totalorder %s8509_s22, %s6740_s12  ;;  %p6747_p0 = scmp.lt.u32.totalorder %s6740_s12, %s8509_s22 }
 0x201   : > { %p6743_p3 = pnand %p6741_p1, %p7389_p8 }
 0x203   : > { %p6744_p13 = pneg %p6743_p3 }
 0x205   : > { %p6749_p2 = pnand %p6747_p0, %p6744_p13 }
 0x207   : > { %6752 = shalt.err (!%p6749_p2)
}
 0x208   : > { %s6753_s11 = scalar_lea.vmem %s807_s13, 256  ;;  %p6761_p4 = scmp.lt.s32.totalorder %s807_s13, %s807_s13 }
 0x209   : > { %p6754_p5 = scmp.ne.s32.totalorder %s807_s13, %s6753_s11  ;;  %p6762_p10 = scmp.lt.s32.totalorder %s6753_s11, %s6753_s11 }
 0x20b   : > { %p6756_p7 = pnand %p6754_p5, %p7389_p8  ;;  %p6763_p11 = por %p6762_p10, %p6761_p4 }
 0x20d   : > { %p6757_p9 = pneg %p6756_p7 }
 0x20f   : > { %p6764_p12 = pnand %p6763_p11, %p6757_p9 }
 0x211   : > { %6767 = shalt.err (!%p6764_p12)
}
 0x212   : > { %6003 = dma.hbm_to_vmem [thread:$0]  (!%p7373_p6), %s8509_s22, 256, %s807_s13, [#allocation19], %s8499_s4, %s8499_s4, %s8498_s5  }
 0x213   : > { %s8510_s27 = sld [smem:[#allocation79_spill]] }
 0x219   : > { %s8511_s12 = smov %s8510_s27  ;;  %s6768_s30 = scalar_lea.hbm %s8510_s27, 16 }
 0x21a   : > { %p6769_p1 = scmp.ne.s32.totalorder %s8511_s12, %s6768_s30  ;;  %p6775_p0 = scmp.lt.u32.totalorder %s6768_s30, %s8511_s12 }
 0x21c   : > { %p6771_p3 = pnand %p6769_p1, %p7389_p8 }
 0x21e   : > { %p6772_p13 = pneg %p6771_p3 }
 0x220   : > { %p6777_p2 = pnand %p6775_p0, %p6772_p13 }
 0x222   : > { %6780 = shalt.err (!%p6777_p2)
}
 0x223   : > { %s6781_s6 = scalar_lea.vmem %s832_s3, 16  ;;  %s6788_s13 = scalar_lea.vmem %s832_s3, 32 }
 0x224   : > { %p6782_p5 = scmp.ne.s32.totalorder %s832_s3, %s6781_s6  ;;  %p6789_p4 = scmp.lt.s32.totalorder %s832_s3, %s832_s3 }
 0x225   : > { %p6790_p10 = scmp.lt.s32.totalorder %s6788_s13, %s6781_s6 }
 0x226   : > { %p6784_p7 = pnand %p6782_p5, %p7389_p8 }
 0x227   : > { %p6791_p11 = por %p6790_p10, %p6789_p4 }
 0x228   : > { %p6785_p9 = pneg %p6784_p7 }
 0x22a   : > { %p6792_p12 = pnand %p6791_p11, %p6785_p9 }
 0x22c   : > { %6795 = shalt.err (!%p6792_p12)
}
 0x22d   : > { %6009 = dma.hbm_to_vmem [thread:$0]  (!%p7373_p6), %s8511_s12, 16, %s832_s3, [#allocation22]  }
 0x22e   : > { %s7169_s2 = smov [#allocation26]   ;;  %s7170_s30 = smov [#allocation29]  }
 0x22f   : > { %s854_s27 = sshll.u32 %s7169_s2, 4  ;;  %s880_s8 = sshll.u32 %s7170_s30, 4  ;;  %s855_s27 = int_to_ptr.vmem [resolvable:$true] %s854_s27  ;;  %s881_s8 = int_to_ptr.vmem [resolvable:$true] %s880_s8 }
 0x230   : > { %s8512_s14 = sld [smem:[#allocation81_spill]] }
 0x236   : > { %s6796_s11 = scalar_lea.hbm %s8512_s14, 1024 }
 0x237   : > { %p6797_p1 = scmp.ne.s32.totalorder %s8512_s14, %s6796_s11  ;;  %p6803_p0 = scmp.lt.u32.totalorder %s6796_s11, %s8512_s14 }
 0x239   : > { %p6799_p3 = pnand %p6797_p1, %p7389_p8 }
 0x23b   : > { %p6800_p13 = pneg %p6799_p3 }
 0x23d   : > { %p6805_p2 = pnand %p6803_p0, %p6800_p13 }
 0x23f   : > { %6808 = shalt.err (!%p6805_p2)
}
 0x240   : > { %s6809_s3 = scalar_lea.vmem %s855_s27, 1024  ;;  %p6817_p4 = scmp.lt.s32.totalorder %s855_s27, %s855_s27 }
 0x241   : > { %p6810_p5 = scmp.ne.s32.totalorder %s855_s27, %s6809_s3  ;;  %p6818_p10 = scmp.lt.s32.totalorder %s6809_s3, %s6809_s3 }
 0x243   : > { %p6812_p7 = pnand %p6810_p5, %p7389_p8  ;;  %p6819_p11 = por %p6818_p10, %p6817_p4 }
 0x245   : > { %p6813_p9 = pneg %p6812_p7 }
 0x247   : > { %p6820_p12 = pnand %p6819_p11, %p6813_p9 }
 0x249   : > { %6823 = shalt.err (!%p6820_p12)
}
 0x24a   : > { %6015 = dma.hbm_to_vmem [thread:$0]  (!%p7373_p6), %s8512_s14, 1024, %s855_s27, [#allocation25], %s8499_s4, %s8499_s4, %s8498_s5  }
 0x24b   : > { %s8513_s16 = sld [smem:[#allocation83_spill]] }
 0x251   : > { %s6824_s9 = scalar_lea.hbm %s8513_s16, 512 }
 0x252   : > { %p6825_p1 = scmp.ne.s32.totalorder %s8513_s16, %s6824_s9  ;;  %p6831_p0 = scmp.lt.u32.totalorder %s6824_s9, %s8513_s16 }
 0x254   : > { %p6827_p3 = pnand %p6825_p1, %p7389_p8 }
 0x256   : > { %p6828_p13 = pneg %p6827_p3 }
 0x258   : > { %p6833_p2 = pnand %p6831_p0, %p6828_p13 }
 0x25a   : > { %6836 = shalt.err (!%p6833_p2)
}
 0x25b   : > { %s6837_s1 = scalar_lea.vmem %s881_s8, 512  ;;  %p6845_p4 = scmp.lt.s32.totalorder %s881_s8, %s881_s8 }
 0x25c   : > { %p6838_p5 = scmp.ne.s32.totalorder %s881_s8, %s6837_s1  ;;  %p6846_p10 = scmp.lt.s32.totalorder %s6837_s1, %s6837_s1 }
 0x25e   : > { %p6840_p7 = pnand %p6838_p5, %p7389_p8  ;;  %p6847_p11 = por %p6846_p10, %p6845_p4 }
 0x260   : > { %p6841_p9 = pneg %p6840_p7 }
 0x262   : > { %p6848_p12 = pnand %p6847_p11, %p6841_p9 }
 0x264   : > { %6851 = shalt.err (!%p6848_p12)
}
 0x265   : > { %6021 = dma.hbm_to_vmem [thread:$0]  (!%p7373_p6), %s8513_s16, 512, %s881_s8, [#allocation28], %s8499_s4, %s8499_s4, %s8498_s5  }
 0x266   : > { %s7171_s15 = smov [#allocation32]   ;;  %s7172_s2 = smov [#allocation35]  }
 0x267   : > { %s905_s0 = sshll.u32 %s7171_s15, 4  ;;  %s928_s30 = sshll.u32 %s7172_s2, 4  ;;  %s906_s0 = int_to_ptr.vmem [resolvable:$true] %s905_s0  ;;  %s929_s30 = int_to_ptr.vmem [resolvable:$true] %s928_s30 }
 0x268   : > { %s8514_s18 = sld [smem:[#allocation85_spill]] }
 0x26e   : > { %s6852_s11 = scalar_lea.hbm %s8514_s18, 16 }
 0x26f   : > { %p6853_p1 = scmp.ne.s32.totalorder %s8514_s18, %s6852_s11  ;;  %p6859_p0 = scmp.lt.u32.totalorder %s6852_s11, %s8514_s18 }
 0x271   : > { %p6855_p3 = pnand %p6853_p1, %p7389_p8 }
 0x273   : > { %p6856_p13 = pneg %p6855_p3 }
 0x275   : > { %p6861_p2 = pnand %p6859_p0, %p6856_p13 }
 0x277   : > { %6864 = shalt.err (!%p6861_p2)
}
 0x278   : > { %s6865_s8 = scalar_lea.vmem %s906_s0, 16  ;;  %s6872_s3 = scalar_lea.vmem %s906_s0, 32 }
 0x279   : > { %p6866_p5 = scmp.ne.s32.totalorder %s906_s0, %s6865_s8  ;;  %p6873_p4 = scmp.lt.s32.totalorder %s906_s0, %s906_s0 }
 0x27a   : > { %p6874_p10 = scmp.lt.s32.totalorder %s6872_s3, %s6865_s8 }
 0x27b   : > { %p6868_p7 = pnand %p6866_p5, %p7389_p8 }
 0x27c   : > { %p6875_p11 = por %p6874_p10, %p6873_p4 }
 0x27d   : > { %p6869_p9 = pneg %p6868_p7 }
 0x27f   : > { %p6876_p12 = pnand %p6875_p11, %p6869_p9 }
 0x281   : > { %6879 = shalt.err (!%p6876_p12)
}
 0x282   : > { %6027 = dma.hbm_to_vmem [thread:$0]  (!%p7373_p6), %s8514_s18, 16, %s906_s0, [#allocation31]  }
 0x283   : > { %s6880_s11 = scalar_lea.hbm %s8405_s20, 1536 }
 0x284   : > { %p6881_p1 = scmp.ne.s32.totalorder %s8405_s20, %s6880_s11  ;;  %p6887_p0 = scmp.lt.u32.totalorder %s6880_s11, %s8405_s20 }
 0x286   : > { %p6883_p3 = pnand %p6881_p1, %p7389_p8 }
 0x288   : > { %p6884_p13 = pneg %p6883_p3 }
 0x28a   : > { %p6889_p2 = pnand %p6887_p0, %p6884_p13 }
 0x28c   : > { %6892 = shalt.err (!%p6889_p2)
}
 0x28d   : > { %s6893_s8 = scalar_lea.vmem %s929_s30, 1536  ;;  %p6901_p4 = scmp.lt.s32.totalorder %s929_s30, %s929_s30 }
 0x28e   : > { %p6894_p5 = scmp.ne.s32.totalorder %s929_s30, %s6893_s8  ;;  %p6902_p10 = scmp.lt.s32.totalorder %s6893_s8, %s6893_s8 }
 0x290   : > { %p6896_p7 = pnand %p6894_p5, %p7389_p8  ;;  %p6903_p11 = por %p6902_p10, %p6901_p4 }
 0x292   : > { %p6897_p9 = pneg %p6896_p7 }
 0x294   : > { %p6904_p12 = pnand %p6903_p11, %p6897_p9 }
 0x296   : > { %6907 = shalt.err (!%p6904_p12)
}
 0x297   : > { %s7173_s0 = smov 192   ;;  %s7174_s3 = smov 12  }
 0x298   : > { %6033 = dma.hbm_to_vmem [thread:$0]  (!%p7373_p6), %s8405_s20, 1536, %s929_s30, [#allocation34], %s7173_s0, %s7173_s0, %s7174_s3  }
 0x299   : > { %s7175_s9 = smov [#allocation38]   ;;  %s7176_s11 = smov [#allocation41]  }
 0x29a   : > { %s954_s10 = sshll.u32 %s7175_s9, 4  ;;  %s979_s6 = sshll.u32 %s7176_s11, 4  ;;  %s955_s10 = int_to_ptr.vmem [resolvable:$true] %s954_s10  ;;  %s980_s6 = int_to_ptr.vmem [resolvable:$true] %s979_s6 }
 0x29b   : > { %s8515_s27 = sld [smem:[#allocation86_spill]] }
 0x2a1   : > { %s8516_s8 = smov %s8515_s27  ;;  %s6908_s12 = scalar_lea.hbm %s8515_s27, 1024 }
 0x2a2   : > { %p6909_p1 = scmp.ne.s32.totalorder %s8516_s8, %s6908_s12  ;;  %p6915_p0 = scmp.lt.u32.totalorder %s6908_s12, %s8516_s8 }
 0x2a4   : > { %p6911_p3 = pnand %p6909_p1, %p7389_p8 }
 0x2a6   : > { %p6912_p13 = pneg %p6911_p3 }
 0x2a8   : > { %p6917_p2 = pnand %p6915_p0, %p6912_p13 }
 0x2aa   : > { %6920 = shalt.err (!%p6917_p2)
}
 0x2ab   : > { %s6921_s30 = scalar_lea.vmem %s955_s10, 1024  ;;  %p6929_p4 = scmp.lt.s32.totalorder %s955_s10, %s955_s10 }
 0x2ac   : > { %p6922_p5 = scmp.ne.s32.totalorder %s955_s10, %s6921_s30  ;;  %p6930_p10 = scmp.lt.s32.totalorder %s6921_s30, %s6921_s30 }
 0x2ae   : > { %p6924_p7 = pnand %p6922_p5, %p7389_p8  ;;  %p6931_p11 = por %p6930_p10, %p6929_p4 }
 0x2b0   : > { %p6925_p9 = pneg %p6924_p7 }
 0x2b2   : > { %p6932_p12 = pnand %p6931_p11, %p6925_p9 }
 0x2b4   : > { %6935 = shalt.err (!%p6932_p12)
}
 0x2b5   : > { %6039 = dma.hbm_to_vmem [thread:$0]  (!%p7373_p6), %s8516_s8, 1024, %s955_s10, [#allocation37], %s8499_s4, %s8499_s4, %s8498_s5  }
 0x2b6   : > { %s8517_s12 = sld [smem:[#allocation87_spill]] }
 0x2bc   : > { %s6936_s0 = scalar_lea.hbm %s8517_s12, 16 }
 0x2bd   : > { %p6937_p1 = scmp.ne.s32.totalorder %s8517_s12, %s6936_s0  ;;  %p6943_p0 = scmp.lt.u32.totalorder %s6936_s0, %s8517_s12 }
 0x2bf   : > { %p6939_p3 = pnand %p6937_p1, %p7389_p8 }
 0x2c1   : > { %p6940_p13 = pneg %p6939_p3 }
 0x2c3   : > { %p6945_p2 = pnand %p6943_p0, %p6940_p13 }
 0x2c5   : > { %6948 = shalt.err (!%p6945_p2)
}
 0x2c6   : > { %s6949_s11 = scalar_lea.vmem %s980_s6, 16  ;;  %s6956_s5 = scalar_lea.vmem %s980_s6, 32 }
 0x2c7   : > { %p6950_p5 = scmp.ne.s32.totalorder %s980_s6, %s6949_s11  ;;  %p6957_p4 = scmp.lt.s32.totalorder %s980_s6, %s980_s6 }
 0x2c8   : > { %p6958_p10 = scmp.lt.s32.totalorder %s6956_s5, %s6949_s11 }
 0x2c9   : > { %p6952_p7 = pnand %p6950_p5, %p7389_p8 }
 0x2ca   : > { %p6959_p11 = por %p6958_p10, %p6957_p4 }
 0x2cb   : > { %p6953_p9 = pneg %p6952_p7 }
 0x2cd   : > { %p6960_p12 = pnand %p6959_p11, %p6953_p9 }
 0x2cf   : > { %6963 = shalt.err (!%p6960_p12)
}
 0x2d0   : > { %6045 = dma.hbm_to_vmem [thread:$0]  (!%p7373_p6), %s8517_s12, 16, %s980_s6, [#allocation40]  }
 0x2d1   : > { %s7177_s13 = smov [#allocation44]   ;;  %s8518_s14 = sld [smem:[#allocation88_spill]] }
 0x2d2   : > { %s1002_s1 = sshll.u32 %s7177_s13, 4  ;;  %s1003_s1 = int_to_ptr.vmem [resolvable:$true] %s1002_s1 }
 0x2d7   : > { %s6964_s16 = scalar_lea.hbm %s8518_s14, 1024 }
 0x2d8   : > { %p6965_p1 = scmp.ne.s32.totalorder %s8518_s14, %s6964_s16  ;;  %p6971_p0 = scmp.lt.u32.totalorder %s6964_s16, %s8518_s14 }
 0x2da   : > { %p6967_p3 = pnand %p6965_p1, %p7389_p8 }
 0x2dc   : > { %p6968_p13 = pneg %p6967_p3 }
 0x2de   : > { %p6973_p2 = pnand %p6971_p0, %p6968_p13 }
 0x2e0   : > { %6976 = shalt.err (!%p6973_p2)
}
 0x2e1   : > { %s6977_s6 = scalar_lea.vmem %s1003_s1, 1024  ;;  %p6985_p4 = scmp.lt.s32.totalorder %s1003_s1, %s1003_s1 }
 0x2e2   : > { %p6978_p5 = scmp.ne.s32.totalorder %s1003_s1, %s6977_s6  ;;  %p6986_p10 = scmp.lt.s32.totalorder %s6977_s6, %s6977_s6 }
 0x2e4   : > { %p6980_p7 = pnand %p6978_p5, %p7389_p8  ;;  %p6987_p11 = por %p6986_p10, %p6985_p4 }
 0x2e6   : > { %p6981_p9 = pneg %p6980_p7 }
 0x2e8   : > { %p6988_p12 = pnand %p6987_p11, %p6981_p9 }
 0x2ea   : > { %6991 = shalt.err (!%p6988_p12)
}
 0x2eb   : > { %s8519_s15 = smov 4   ;;  %s8520_s2 = smov 64  }
 0x2ec   : > { %s8521_s5 = sld [smem:[#allocation64_spill]]  ;;  %s8522_s4 = sld [smem:[#allocation63_spill]] }
 0x2ed   : > { %s8523_s29 = sld [smem:[#allocation62_spill]]  ;;  %s8524_s10 = sld [smem:[#allocation61_spill]] }
 0x2ee   : > { %s8525_s13 = sld [smem:[#allocation65_spill]] }
 0x2ef   : > { %6051 = dma.hbm_to_vmem [thread:$0]  (!%p7373_p6), %s8518_s14, 1024, %s1003_s1, [#allocation43], %s8520_s2, %s8520_s2, %s8519_s15  }
 0x2f2   : > { %s4934_s7 = sadd.s32 4294967294, %s8521_s5   ;;  %s7926_s3 = sadd.s32 1, %s8521_s5  }
 0x2f3   : > { %s63_s27 = ssub.s32 %s8521_s5, %s7926_s3  ;;  %s66_s30 = sadd.s32 1, %s8522_s4 }
 0x2f4   : > { %p64_p8 = scmp.eq.s32.totalorder %s63_s27, 0  ;;  %p73_p1 = scmp.ne.s32.totalorder %s8522_s4, %s8523_s29 }
 0x2f5   : > { %p74_p3 = scmp.eq.s32.totalorder %s8521_s5, 0  ;;  %p79_p13 = scmp.ne.s32.totalorder %s8523_s29, %s8524_s10 }
 0x2f6   : > { %s7937_s16 = scalar_select %p64_p8, %s8522_s4, %s66_s30  }
 0x2f7   : > { %p7939_p0 = por %p74_p3, %p73_p1  ;;  %p8527_p2 = scmp.eq.s32.totalorder %s8525_s13, 0 }
 0x2f8   : > { %p670_p5 = scmp.eq.s32.totalorder %s8525_s13, 1  ;;  %p676_p7 = scmp.eq.s32.totalorder %s4934_s7, 1 }
 0x2f9   : > { %p7945_p6 = por %p8527_p2, %p79_p13  ;;  %p6086_p9 = scmp.lt.s32.totalorder %s8521_s5, 2 }
 0x2fa   : > { %s1019_s18 = sand.u32 1, %s8522_s4   ;;  %p7952_p4 = por %p670_p5, %p73_p1 }
 0x2fb   : > { %p7956_p10 = por %p676_p7, %p79_p13  ;;  %s4963_s9 = sshll.u32 %s1019_s18, 3 }
 0x2fc   : > { %s8529_s0 = scalar_select %p7952_p4, 1, 0 }
 0x2fd   : > { %s8530_s6 = scalar_select %p7956_p10, 1, 0 }
 0x2fe   : > { %s5098_s11 = sshll.u32 %s8521_s5, 7  ;;  %s8531_s27 = sld [smem:[#allocation67_spill]] }
 0x2ff   : > { %s1023_s4 = scalar_lea.vmem [#allocation3], %s4963_s9  ;;  %p7970_p11 = pnand %p6086_p9, %p7939_p0 }
 0x300   : > { %s1030_s13 = sshll.u32 %s1023_s4, 4  ;;  %s7974_s5 = scalar_lea.sflag [#allocation4], %s1019_s18  ;;  %s7966_s13 = int_to_ptr.vmem [resolvable:$true] %s1030_s13 }
 0x301   : > { %p6994_p8 = pneg %p7970_p11 }
 0x304   : > { %s8532_s8 = smov %s8531_s27  ;;  %s7964_s30 = scalar_lea.hbm %s8531_s27, %s5098_s11 }
 0x305   : > { %s6992_s29 = scalar_lea.hbm %s7964_s30, 128  ;;  %s6997_s17 = scalar_lea.hbm %s8532_s8, 256 }
 0x306   : > { %p6993_p12 = scmp.ne.s32.totalorder %s7964_s30, %s6992_s29  ;;  %p6998_p13 = scmp.lt.u32.totalorder %s7964_s30, %s8532_s8 }
 0x307   : > { %p6999_p0 = scmp.lt.u32.totalorder %s6997_s17, %s6992_s29  ;;  %p7001_p5 = scmp.lt.u32.totalorder %s6992_s29, %s7964_s30 }
 0x308   : > { %p6995_p1 = pnand %p6994_p8, %p6993_p12 }
 0x309   : > { %p7000_p2 = por %p6999_p0, %p6998_p13 }
 0x30a   : > { %p6996_p3 = pneg %p6995_p1 }
 0x30b   : > { %p7002_p7 = por %p7001_p5, %p7000_p2 }
 0x30d   : > { %p7003_p9 = pnand %p7002_p7, %p6996_p3 }
 0x30f   : > { %7006 = shalt.err (!%p7003_p9)
}
 0x310   : > { %s7007_s18 = scalar_lea.vmem %s7966_s13, 128  ;;  %s7178_s4 = smov [#allocation3]  }
 0x311   : > { %p7008_p12 = scmp.ne.s32.totalorder %s7966_s13, %s7007_s18  ;;  %s7012_s9 = sshll.u32 %s7178_s4, 4  ;;  %s7013_s9 = int_to_ptr.vmem [resolvable:$false] %s7012_s9 }
 0x312   : > { %s7014_s11 = scalar_lea.vmem %s7013_s9, 256  ;;  %p7015_p4 = scmp.lt.s32.totalorder %s7966_s13, %s7013_s9 }
 0x313   : > { %p7010_p1 = pnand %p7008_p12, %p6994_p8  ;;  %p7016_p13 = scmp.lt.s32.totalorder %s7014_s11, %s7007_s18 }
 0x315   : > { %p7011_p10 = pneg %p7010_p1  ;;  %p7017_p0 = por %p7016_p13, %p7015_p4 }
 0x317   : > { %p7018_p2 = pnand %p7017_p0, %p7011_p10 }
 0x319   : > { %7021 = shalt.err (!%p7018_p2)
}
 0x31a   : > { %6055 = dma.hbm_to_vmem [thread:$0]  (!%p7970_p11), %s7964_s30, 128, %s7966_s13, %s7974_s5, %s8520_s2, %s8520_s2, %s8519_s15  }
 0x31b   : > { %s8534_s29 = sld [smem:[#allocation66_spill]] }
 0x321   : > { %p8535_p8 = scmp.ne.s32.totalorder %s8534_s29, 0 }
 0x322   : > { %s8536_s17 = sld [smem:[#allocation62_spill]] (!%p8535_p8) }
 0x323   : > { %1042 = sbr.rel (%p8535_p8) target bundleno = 7225 (0x1c39), region = 132 }
 0x328   : > { %s8008_s10 = sand.u32 (!%p8535_p8), 1, %s8536_s17  }
 0x329   : > { %s4967_s27 = sshll.u32 (!%p8535_p8), %s8008_s10, 3  ;;  %s1045_s18 = scalar_lea.sflag (!%p8535_p8), [#allocation4], %s8008_s10 }
 0x32a   : > { %s8012_s4 = scalar_lea.vmem [#allocation3], %s4967_s27 }
 0x32b   : > { %7067 = dma.done.wait (%p7945_p6), %s1045_s18, 128  }
 0x32c   : > { %7069 = vsyncadd (%p7945_p6), %s1045_s18, 4294967168  ;;  %s8537_s7 = sld [smem:[#allocation65_spill]] }
 0x332   : > { %p8538_p4 = scmp.eq.s32.totalorder %s8537_s7, 0 }
 0x334   : > { %7071 = dma.done.wait (%p8538_p4), [#allocation7], 1408   ;;  %p8539_p10 = pmov %p8538_p4 }
 0x335   : > { %p8540_p11 = pmov %p8538_p4 }
 0x336   : > { %7073 = vsyncadd (%p8539_p10), [#allocation7], 4294965888 }
 0x337   : > { %7075 = dma.done.wait (%p8540_p11), [#allocation10], 1152   ;;  %p8541_p3 = pmov %p8538_p4 }
 0x339   : > { %7077 = vsyncadd (%p8541_p3), [#allocation10], 4294966144  ;;  %p8542_p5 = pmov %p8541_p3 }
 0x33a   : > { %p8543_p7 = pmov %p8541_p3 }
 0x33b   : > { %7079 = dma.done.wait (%p8542_p5), [#allocation13], 32  }
 0x33c   : > { %7081 = vsyncadd (%p8543_p7), [#allocation13], 4294967264  ;;  %p8544_p6 = pmov %p8541_p3 }
 0x33d   : > { %p8545_p9 = pmov %p8541_p3 }
 0x33e   : > { %7083 = dma.done.wait (%p8544_p6), [#allocation16], 1280  }
 0x33f   : > { %7085 = vsyncadd (%p8545_p9), [#allocation16], 4294966016  ;;  %p8546_p12 = pmov %p8541_p3 }
 0x340   : > { %p8547_p1 = pmov %p8541_p3 }
 0x341   : > { %7087 = dma.done.wait (%p8546_p12), [#allocation19], 1280  }
 0x342   : > { %7089 = vsyncadd (%p8547_p1), [#allocation19], 4294966016  ;;  %p8548_p13 = pmov %p8547_p1 }
 0x343   : > { %p8549_p0 = pmov %p8547_p1 }
 0x344   : > { %7091 = dma.done.wait (%p8548_p13), [#allocation22], 32  }
 0x345   : > { %7093 = vsyncadd (%p8549_p0), [#allocation22], 4294967264  ;;  %p8550_p2 = pmov %p8549_p0 }
 0x346   : > { %p8551_p8 = pmov %p8549_p0 }
 0x347   : > { %7095 = dma.done.wait (%p8550_p2), [#allocation25], 1152  }
 0x348   : > { %7097 = vsyncadd (%p8551_p8), [#allocation25], 4294966144  ;;  %p8552_p4 = pmov %p8549_p0 }
 0x349   : > { %p8553_p10 = pmov %p8549_p0 }
 0x34a   : > { %7099 = dma.done.wait (%p8552_p4), [#allocation28], 1536  }
 0x34b   : > { %7101 = vsyncadd (%p8553_p10), [#allocation28], 4294965760  ;;  %p8554_p11 = pmov %p8549_p0 }
 0x34c   : > { %p8555_p3 = pmov %p8549_p0 }
 0x34d   : > { %7103 = dma.done.wait (%p8554_p11), [#allocation31], 32  }
 0x34e   : > { %7105 = vsyncadd (%p8555_p3), [#allocation31], 4294967264  ;;  %p8556_p5 = pmov %p8549_p0 }
 0x34f   : > { %p8557_p7 = pmov %p8549_p0 }
 0x350   : > { %7107 = dma.done.wait (%p8556_p5), [#allocation34], 1632  }
 0x351   : > { %7109 = vsyncadd (%p8557_p7), [#allocation34], 4294965664  ;;  %p8558_p6 = pmov %p8549_p0 }
 0x352   : > { %p8559_p9 = pmov %p8549_p0 }
 0x353   : > { %7111 = dma.done.wait (%p8558_p6), [#allocation37], 3072  }
 0x354   : > { %7113 = vsyncadd (%p8559_p9), [#allocation37], 4294964224  ;;  %p8560_p12 = pmov %p8549_p0 }
 0x355   : > { %p8561_p1 = pmov %p8549_p0 }
 0x356   : > { %7115 = dma.done.wait (%p8560_p12), [#allocation40], 32  }
 0x357   : > { %7117 = vsyncadd (%p8561_p1), [#allocation40], 4294967264  ;;  %p8562_p13 = pmov %p8549_p0 }
 0x359   : > { %7119 = dma.done.wait (%p8562_p13), [#allocation43], 1088  }
 0x35a   : > { %7121 = vsyncadd (%p8549_p0), [#allocation43], 4294966208  ;;  %v7179_v1 = vmov 0   ;;  %v6195_v2 = vld [vmem:[#allocation8 + $0x4] ss:$8 sps:$4 sm:$0xff]   ;;  %vm1280_vm0 = vcmask 523264   ;;  %v1725_v52 = vlaneseq }
 0x35b   : > { %1316 = vmatprep.mubr.bf16.mxu0 %v7179_v1  ;;  %v6197_v3 = vld [vmem:[#allocation8] ss:$8 sps:$4 sm:$0xff]   ;;  %1284 = vmatprep.subr.bf16.mxu0 %v6195_v2  ;;  %v6198_v4 = vld [vmem:[#allocation8 + $0x14] ss:$8 sps:$4 sm:$0xff]   ;;  %v6200_v5 = vld [vmem:[#allocation8 + $0x10] ss:$8 sps:$4 sm:$0xff]  }
 0x35c   : > { %1285 = vmatpush1.bf16.msra.mxu0 %v6197_v3  ;;  %v6201_v6 = vld [vmem:[#allocation8 + $0x24] ss:$8 sps:$4 sm:$0xff]   ;;  %v6203_v7 = vld [vmem:[#allocation8 + $0x20] ss:$8 sps:$4 sm:$0xff]   ;;  %v6204_v8 = vld [vmem:[#allocation8 + $0x34] ss:$8 sps:$4 sm:$0xff]  }
 0x35d   : > { %1286 = vmatprep.subr.bf16.mxu0 %v6198_v4  ;;  %v6206_v9 = vld [vmem:[#allocation8 + $0x30] ss:$8 sps:$4 sm:$0xff]   ;;  %v7180_v11 = vmov 0.0|0.0   ;;  %vm7181_vm1 = vmmov 0   ;;  %v7182_v12 = vmov 0.0   ;;  %s7183_s15 = smov 64  }
 0x35e   : > { %v6207_v10 = vld [vmem:[%s8012_s4] sm:$0xff]   ;;  %5674 = vmatprep.subr.bf16.mxu1 %v7180_v11  ;;  %5282 = vmatprep.mubr.msk.f32.mxu1 %vm7181_vm1, %v7182_v12  ;;  %v1569_v21 = vld [vmem:[#allocation9 + $0x8] sm:$0xff]  ;;  %v1329_v27 = vld [vmem:[#allocation6 + $0x8] sm:$0xff]  ;;  %vm1338_vm2 = vcmask 130048   ;;  %vm1651_vm3 = vcmask 64512   ;;  %v1726_v53 = vshrl.u32 %v1725_v52, 7 }
 0x35f   : > { %v1568_v20 = vld [vmem:[#allocation9] sm:$0xff]  ;;  %v1327_v28 = vld [vmem:[#allocation6] sm:$0xff]  ;;  %v1486_v29 = vld [vmem:[#allocation6 + $0x10] sm:$0xff]  ;;  %vm2312_vm4 = vcmask 519168   ;;  %vm2765_vm5 = vcmask 1043456   ;;  %vm2761_vm6 = vcmask 31744  }
 0x360   : > { %1287 = vmatpush1.bf16.msra.mxu0 %v6200_v5  ;;  %v5684_v22 = vpack.c.bf16 %v1569_v21, %v1568_v20  ;;  %v1570_v30 = vld [vmem:[#allocation9 + $0x10] sm:$0xff]  ;;  %v1571_v31 = vld [vmem:[#allocation9 + $0x18] sm:$0xff]  ;;  %v1572_v33 = vld [vmem:[#allocation9 + $0x20] sm:$0xff]  ;;  %v8108_v54 = vsub.s32 0, %v1726_v53  ;;  %vm3072_vm7 = vcmask 517120   ;;  %vm3166_vm8 = vcmask 261120  }
 0x361   : > { %1288 = vmatprep.subr.bf16.mxu0 %v6201_v6  ;;  %v5687_v32 = vpack.c.bf16 %v1571_v31, %v1570_v30  ;;  %v1573_v34 = vld [vmem:[#allocation9 + $0x28] sm:$0xff]  ;;  %v1574_v36 = vld [vmem:[#allocation9 + $0x30] sm:$0xff]  ;;  %v1575_v37 = vld [vmem:[#allocation9 + $0x38] sm:$0xff]  ;;  %vm3597_vm9 = vcmask 1041408   ;;  %vm3593_vm10 = vcmask 15360   ;;  %s7184_s2 = smov 126  }
 0x362   : > { %v5690_v35 = vpack.c.bf16 %v1573_v34, %v1572_v33  ;;  %v5693_v38 = vpack.c.bf16 %v1575_v37, %v1574_v36  ;;  %v1650_v48 = vld [vmem:[#allocation11] sm:$0xff]  ;;  %v2005_v37 = vld [vmem:[#allocation15 + $0x4] sm:$0xf]  ;;  %s7185_s1 = smov 127   ;;  %s7186_s30 = smov 125   ;;  %vm4606_vm11 = vcmask 0  }
 0x363   : > { %v6210_v4 = vld [vmem:[#allocation17 + $0x4] ss:$8 sps:$4 sm:$0xff]   ;;  %s5095_s13 = sshll.u32 %s8537_s7, 4  ;;  %s1223_s5 = scalar_lea.vmem [#allocation45], %s8008_s10 }
 0x364   : > { %1289 = vmatpush1.bf16.msra.mxu0 %v6203_v7  ;;  %v2320_v34 = vld [vmem:[#allocation18] sm:$0xff]  ;;  %s4621_s9 = sshll.u32 %s1223_s5, 4  ;;  %s8563_s17 = sld [smem:[#allocation89_spill]]  ;;  %s8343_s9 = int_to_ptr.vmem [resolvable:$true] %s4621_s9 }
 0x365   : > { %1290 = vmatprep.subr.bf16.mxu0 %v6204_v8  ;;  %s4609_s18 = scalar_lea.sflag [#allocation5], %s8008_s10  ;;  %s7022_s4 = scalar_lea.vmem %s8343_s9, 16 }
 0x366   : > { %p7023_p2 = scmp.ne.s32.totalorder %s8343_s9, %s7022_s4  ;;  %p8564_p8 = scmp.ne.s32.totalorder %s8529_s0, 0 }
 0x367   : > { %s7187_s7 = smov [#allocation45]  }
 0x368   : > { %1291 = vmatpush1.bf16.msra.mxu0 %v6206_v9  ;;  %v6208_v9 = vld [vmem:[#allocation17] ss:$8 sps:$4 sm:$0xff]   ;;  %p7024_p4 = pnand %p7023_p2, %p8564_p8 }
 0x369   : > { %5695 = vmatprep.subr.bf16.mxu0 %v7180_v11 }
 0x36a   : > { %s8341_s27 = scalar_lea.hbm %s8563_s17, %s5095_s13  ;;  %p7025_p10 = pneg %p7024_p4 }
 0x36b   : > { %5003 = vmatmul.mubr.msk.bf16.vlgmr.msra.gmra.mrb[0].mxu0 %vm1280_vm0, %v6207_v10 }
 0x36c   : > { %5339 = vmatprep.mubr.msk.f32.mxu0 %vm7181_vm1, %v7182_v12  ;;  %5697 = vmatpush3.bf16.msra.mxu0 %v5684_v22 }
 0x36d   : > { %5698 = vmatprep.subr.bf16.mxu0 %v7180_v11 }
 0x370   : > { %5700 = vmatpush3.bf16.msra.mxu0 %v5687_v32 }
 0x371   : > { %5701 = vmatprep.subr.bf16.mxu0 %v7180_v11 }
 0x374   : > { %5703 = vmatpush3.bf16.msra.mxu0 %v5690_v35 }
 0x375   : > { %5704 = vmatprep.subr.bf16.mxu0 %v7180_v11 }
 0x378   : > { %5706 = vmatpush3.bf16.msra.mxu0 %v5693_v38 }
 0x379   : > { %5347 = vmatprep.subr.mxu0 %v7182_v12 }
 0x43e   : > { %v1318_v13 = vpop.f32.mrb[0].mxu0 }
 0x43f   : > { %v1320_v14 = vpop.f32.mrb[1].mxu0 }
 0x440   : > { %v1322_v15 = vpop.f32.mrb[2].mxu0 }
 0x441   : > { %v5678_v16 = vpack.c.bf16 %v1322_v15, %v1318_v13  ;;  %v1324_v17 = vpop.f32.mrb[3].mxu0  ;;  %v6190_v18 = vpack.i.bf16 %v1322_v15, %v1318_v13  ;;  %v6213_v13 = vld [vmem:[#allocation17 + $0x14] ss:$8 sps:$4 sm:$0xff]   ;;  %v6216_v15 = vld [vmem:[#allocation17 + $0x24] ss:$8 sps:$4 sm:$0xff]  }
 0x442   : > { %v5681_v19 = vpack.c.bf16 %v1324_v17, %v1320_v14  ;;  %v6211_v14 = vld [vmem:[#allocation17 + $0x10] ss:$8 sps:$4 sm:$0xff]   ;;  %v6219_v17 = vld [vmem:[#allocation17 + $0x34] ss:$8 sps:$4 sm:$0xff]  }
 0x443   : > { %6191 = vrot.lane.b32.xlu0 %v6190_v18, %s7183_s15  ;;  %v6217_v18 = vld [vmem:[#allocation17 + $0x30] ss:$8 sps:$4 sm:$0xff]  }
 0x4b5   : > { %v6192_v23 = vpop.permute.xlu0 %6191 }
 0x4b6   : > { %v6194_v24 = vunpack.i.h.bf16 %v6192_v23  ;;  %v6193_v25 = vunpack.i.l.bf16 %v6192_v23 }
 0x4b8   : > { %v5675_v26 = vpack.c.bf16 %v6194_v24, %v6193_v25  ;;  %v5012_v24 = vld [vmem:[#allocation14] ss:$0 sm:$0xff] }
 0x4ba   : > { %5676 = vmatpush3.bf16.msra.mxu1 %v5675_v26 }
 0x4bb   : > { %5677 = vmatprep.subr.bf16.mxu1 %v7180_v11 }
 0x4bd   : > { %5283 = vmatmul.mubr.msk.f32.vlgmr.msra.gmra.mrb[0].mxu1 %vm1338_vm2, %v1329_v27 }
 0x4be   : > { %5679 = vmatpush3.bf16.msra.mxu1 %v5678_v16  ;;  %5289 = vmatprep.mubr.msk.f32.mxu1 %vm7181_vm1, %v7182_v12  ;;  %v6214_v16 = vld [vmem:[#allocation17 + $0x20] ss:$8 sps:$4 sm:$0xff]  }
 0x4bf   : > { %5680 = vmatprep.subr.bf16.mxu1 %v7180_v11 }
 0x4c5   : > { %5290 = vmatmul.mubr.msk.f32.vlgmr.msra.gmra.mrb[0].mxu1 %vm1338_vm2, %v1327_v28 }
 0x4c6   : > { %5682 = vmatpush3.bf16.msra.mxu1 %v5681_v19  ;;  %5296 = vmatprep.mubr.msk.f32.mxu1 %vm7181_vm1, %v7182_v12 }
 0x4c7   : > { %5683 = vmatprep.subr.bf16.mxu1 %v7180_v11 }
 0x4cd   : > { %5297 = vmatmul.mubr.msk.f32.vlgmr.msra.gmra.mrb[0].mxu1 %vm1338_vm2, %v1486_v29 }
 0x4ce   : > { %5685 = vmatpush3.bf16.msra.mxu1 %v5684_v22  ;;  %5315 = vmatprep.mubr.msk.f32.mxu1 %vm7181_vm1, %v7182_v12  ;;  %v5011_v22 = vld [vmem:[#allocation12] ss:$0 sm:$0xff] }
 0x4cf   : > { %5686 = vmatprep.subr.bf16.mxu1 %v7180_v11 }
 0x4d2   : > { %5688 = vmatpush3.bf16.msra.mxu1 %v5687_v32 }
 0x4d3   : > { %5689 = vmatprep.subr.bf16.mxu1 %v7180_v11 }
 0x4d6   : > { %5691 = vmatpush3.bf16.msra.mxu1 %v5690_v35  ;;  %v2321_v35 = vld [vmem:[#allocation18 + $0x8] sm:$0xff] }
 0x4d7   : > { %5692 = vmatprep.subr.bf16.mxu1 %v7180_v11  ;;  %v5708_v36 = vpack.c.bf16 %v2321_v35, %v2320_v34  ;;  %v5030_v35 = vld [vmem:[#allocation21] ss:$0 sm:$0xff] }
 0x4da   : > { %5694 = vmatpush3.bf16.msra.mxu1 %v5693_v38 }
 0x4db   : > { %5318 = vmatprep.subr.mxu1 %v7182_v12 }
 0x5a0   : > { %v1556_v39 = vpop.f32.mrb[0].mxu1 }
 0x5a1   : > { %v1561_v40 = vsel %vm1280_vm0, %v1556_v39, 0.0  ;;  %v5298_v41 = vpop.f32.mrb[1].mxu1 }
 0x5a2   : > { %v1562_v42 = vrot.slane %v1561_v40, 4 }
 0x5a4   : > { %v1563_v43 = vadd.f32 %v1562_v42, %v1561_v40  ;;  %v2157_v40 = vld [vmem:[#allocation15 + $0x8] sm:$0xf]  ;;  %v2233_v42 = vld [vmem:[#allocation15 + $0xc] sm:$0xf] }
 0x5a6   : > { %v1564_v44 = vrot.slane %v1563_v43, 2 }
 0x5a8   : > { %v1565_v45 = vadd.f32 %v1564_v44, %v1563_v43  ;;  %v2322_v43 = vld [vmem:[#allocation18 + $0x10] sm:$0xff]  ;;  %v2323_v44 = vld [vmem:[#allocation18 + $0x18] sm:$0xff] }
 0x5aa   : > { %v1566_v46 = vrot.slane %v1565_v45, 1 }
 0x5ac   : > { %v1567_v47 = vadd.f32 %v1566_v46, %v1565_v45  ;;  %v5711_v45 = vpack.c.bf16 %v2323_v44, %v2322_v43  ;;  %v2324_v46 = vld [vmem:[#allocation18 + $0x20] sm:$0xff] }
 0x5ae   : > { %5316 = vmatmul.mubr.msk.f32.vlgmr.msra.gmra.mrb[2].mxu1 %vm1280_vm0, %v1567_v47  ;;  %v2325_v47 = vld [vmem:[#allocation18 + $0x28] sm:$0xff] }
 0x5af   : > { %5320 = vmatprep.mubr.msk.f32.mxu1 %vm7181_vm1, %v7182_v12  ;;  %5319 = vmatpush3.msra.mxu1 %v1650_v48 }
 0x5b0   : > { %5342 = vmatprep.subr.mxu1 %v7182_v12 }
 0x681   : > { %v1645_v49 = vpop.f32.mrb[2].mxu1 }
 0x682   : > { %v1649_v50 = vmul.f32 0.015625, %v1645_v49  ;;  %v5317_v51 = vpop.f32.mrb[3].mxu1  ;;  %v2326_v49 = vld [vmem:[#allocation18 + $0x30] sm:$0xff] }
 0x684   : > { %5321 = vmatmul.mubr.msk.f32.vlgmr.msra.gmra.mrb[4].mxu1 %vm1651_vm3, %v1649_v50  ;;  %v2327_v50 = vld [vmem:[#allocation18 + $0x38] sm:$0xff] }
 0x685   : > { %5343 = vmatpush3.msra.mxu1 %v1650_v48  ;;  %5344 = vmatprep.mubr.msk.f32.mxu1 %vm7181_vm1, %v7182_v12  ;;  %v5714_v48 = vpack.c.bf16 %v2325_v47, %v2324_v46  ;;  %v5717_v51 = vpack.c.bf16 %v2327_v50, %v2326_v49  ;;  %v3080_v47 = vld [vmem:[#allocation27] sm:$0xff]  ;;  %v2757_v50 = vld [vmem:[#allocation24 + $0x2] sm:$0x3] }
 0x686   : > { %1962 = vmatprep.subr.bf16.mxu1 %v6210_v4 }
 0x757   : > { %v1721_v55 = vpop.f32.mrb[4].mxu1 }
 0x758   : > { %v1728_v56 = vrot.slane %v1721_v55, %v8108_v54  ;;  %v5322_v57 = vpop.f32.mrb[5].mxu1 }
 0x75a   : > { %v1729_v58 = vsub.f32 %v1556_v39, %v1728_v56  ;;  %v2003_v39 = vld [vmem:[#allocation15] sm:$0xf] }
 0x75c   : > { %v1730_v59 = vmul.f32 %v1729_v58, %v1729_v58 }
 0x75e   : > { %v1731_v60 = vsel %vm1280_vm0, %v1730_v59, 0.0 }
 0x75f   : > { %v1732_v61 = vrot.slane %v1731_v60, 4 }
 0x761   : > { %v1733_v62 = vadd.f32 %v1732_v61, %v1731_v60 }
 0x763   : > { %v1734_v63 = vrot.slane %v1733_v62, 2 }
 0x765   : > { %v1735_v0 = vadd.f32 %v1734_v63, %v1733_v62  ;;  %v2402_v62 = vld [vmem:[#allocation20] sm:$0xff]  ;;  %v2403_v63 = vld [vmem:[#allocation20 + $0x8] sm:$0xff] }
 0x767   : > { %v1736_v2 = vrot.slane %v1735_v0, 1 }
 0x769   : > { %v1737_v3 = vadd.f32 %v1736_v2, %v1735_v0  ;;  %v5720_v0 = vpack.c.bf16 %v2403_v63, %v2402_v62  ;;  %v3086_v63 = vld [vmem:[#allocation27 + $0x30] sm:$0xff] }
 0x76b   : > { %5340 = vmatmul.mubr.msk.f32.vlgmr.msra.gmra.mrb[4].mxu0 %vm1280_vm0, %v1737_v3 }
 0x76c   : > { %5349 = vmatprep.mubr.msk.f32.mxu0 %vm7181_vm1, %v7182_v12 }
 0x83e   : > { %v1807_v5 = vpop.f32.mrb[4].mxu0 }
 0x83f   : > { %v1811_v6 = vmul.f32 0.015625, %v1807_v5  ;;  %v5341_v7 = vpop.f32.mrb[5].mxu0 }
 0x841   : > { %v1812_v8 = vadd.f32 1e-05, %v1811_v6 }
 0x843   : > { %6256 = vrsqrt.f32 %v1812_v8 }
 0x84d   : > { %v6257_v10 = vpop.eup %6256 }
 0x84e   : > { %5345 = vmatmul.mubr.msk.f32.vlgmr.msra.gmra.mrb[6].mxu1 %vm1651_vm3, %v6257_v10 }
 0x84f   : > { %1963 = vmatpush1.bf16.msra.mxu1 %v6208_v9  ;;  %1994 = vmatprep.mubr.bf16.mxu1 %v7179_v1 }
 0x850   : > { %1964 = vmatprep.subr.bf16.mxu1 %v6213_v13 }
 0x853   : > { %1965 = vmatpush1.bf16.msra.mxu1 %v6211_v14 }
 0x854   : > { %1966 = vmatprep.subr.bf16.mxu1 %v6216_v15 }
 0x857   : > { %1967 = vmatpush1.bf16.msra.mxu1 %v6214_v16 }
 0x858   : > { %1968 = vmatprep.subr.bf16.mxu1 %v6219_v17 }
 0x85b   : > { %1969 = vmatpush1.bf16.msra.mxu1 %v6217_v18 }
 0x85c   : > { %5707 = vmatprep.subr.bf16.mxu1 %v7180_v11 }
 0x921   : > { %v1883_v19 = vpop.f32.mrb[6].mxu1 }
 0x922   : > { %v1890_v20 = vrot.slane %v1883_v19, %v8108_v54  ;;  %v5346_v21 = vpop.f32.mrb[7].mxu1  ;;  %v6222_v19 = vld [vmem:[#allocation26 + $0x4] ss:$8 sps:$4 sm:$0xff]  }
 0x924   : > { %v1891_v23 = vmul.f32 %v1890_v20, %v1729_v58 }
 0x926   : > { %v1899_v25 = vmul.f32 %v5011_v22, %v1891_v23 }
 0x928   : > { %v1907_v26 = vadd.f32 %v5012_v24, %v1899_v25  ;;  %v6220_v24 = vld [vmem:[#allocation26] ss:$8 sps:$4 sm:$0xff]  }
 0x92a   : > { %v1908_v27 = vmul.f32 0.2, %v1907_v26 }
 0x92c   : > { %v1909_v28 = vmax.f32 %v1907_v26, %v1908_v27  ;;  %v6225_v26 = vld [vmem:[#allocation26 + $0x14] ss:$8 sps:$4 sm:$0xff]   ;;  %v6223_v27 = vld [vmem:[#allocation26 + $0x10] ss:$8 sps:$4 sm:$0xff]  }
 0x92e   : > { %v1910_v29 = vpack.c.bf16 %v1909_v28, %v1909_v28  ;;  %v6228_v28 = vld [vmem:[#allocation26 + $0x24] ss:$8 sps:$4 sm:$0xff]  }
 0x930   : > { %5021 = vmatmul.mubr.msk.bf16.vlgmr.msra.gmra.mrb[8].mxu1 %vm1280_vm0, %v1910_v29  ;;  %v6226_v29 = vld [vmem:[#allocation26 + $0x20] ss:$8 sps:$4 sm:$0xff]  }
 0x931   : > { %5383 = vmatprep.mubr.msk.f32.mxu1 %vm7181_vm1, %v7182_v12  ;;  %5709 = vmatpush3.bf16.msra.mxu1 %v5708_v36 }
 0x932   : > { %5710 = vmatprep.subr.bf16.mxu1 %v7180_v11 }
 0x935   : > { %5712 = vmatpush3.bf16.msra.mxu1 %v5711_v45 }
 0x936   : > { %5713 = vmatprep.subr.bf16.mxu1 %v7180_v11 }
 0x939   : > { %5715 = vmatpush3.bf16.msra.mxu1 %v5714_v48 }
 0x93a   : > { %5716 = vmatprep.subr.bf16.mxu1 %v7180_v11 }
 0x93d   : > { %5718 = vmatpush3.bf16.msra.mxu1 %v5717_v51 }
 0x93e   : > { %5734 = vmatprep.subr.bf16.mxu1 %v7180_v11 }
 0xa03   : > { %v1996_v30 = vpop.f32.mrb[8].mxu1 }
 0xa04   : > { %2007 = vrot.lane.b32.xlu0 %v1996_v30, %s7183_s15  ;;  %v1998_v31 = vpop.f32.mrb[9].mxu1 }
 0xa05   : > { %2235 = vrot.lane.b32.xlu1 %v1998_v31, %s7183_s15  ;;  %v2000_v32 = vpop.f32.mrb[10].mxu1 }
 0xa06   : > { %v2001_v33 = vpop.f32.mrb[11].mxu1 }
 0xa76   : > { %v2008_v38 = vpop.permute.xlu0 %2007 }
 0xa77   : > { %5348 = vmatpush3.msra.mxu0 %v2008_v38  ;;  %v2236_v41 = vpop.permute.xlu1 %2235 }
 0xa78   : > { %5350 = vmatmul.mubr.msk.f32.vlgmr.msra.gmra.mrb[6].mxu0 %vm1651_vm3, %v2005_v37  ;;  %5352 = vmatprep.subr.mxu0 %v7182_v12  ;;  %v5031_v37 = vld [vmem:[#allocation23] ss:$0 sm:$0xff] }
 0xa79   : > { %5353 = vmatpush3.msra.mxu0 %v1996_v30  ;;  %5354 = vmatprep.mubr.msk.f32.mxu0 %vm7181_vm1, %v7182_v12  ;;  %v6231_v30 = vld [vmem:[#allocation26 + $0x34] ss:$8 sps:$4 sm:$0xff]  }
 0xa7a   : > { %5357 = vmatprep.subr.mxu0 %v7182_v12 }
 0xa80   : > { %5355 = vmatmul.mubr.msk.f32.vlgmr.msra.gmra.mrb[6].mxu0 %vm1651_vm3, %v2003_v39 }
 0xa81   : > { %5358 = vmatpush3.msra.mxu0 %v1998_v31  ;;  %5359 = vmatprep.mubr.msk.f32.mxu0 %vm7181_vm1, %v7182_v12  ;;  %v6229_v31 = vld [vmem:[#allocation26 + $0x30] ss:$8 sps:$4 sm:$0xff]  }
 0xa82   : > { %5362 = vmatprep.subr.mxu0 %v7182_v12 }
 0xa88   : > { %5360 = vmatmul.mubr.msk.f32.vlgmr.msra.gmra.mrb[6].mxu0 %vm1651_vm3, %v2157_v40 }
 0xa89   : > { %5363 = vmatpush3.msra.mxu0 %v2236_v41  ;;  %5364 = vmatprep.mubr.msk.f32.mxu0 %vm7181_vm1, %v7182_v12 }
 0xa8a   : > { %5719 = vmatprep.subr.bf16.mxu0 %v7180_v11 }
 0xa90   : > { %5365 = vmatmul.mubr.msk.f32.vlgmr.msra.gmra.mrb[6].mxu0 %vm1651_vm3, %v2233_v42 }
 0xa91   : > { %5390 = vmatprep.mubr.msk.f32.mxu0 %vm7181_vm1, %v7182_v12  ;;  %5721 = vmatpush3.bf16.msra.mxu0 %v5720_v0 }
 0xa92   : > { %5722 = vmatprep.subr.bf16.mxu0 %v7180_v11 }
 0xb63   : > { %v2307_v52 = vpop.f32.mrb[6].mxu0 }
 0xb64   : > { %v2313_v53 = vsel %vm2312_vm4, %v2307_v52, 0.0  ;;  %v5366_v55 = vpop.f32.mrb[7].mxu0 }
 0xb65   : > { %v2314_v56 = vrot.slane %v2313_v53, 4 }
 0xb67   : > { %v2315_v57 = vadd.f32 %v2314_v56, %v2313_v53  ;;  %v2914_v53 = vld [vmem:[#allocation24 + $0x4] sm:$0x3]  ;;  %v2993_v56 = vld [vmem:[#allocation24 + $0x6] sm:$0x3] }
 0xb69   : > { %v2316_v58 = vrot.slane %v2315_v57, 2 }
 0xb6b   : > { %v2317_v59 = vadd.f32 %v2316_v58, %v2315_v57  ;;  %v3082_v57 = vld [vmem:[#allocation27 + $0x10] sm:$0xff]  ;;  %v3083_v58 = vld [vmem:[#allocation27 + $0x18] sm:$0xff] }
 0xb6d   : > { %v2318_v60 = vrot.slane %v2317_v59, 1 }
 0xb6f   : > { %v2319_v61 = vadd.f32 %v2318_v60, %v2317_v59  ;;  %v5741_v59 = vpack.c.bf16 %v3083_v58, %v3082_v57  ;;  %v3084_v60 = vld [vmem:[#allocation27 + $0x20] sm:$0xff] }
 0xb70   : > { %v5054_v57 = vld [vmem:[#allocation32] ss:$0 sm:$0xff] }
 0xb71   : > { %5384 = vmatmul.mubr.msk.f32.vlgmr.msra.gmra.mrb[12].mxu1 %vm1280_vm0, %v2319_v61  ;;  %v3085_v61 = vld [vmem:[#allocation27 + $0x28] sm:$0xff] }
 0xb72   : > { %5416 = vmatprep.mubr.msk.f32.mxu1 %vm7181_vm1, %v7182_v12  ;;  %5736 = vmatpush3.bf16.msra.mxu1 %v5720_v0  ;;  %v5744_v62 = vpack.c.bf16 %v3085_v61, %v3084_v60  ;;  %v3087_v0 = vld [vmem:[#allocation27 + $0x38] sm:$0xff] }
 0xb73   : > { %2714 = vmatprep.subr.bf16.mxu1 %v6222_v19 }
 0xc44   : > { %v2397_v2 = vpop.f32.mrb[12].mxu1 }
 0xc45   : > { %v2401_v3 = vmul.f32 0.0625, %v2397_v2  ;;  %v5385_v4 = vpop.f32.mrb[13].mxu1  ;;  %v5747_v2 = vpack.c.bf16 %v3087_v0, %v3086_v63  ;;  %v3833_v63 = vld [vmem:[#allocation36] sm:$0xff]  ;;  %v3834_v0 = vld [vmem:[#allocation36 + $0x8] sm:$0xff] }
 0xc46   : > { %v3163_v4 = vld [vmem:[#allocation29 + $0x8] sm:$0xff] }
 0xc47   : > { %5391 = vmatmul.mubr.msk.f32.vlgmr.msra.gmra.mrb[8].mxu0 %vm1338_vm2, %v2401_v3  ;;  %v3162_v3 = vld [vmem:[#allocation29] sm:$0xff] }
 0xc48   : > { %5724 = vmatpush3.bf16.msra.mxu0 %v5708_v36  ;;  %5409 = vmatprep.mubr.msk.f32.mxu0 %vm7181_vm1, %v7182_v12 }
 0xc49   : > { %5725 = vmatprep.subr.bf16.mxu0 %v7180_v11 }
 0xc4c   : > { %5727 = vmatpush3.bf16.msra.mxu0 %v5711_v45 }
 0xc4d   : > { %5728 = vmatprep.subr.bf16.mxu0 %v7180_v11 }
 0xc50   : > { %5730 = vmatpush3.bf16.msra.mxu0 %v5714_v48  ;;  %v3081_v48 = vld [vmem:[#allocation27 + $0x8] sm:$0xff] }
 0xc51   : > { %5731 = vmatprep.subr.bf16.mxu0 %v7180_v11  ;;  %v8170_v49 = vpack.c.bf16 %v3081_v48, %v3080_v47  ;;  %v6240_v47 = vld [vmem:[#allocation35 + $0x30] ss:$12 sps:$4 sm:$0xff]   ;;  %v6243_v48 = vld [vmem:[#allocation35 + $0x38] ss:$12 sps:$4 sm:$0xff]  }
 0xc54   : > { %5733 = vmatpush3.bf16.msra.mxu0 %v5717_v51 }
 0xc55   : > { %5419 = vmatprep.subr.mxu0 %v7182_v12 }
 0xd1a   : > { %v2473_v5 = vpop.f32.mrb[8].mxu0 }
 0xd1b   : > { %v2480_v6 = vrot.slane %v2473_v5, %v8108_v54  ;;  %v5392_v7 = vpop.f32.mrb[9].mxu0  ;;  %v5750_v5 = vpack.c.bf16 %v3163_v4, %v3162_v3  ;;  %v8231_v3 = vpack.c.bf16 %v3834_v0, %v3833_v63  ;;  %v3836_v4 = vld [vmem:[#allocation36 + $0x18] sm:$0xff] }
 0xd1d   : > { %v2481_v8 = vsub.f32 %v2307_v52, %v2480_v6  ;;  %v2755_v52 = vld [vmem:[#allocation24] sm:$0x3] }
 0xd1f   : > { %v2482_v9 = vmul.f32 %v2481_v8, %v2481_v8 }
 0xd21   : > { %v2483_v10 = vsel %vm2312_vm4, %v2482_v9, 0.0 }
 0xd22   : > { %v2484_v13 = vrot.slane %v2483_v10, 4 }
 0xd24   : > { %v2485_v14 = vadd.f32 %v2484_v13, %v2483_v10 }
 0xd26   : > { %v2486_v15 = vrot.slane %v2485_v14, 2 }
 0xd28   : > { %v2487_v16 = vadd.f32 %v2486_v15, %v2485_v14 }
 0xd2a   : > { %v2488_v17 = vrot.slane %v2487_v16, 1 }
 0xd2c   : > { %v2489_v18 = vadd.f32 %v2488_v17, %v2487_v16  ;;  %v3164_v17 = vld [vmem:[#allocation29 + $0x10] sm:$0xff] }
 0xd2e   : > { %5410 = vmatmul.mubr.msk.f32.vlgmr.msra.gmra.mrb[10].mxu0 %vm1280_vm0, %v2489_v18  ;;  %v3165_v18 = vld [vmem:[#allocation29 + $0x18] sm:$0xff] }
 0xd2f   : > { %5421 = vmatprep.mubr.msk.f32.mxu0 %vm7181_vm1, %v7182_v12  ;;  %v5753_v19 = vpack.c.bf16 %v3165_v18, %v3164_v17 }
 0xe01   : > { %v2559_v20 = vpop.f32.mrb[10].mxu0 }
 0xe02   : > { %v2563_v21 = vmul.f32 0.0625, %v2559_v20  ;;  %v5411_v22 = vpop.f32.mrb[11].mxu0 }
 0xe04   : > { %v2564_v23 = vadd.f32 1e-05, %v2563_v21 }
 0xe06   : > { %6258 = vrsqrt.f32 %v2564_v23 }
 0xe10   : > { %v6259_v25 = vpop.eup %6258 }
 0xe11   : > { %5417 = vmatmul.mubr.msk.f32.vlgmr.msra.gmra.mrb[14].mxu1 %vm1338_vm2, %v6259_v25 }
 0xe12   : > { %2715 = vmatpush1.bf16.msra.mxu1 %v6220_v24  ;;  %2746 = vmatprep.mubr.bf16.mxu1 %v7179_v1 }
 0xe13   : > { %2716 = vmatprep.subr.bf16.mxu1 %v6225_v26 }
 0xe16   : > { %2717 = vmatpush1.bf16.msra.mxu1 %v6223_v27 }
 0xe17   : > { %2718 = vmatprep.subr.bf16.mxu1 %v6228_v28 }
 0xe1a   : > { %2719 = vmatpush1.bf16.msra.mxu1 %v6226_v29 }
 0xe1b   : > { %2720 = vmatprep.subr.bf16.mxu1 %v6231_v30 }
 0xe1e   : > { %2721 = vmatpush1.bf16.msra.mxu1 %v6229_v31 }
 0xe1f   : > { %5737 = vmatprep.subr.bf16.mxu1 %v7180_v11 }
 0xee4   : > { %v2635_v32 = vpop.f32.mrb[14].mxu1 }
 0xee5   : > { %v2642_v33 = vrot.slane %v2635_v32, %v8108_v54  ;;  %v5418_v34 = vpop.f32.mrb[15].mxu1 }
 0xee7   : > { %v2643_v36 = vmul.f32 %v2642_v33, %v2481_v8 }
 0xee9   : > { %v2651_v38 = vmul.f32 %v5030_v35, %v2643_v36  ;;  %v6234_v35 = vld [vmem:[#allocation35 + $0x4] ss:$12 sps:$4 sm:$0xff]  }
 0xeeb   : > { %v2659_v39 = vadd.f32 %v5031_v37, %v2651_v38 }
 0xeed   : > { %v2660_v40 = vmul.f32 0.2, %v2659_v39 }
 0xeef   : > { %v2661_v41 = vmax.f32 %v2659_v39, %v2660_v40  ;;  %v6232_v40 = vld [vmem:[#allocation35] ss:$12 sps:$4 sm:$0xff]  }
 0xef1   : > { %v2662_v42 = vpack.c.bf16 %v2661_v41, %v2661_v41 }
 0xef3   : > { %5040 = vmatmul.mubr.msk.bf16.vlgmr.msra.gmra.mrb[16].mxu1 %vm1280_vm0, %v2662_v42  ;;  %v6235_v42 = vld [vmem:[#allocation35 + $0x8] ss:$12 sps:$4 sm:$0xff]  }
 0xef4   : > { %5455 = vmatprep.mubr.msk.f32.mxu1 %vm7181_vm1, %v7182_v12  ;;  %5739 = vmatpush3.bf16.msra.mxu1 %v8170_v49 }
 0xef5   : > { %5740 = vmatprep.subr.bf16.mxu1 %v7180_v11 }
 0xef8   : > { %5742 = vmatpush3.bf16.msra.mxu1 %v5741_v59 }
 0xef9   : > { %5743 = vmatprep.subr.bf16.mxu1 %v7180_v11 }
 0xefc   : > { %5745 = vmatpush3.bf16.msra.mxu1 %v5744_v62 }
 0xefd   : > { %5746 = vmatprep.subr.bf16.mxu1 %v7180_v11 }
 0xf00   : > { %5748 = vmatpush3.bf16.msra.mxu1 %v5747_v2 }
 0xf01   : > { %5767 = vmatprep.subr.bf16.mxu1 %v7180_v11 }
 0xfc6   : > { %v2748_v43 = vpop.f32.mrb[16].mxu1 }
 0xfc7   : > { %2759 = vrot.lane.b32.xlu1 %v2748_v43, %s7183_s15  ;;  %v2750_v44 = vpop.f32.mrb[17].mxu1 }
 0xfc8   : > { %2994 = vrot.lane.b32.xlu0 %v2750_v44, %s7183_s15  ;;  %v2752_v45 = vpop.f32.mrb[18].mxu1  ;;  %s7026_s15 = sshll.u32 %s7187_s7, 4  ;;  %s7027_s15 = int_to_ptr.vmem [resolvable:$false] %s7026_s15 }
 0xfc9   : > { %v2753_v46 = vpop.f32.mrb[19].mxu1  ;;  %v6239_v45 = vld [vmem:[#allocation35 + $0x20] ss:$12 sps:$4 sm:$0xff]   ;;  %p7029_p11 = scmp.lt.s32.totalorder %s8343_s9, %s7027_s15 }
 0xfca   : > { %v6242_v46 = vld [vmem:[#allocation35 + $0x34] ss:$12 sps:$4 sm:$0xff]  }
0x1039   : > { %v2760_v51 = vpop.permute.xlu1 %2759 }
0x103a   : > { %5420 = vmatpush3.msk.msra.mxu0 %vm2765_vm5, %v2760_v51  ;;  %v2995_v55 = vpop.permute.xlu0 %2994 }
0x103b   : > { %5422 = vmatmul.mubr.msk.f32.vlgmr.msra.gmra.mrb[12].mxu0 %vm2761_vm6, %v2757_v50  ;;  %5424 = vmatprep.subr.mxu0 %v7182_v12  ;;  %v6247_v50 = vld [vmem:[#allocation35 + $0x50] ss:$12 sps:$4 sm:$0xff]  }
0x103c   : > { %5425 = vmatpush3.msk.msra.mxu0 %vm2765_vm5, %v2748_v43  ;;  %5426 = vmatprep.mubr.msk.f32.mxu0 %vm7181_vm1, %v7182_v12  ;;  %v6238_v43 = vld [vmem:[#allocation35 + $0x1c] ss:$12 sps:$4 sm:$0xff]  }
0x103d   : > { %5429 = vmatprep.subr.mxu0 %v7182_v12 }
0x1043   : > { %5427 = vmatmul.mubr.msk.f32.vlgmr.msra.gmra.mrb[12].mxu0 %vm2761_vm6, %v2755_v52 }
0x1044   : > { %5430 = vmatpush3.msk.msra.mxu0 %vm2765_vm5, %v2750_v44  ;;  %5431 = vmatprep.mubr.msk.f32.mxu0 %vm7181_vm1, %v7182_v12  ;;  %v6236_v44 = vld [vmem:[#allocation35 + $0x18] ss:$12 sps:$4 sm:$0xff]  }
0x1045   : > { %5434 = vmatprep.subr.mxu0 %v7182_v12 }
0x104b   : > { %5432 = vmatmul.mubr.msk.f32.vlgmr.msra.gmra.mrb[12].mxu0 %vm2761_vm6, %v2914_v53 }
0x104c   : > { %5435 = vmatpush3.msk.msra.mxu0 %vm2765_vm5, %v2995_v55  ;;  %5436 = vmatprep.mubr.msk.f32.mxu0 %vm7181_vm1, %v7182_v12  ;;  %v5053_v55 = vld [vmem:[#allocation30] ss:$0 sm:$0xff] }
0x104d   : > { %5749 = vmatprep.subr.bf16.mxu0 %v7180_v11 }
0x1053   : > { %5437 = vmatmul.mubr.msk.f32.vlgmr.msra.gmra.mrb[12].mxu0 %vm2761_vm6, %v2993_v56 }
0x1054   : > { %5466 = vmatprep.mubr.msk.f32.mxu0 %vm7181_vm1, %v7182_v12  ;;  %5751 = vmatpush3.bf16.msra.mxu0 %v5750_v5 }
0x1055   : > { %5752 = vmatprep.subr.bf16.mxu0 %v7180_v11 }
0x1058   : > { %5754 = vmatpush3.bf16.msra.mxu0 %v5753_v19 }
0x1059   : > { %5755 = vmatprep.subr.bf16.mxu0 %v7180_v11 }
0x1126   : > { %v3067_v6 = vpop.f32.mrb[12].mxu0 }
0x1127   : > { %v3073_v7 = vsel %vm3072_vm7, %v3067_v6, 0.0  ;;  %v5438_v8 = vpop.f32.mrb[13].mxu0 }
0x1128   : > { %v3074_v9 = vrot.slane %v3073_v7, 4 }
0x112a   : > { %v3075_v10 = vadd.f32 %v3074_v9, %v3073_v7  ;;  %v3838_v7 = vld [vmem:[#allocation36 + $0x28] sm:$0xff]  ;;  %v3839_v9 = vld [vmem:[#allocation36 + $0x30] sm:$0xff] }
0x112c   : > { %v3076_v13 = vrot.slane %v3075_v10, 2 }
0x112e   : > { %v3077_v14 = vadd.f32 %v3076_v13, %v3075_v10  ;;  %v3840_v10 = vld [vmem:[#allocation36 + $0x38] sm:$0xff] }
0x112f   : > { %v8242_v13 = vpack.c.bf16 %v3840_v10, %v3839_v9 }
0x1130   : > { %v3078_v15 = vrot.slane %v3077_v14, 1 }
0x1132   : > { %v3079_v16 = vadd.f32 %v3078_v15, %v3077_v14  ;;  %v3841_v14 = vld [vmem:[#allocation36 + $0x40] sm:$0xff]  ;;  %v3842_v15 = vld [vmem:[#allocation36 + $0x48] sm:$0xff] }
0x1134   : > { %5456 = vmatmul.mubr.msk.f32.vlgmr.msra.gmra.mrb[20].mxu1 %vm1280_vm0, %v3079_v16  ;;  %v8246_v16 = vpack.c.bf16 %v3842_v15, %v3841_v14  ;;  %v6248_v15 = vld [vmem:[#allocation44] sm:$0xff]  }
0x1135   : > { %5769 = vmatpush3.bf16.msra.mxu1 %v5750_v5  ;;  %5496 = vmatprep.mubr.msk.f32.mxu1 %vm7181_vm1, %v7182_v12 }
0x1136   : > { %5770 = vmatprep.subr.bf16.mxu1 %v7180_v11 }
0x1139   : > { %5772 = vmatpush3.bf16.msra.mxu1 %v5753_v19  ;;  %v3592_v19 = vld [vmem:[#allocation33 + $0x2] sm:$0x3] }
0x113a   : > { %3509 = vmatprep.subr.bf16.mxu1 %v6234_v35  ;;  %v3848_v35 = vld [vmem:[#allocation36 + $0x78] sm:$0xff] }
0x1207   : > { %v3157_v20 = vpop.f32.mrb[20].mxu1 }
0x1208   : > { %v3161_v21 = vmul.f32 0.25, %v3157_v20  ;;  %v5457_v22 = vpop.f32.mrb[21].mxu1 }
0x120a   : > { %5467 = vmatmul.mubr.msk.f32.vlgmr.msra.gmra.mrb[14].mxu0 %vm3166_vm8, %v3161_v21 }
0x120b   : > { %5757 = vmatpush3.bf16.msra.mxu0 %v8170_v49  ;;  %5485 = vmatprep.mubr.msk.f32.mxu0 %vm7181_vm1, %v7182_v12  ;;  %v6246_v49 = vld [vmem:[#allocation35 + $0x4c] ss:$12 sps:$4 sm:$0xff]  }
0x120c   : > { %5758 = vmatprep.subr.bf16.mxu0 %v7180_v11 }
0x120f   : > { %5760 = vmatpush3.bf16.msra.mxu0 %v5741_v59 }
0x1210   : > { %5761 = vmatprep.subr.bf16.mxu0 %v7180_v11 }
0x1213   : > { %5763 = vmatpush3.bf16.msra.mxu0 %v5744_v62 }
0x1214   : > { %5764 = vmatprep.subr.bf16.mxu0 %v7180_v11 }
0x1217   : > { %5766 = vmatpush3.bf16.msra.mxu0 %v5747_v2  ;;  %v3835_v2 = vld [vmem:[#allocation36 + $0x10] sm:$0xff] }
0x1218   : > { %5499 = vmatprep.subr.bf16.mxu0 %v7182_v12  ;;  %v8234_v5 = vpack.c.bf16 %v3836_v4, %v3835_v2 }
0x12dd   : > { %v3236_v23 = vpop.f32.mrb[14].mxu0 }
0x12de   : > { %v3243_v24 = vrot.slane %v3236_v23, %v8108_v54  ;;  %v5468_v25 = vpop.f32.mrb[15].mxu0 }
0x12e0   : > { %v3244_v26 = vsub.f32 %v3067_v6, %v3243_v24  ;;  %v3837_v6 = vld [vmem:[#allocation36 + $0x20] sm:$0xff] }
0x12e1   : > { %v8238_v8 = vpack.c.bf16 %v3838_v7, %v3837_v6 }
0x12e2   : > { %v3245_v27 = vmul.f32 %v3244_v26, %v3244_v26 }
0x12e4   : > { %v3246_v28 = vsel %vm3072_vm7, %v3245_v27, 0.0  ;;  %v3748_v27 = vld [vmem:[#allocation33 + $0x4] sm:$0x3] }
0x12e5   : > { %v3247_v29 = vrot.slane %v3246_v28, 4 }
0x12e7   : > { %v3248_v30 = vadd.f32 %v3247_v29, %v3246_v28  ;;  %v3843_v28 = vld [vmem:[#allocation36 + $0x50] sm:$0xff]  ;;  %v3844_v29 = vld [vmem:[#allocation36 + $0x58] sm:$0xff] }
0x12e9   : > { %v3249_v31 = vrot.slane %v3248_v30, 2 }
0x12eb   : > { %v3250_v32 = vadd.f32 %v3249_v31, %v3248_v30  ;;  %v8266_v30 = vpack.c.bf16 %v3844_v29, %v3843_v28  ;;  %v3845_v31 = vld [vmem:[#allocation36 + $0x60] sm:$0xff] }
0x12ec   : > { %v5078_v29 = vld [vmem:[#allocation41] ss:$0 sm:$0xff] }
0x12ed   : > { %v3251_v33 = vrot.slane %v3250_v32, 1 }
0x12ef   : > { %v3252_v34 = vadd.f32 %v3251_v33, %v3250_v32  ;;  %v3846_v32 = vld [vmem:[#allocation36 + $0x68] sm:$0xff] }
0x12f0   : > { %v8270_v33 = vpack.c.bf16 %v3846_v32, %v3845_v31 }
0x12f1   : > { %5486 = vmatmul.mubr.msk.f32.vlgmr.msra.gmra.mrb[16].mxu0 %vm1280_vm0, %v3252_v34  ;;  %v3847_v34 = vld [vmem:[#allocation36 + $0x70] sm:$0xff] }
0x12f2   : > { %5507 = vmatprep.mubr.msk.bf16.mxu0 %vm7181_vm1, %v7182_v12  ;;  %5500 = vmatpush3.bf16.msra.mxu0 %v6235_v42 }
0x12f3   : > { %5501 = vmatprep.subr.bf16.mxu0 %v7182_v12 }
0x12f6   : > { %5502 = vmatpush3.bf16.msra.mxu0 %v6239_v45 }
0x12f7   : > { %5503 = vmatprep.subr.bf16.mxu0 %v7182_v12 }
0x12fa   : > { %5504 = vmatpush3.bf16.msra.mxu0 %v6243_v48 }
0x12fb   : > { %5505 = vmatprep.subr.bf16.mxu0 %v7182_v12 }
0x12fe   : > { %5506 = vmatpush3.bf16.msra.mxu0 %v6247_v50 }
0x12ff   : > { %5773 = vmatprep.subr.bf16.mxu0 %v7180_v11 }
0x13c4   : > { %v3322_v36 = vpop.f32.mrb[16].mxu0 }
0x13c5   : > { %v3326_v37 = vmul.f32 0.25, %v3322_v36  ;;  %v5487_v38 = vpop.f32.mrb[17].mxu0  ;;  %v5795_v36 = vpack.c.bf16 %v3848_v35, %v3847_v34 }
0x13c6   : > { %v3921_v38 = vld [vmem:[#allocation38 + $0x8] sm:$0xff] }
0x13c7   : > { %v3327_v39 = vadd.f32 1e-05, %v3326_v37  ;;  %v3920_v37 = vld [vmem:[#allocation38] sm:$0xff] }
0x13c9   : > { %6260 = vrsqrt.f32 %v3327_v39  ;;  %v3922_v39 = vld [vmem:[#allocation38 + $0x10] sm:$0xff] }
0x13d3   : > { %v6261_v41 = vpop.eup %6260 }
0x13d4   : > { %5497 = vmatmul.mubr.msk.f32.vlgmr.msra.gmra.mrb[22].mxu1 %vm3166_vm8, %v6261_v41  ;;  %v3923_v41 = vld [vmem:[#allocation38 + $0x18] sm:$0xff] }
0x13d5   : > { %3510 = vmatpush1.bf16.msra.mxu1 %v6232_v40  ;;  %3541 = vmatprep.mubr.bf16.mxu1 %v7179_v1  ;;  %v6244_v1 = vld [vmem:[#allocation35 + $0x48] ss:$12 sps:$4 sm:$0xff]   ;;  %v5798_v40 = vpack.c.bf16 %v3921_v38, %v3920_v37  ;;  %v5801_v42 = vpack.c.bf16 %v3923_v41, %v3922_v39 }
0x13d6   : > { %3511 = vmatprep.subr.bf16.mxu1 %v6238_v43  ;;  %v3924_v43 = vld [vmem:[#allocation38 + $0x20] sm:$0xff] }
0x13d9   : > { %3512 = vmatpush1.bf16.msra.mxu1 %v6236_v44  ;;  %v3925_v44 = vld [vmem:[#allocation38 + $0x28] sm:$0xff] }
0x13da   : > { %3513 = vmatprep.subr.bf16.mxu1 %v6242_v46  ;;  %v5804_v45 = vpack.c.bf16 %v3925_v44, %v3924_v43  ;;  %v4525_v44 = vld [vmem:[#allocation42 + $0x3] sm:$0x1] }
0x13dd   : > { %3514 = vmatpush1.bf16.msra.mxu1 %v6240_v47 }
0x13de   : > { %3515 = vmatprep.subr.bf16.mxu1 %v6246_v49 }
0x13e1   : > { %3516 = vmatpush1.bf16.msra.mxu1 %v6244_v1 }
0x13e2   : > { %5511 = vmatprep.subr.mxu1 %v7182_v12 }
0x14a7   : > { %v3398_v51 = vpop.f32.mrb[22].mxu1 }
0x14a8   : > { %v3405_v52 = vrot.slane %v3398_v51, %v8108_v54  ;;  %v5498_v53 = vpop.f32.mrb[23].mxu1 }
0x14aa   : > { %v3406_v56 = vmul.f32 %v3405_v52, %v3244_v26  ;;  %v3590_v26 = vld [vmem:[#allocation33] sm:$0x3] }
0x14ac   : > { %v3414_v58 = vmul.f32 %v5053_v55, %v3406_v56  ;;  %v3926_v55 = vld [vmem:[#allocation38 + $0x30] sm:$0xff]  ;;  %v3927_v56 = vld [vmem:[#allocation38 + $0x38] sm:$0xff] }
0x14ae   : > { %v3422_v59 = vadd.f32 %v5054_v57, %v3414_v58  ;;  %v5807_v57 = vpack.c.bf16 %v3927_v56, %v3926_v55 }
0x14b0   : > { %v3423_v60 = vmul.f32 0.2, %v3422_v59 }
0x14b2   : > { %v3424_v61 = vmax.f32 %v3422_v59, %v3423_v60 }
0x14b4   : > { %v3425_v62 = vpack.c.bf16 %v3424_v61, %v3424_v61 }
0x14b6   : > { %5067 = vmatmul.mubr.msk.bf16.vlgmr.msra.gmra.mrb[24].mxu1 %vm1280_vm0, %v3425_v62  ;;  %5508 = vmatmul.mubr.msk.bf16.vlgmr.msra.gmra.mrb[20].mxu0 %vm1280_vm0, %v3425_v62 }
0x14b7   : > { %5513 = vmatprep.mubr.msk.f32.mxu1 %vm7181_vm1, %v7182_v12  ;;  %5558 = vmatprep.mubr.msk.f32.mxu0 %vm7181_vm1, %v7182_v12 }
0x14b8   : > { %5775 = vmatpush3.bf16.msra.mxu0 %v8231_v3 }
0x14b9   : > { %5776 = vmatprep.subr.bf16.mxu0 %v7180_v11 }
0x14bc   : > { %5778 = vmatpush3.bf16.msra.mxu0 %v8234_v5 }
0x14bd   : > { %5779 = vmatprep.subr.bf16.mxu0 %v7180_v11 }
0x14c0   : > { %5781 = vmatpush3.bf16.msra.mxu0 %v8238_v8 }
0x14c1   : > { %5782 = vmatprep.subr.bf16.mxu0 %v7180_v11 }
0x14c4   : > { %5784 = vmatpush3.bf16.msra.mxu0 %v8242_v13 }
0x14c5   : > { %5785 = vmatprep.subr.bf16.mxu0 %v7180_v11 }
0x14c8   : > { %5787 = vmatpush3.bf16.msra.mxu0 %v8246_v16 }
0x14c9   : > { %5788 = vmatprep.subr.bf16.mxu0 %v7180_v11 }
0x14cc   : > { %5790 = vmatpush3.bf16.msra.mxu0 %v8266_v30 }
0x14cd   : > { %5791 = vmatprep.subr.bf16.mxu0 %v7180_v11 }
0x14d0   : > { %5793 = vmatpush3.bf16.msra.mxu0 %v8270_v33 }
0x14d1   : > { %5794 = vmatprep.subr.bf16.mxu0 %v7180_v11 }
0x14d4   : > { %5796 = vmatpush3.bf16.msra.mxu0 %v5795_v36 }
0x14d5   : > { %5833 = vmatprep.subr.bf16.mxu0 %v7180_v11 }
0x1589   : > { %v3543_v17 = vpop.f32.mrb[24].mxu1  ;;  %v3584_v18 = vpop.f32.mrb[20].mxu0 }
0x158a   : > { %v3545_v20 = vpop.f32.mrb[25].mxu1  ;;  %v5509_v21 = vpop.f32.mrb[21].mxu0 }
0x158b   : > { %v3547_v22 = vpop.f32.mrb[26].mxu1  ;;  %v3587_v23 = vpop.f32.mrb[22].mxu0  ;;  %5512 = vmatpush3.msk.msra.mxu1 %vm3597_vm9, %v3545_v20  ;;  %v6252_v20 = vld [vmem:[#allocation44 + $0x20] sm:$0xff]   ;;  %v6253_v21 = vld [vmem:[#allocation44 + $0x28] sm:$0xff]  }
0x158c   : > { %v3548_v24 = vpop.f32.mrb[27].mxu1  ;;  %v5510_v25 = vpop.f32.mrb[23].mxu0  ;;  %5514 = vmatmul.mubr.msk.f32.vlgmr.msra.gmra.mrb[28].mxu1 %vm3593_vm10, %v3592_v19  ;;  %5516 = vmatprep.subr.mxu1 %v7182_v12  ;;  %v6251_v19 = vld [vmem:[#allocation44 + $0x18] sm:$0xff]   ;;  %v6254_v22 = vld [vmem:[#allocation44 + $0x30] sm:$0xff]  }
0x158d   : > { %5517 = vmatpush3.msk.msra.mxu1 %vm3597_vm9, %v3543_v17  ;;  %5518 = vmatprep.mubr.msk.f32.mxu1 %vm7181_vm1, %v7182_v12  ;;  %v6249_v17 = vld [vmem:[#allocation44 + $0x8] sm:$0xff]   ;;  %v6255_v23 = vld [vmem:[#allocation44 + $0x38] sm:$0xff]  }
0x158e   : > { %5521 = vmatprep.subr.mxu1 %v7182_v12 }
0x1594   : > { %5519 = vmatmul.mubr.msk.f32.vlgmr.msra.gmra.mrb[28].mxu1 %vm3593_vm10, %v3590_v26 }
0x1595   : > { %5522 = vmatpush3.msk.msra.mxu1 %vm3597_vm9, %v3584_v18  ;;  %5523 = vmatprep.mubr.msk.f32.mxu1 %vm7181_vm1, %v7182_v12  ;;  %v6250_v18 = vld [vmem:[#allocation44 + $0x10] sm:$0xff]  }
0x1596   : > { %5797 = vmatprep.subr.bf16.mxu1 %v7180_v11 }
0x159c   : > { %5524 = vmatmul.mubr.msk.f32.vlgmr.msra.gmra.mrb[28].mxu1 %vm3593_vm10, %v3748_v27  ;;  %v5077_v27 = vld [vmem:[#allocation39] ss:$0 sm:$0xff] }
0x159d   : > { %5577 = vmatprep.mubr.msk.f32.mxu1 %vm7181_vm1, %v7182_v12  ;;  %5799 = vmatpush3.bf16.msra.mxu1 %v5798_v40 }
0x159e   : > { %5800 = vmatprep.subr.bf16.mxu1 %v7180_v11 }
0x15a1   : > { %5802 = vmatpush3.bf16.msra.mxu1 %v5801_v42 }
0x15a2   : > { %5803 = vmatprep.subr.bf16.mxu1 %v7180_v11 }
0x15a5   : > { %5805 = vmatpush3.bf16.msra.mxu1 %v5804_v45 }
0x15a6   : > { %5806 = vmatprep.subr.bf16.mxu1 %v7180_v11 }
0x15a9   : > { %5808 = vmatpush3.bf16.msra.mxu1 %v5807_v57 }
0x15aa   : > { %5809 = vmatprep.subr.bf16.mxu1 %v7180_v11 }
0x166f   : > { %v3821_v46 = vpop.f32.mrb[28].mxu1 }
0x1670   : > { %v3826_v47 = vsel %vm3597_vm9, %v3821_v46, 0.0  ;;  %v5525_v48 = vpop.f32.mrb[29].mxu1 }
0x1671   : > { %v3827_v49 = vrot.slane %v3826_v47, 4 }
0x1673   : > { %v3828_v1 = vadd.f32 %v3827_v49, %v3826_v47 }
0x1675   : > { %v3829_v50 = vrot.slane %v3828_v1, 2 }
0x1677   : > { %v3830_v51 = vadd.f32 %v3829_v50, %v3828_v1 }
0x1679   : > { %v3831_v52 = vrot.slane %v3830_v51, 1 }
0x167b   : > { %v3832_v53 = vadd.f32 %v3831_v52, %v3830_v51 }
0x167d   : > { %5559 = vmatmul.mubr.f32.vlgmr.msra.gmra.mrb[18].mxu0 %v3832_v53  ;;  %v4604_v53 = vld [vmem:[#allocation2] sm:$0x1] }
0x167e   : > { %5835 = vmatpush3.bf16.msra.mxu0 %v5798_v40  ;;  %5631 = vmatprep.mubr.msk.f32.mxu0 %vm7181_vm1, %v7182_v12  ;;  %v4288_v40 = vld [vmem:[#allocation42] sm:$0x1] }
0x167f   : > { %5836 = vmatprep.subr.bf16.mxu0 %v7180_v11 }
0x1682   : > { %5838 = vmatpush3.bf16.msra.mxu0 %v5801_v42  ;;  %v4445_v42 = vld [vmem:[#allocation42 + $0x2] sm:$0x1] }
0x1683   : > { %5839 = vmatprep.subr.bf16.mxu0 %v7180_v11 }
0x1686   : > { %5841 = vmatpush3.bf16.msra.mxu0 %v5804_v45 }
0x1687   : > { %5842 = vmatprep.subr.bf16.mxu0 %v7180_v11 }
0x168a   : > { %5844 = vmatpush3.bf16.msra.mxu0 %v5807_v57 }
0x168b   : > { %5634 = vmatprep.subr.bf16.mxu0 %v7182_v12 }
0x1750   : > { %v3915_v58 = vpop.f32.mrb[18].mxu0 }
0x1751   : > { %v3919_v59 = vmul.f32 0.25, %v3915_v58  ;;  %v5560_v60 = vpop.f32.mrb[19].mxu0 }
0x1753   : > { %5578 = vmatmul.mubr.msk.f32.vlgmr.msra.gmra.mrb[30].mxu1 %vm1280_vm0, %v3919_v59 }
0x1754   : > { %5811 = vmatpush3.bf16.msra.mxu1 %v8231_v3  ;;  %5612 = vmatprep.mubr.msk.f32.mxu1 %vm7181_vm1, %v7182_v12 }
0x1755   : > { %5812 = vmatprep.subr.bf16.mxu1 %v7180_v11 }
0x1758   : > { %5814 = vmatpush3.bf16.msra.mxu1 %v8234_v5 }
0x1759   : > { %5815 = vmatprep.subr.bf16.mxu1 %v7180_v11 }
0x175c   : > { %5817 = vmatpush3.bf16.msra.mxu1 %v8238_v8 }
0x175d   : > { %5818 = vmatprep.subr.bf16.mxu1 %v7180_v11 }
0x1760   : > { %5820 = vmatpush3.bf16.msra.mxu1 %v8242_v13 }
0x1761   : > { %5821 = vmatprep.subr.bf16.mxu1 %v7180_v11 }
0x1764   : > { %5823 = vmatpush3.bf16.msra.mxu1 %v8246_v16 }
0x1765   : > { %5824 = vmatprep.subr.bf16.mxu1 %v7180_v11 }
0x1768   : > { %5826 = vmatpush3.bf16.msra.mxu1 %v8266_v30 }
0x1769   : > { %5827 = vmatprep.subr.bf16.mxu1 %v7180_v11 }
0x176c   : > { %5829 = vmatpush3.bf16.msra.mxu1 %v8270_v33 }
0x176d   : > { %5830 = vmatprep.subr.bf16.mxu1 %v7180_v11 }
0x1770   : > { %5832 = vmatpush3.bf16.msra.mxu1 %v5795_v36 }
0x1771   : > { %5654 = vmatprep.subr.mxu1 %v7182_v12 }
0x1826   : > { %v3997_v61 = vpop.f32.mrb[30].mxu1 }
0x1827   : > { %v4004_v62 = vrot.slane %v3997_v61, %v8108_v54  ;;  %v5579_v63 = vpop.f32.mrb[31].mxu1 }
0x1829   : > { %v4005_v0 = vsub.f32 %v3821_v46, %v4004_v62 }
0x182b   : > { %v4006_v2 = vmul.f32 %v4005_v0, %v4005_v0 }
0x182d   : > { %v4007_v3 = vsel %vm3597_vm9, %v4006_v2, 0.0 }
0x182e   : > { %v4008_v4 = vrot.slane %v4007_v3, 4 }
0x1830   : > { %v4009_v5 = vadd.f32 %v4008_v4, %v4007_v3 }
0x1832   : > { %v4010_v6 = vrot.slane %v4009_v5, 2 }
0x1834   : > { %v4011_v7 = vadd.f32 %v4010_v6, %v4009_v5 }
0x1836   : > { %v4012_v8 = vrot.slane %v4011_v7, 1 }
0x1838   : > { %v4013_v9 = vadd.f32 %v4012_v8, %v4011_v7 }
0x183a   : > { %5613 = vmatmul.mubr.f32.vlgmr.msra.gmra.mrb[32].mxu1 %v4013_v9 }
0x183b   : > { %5656 = vmatprep.mubr.msk.f32.mxu1 %vm7181_vm1, %v7182_v12 }
0x190d   : > { %v4080_v11 = vpop.f32.mrb[32].mxu1 }
0x190e   : > { %v4084_v10 = vmul.f32 0.25, %v4080_v11  ;;  %v5614_v13 = vpop.f32.mrb[33].mxu1 }
0x1910   : > { %v4085_v14 = vadd.f32 1e-05, %v4084_v10 }
0x1912   : > { %6262 = vrsqrt.f32 %v4085_v14 }
0x191c   : > { %v6263_v16 = vpop.eup %6262 }
0x191d   : > { %5632 = vmatmul.mubr.msk.f32.vlgmr.msra.gmra.mrb[24].mxu0 %vm1280_vm0, %v6263_v16 }
0x191e   : > { %5635 = vmatpush3.bf16.msra.mxu0 %v6248_v15  ;;  %5650 = vmatprep.mubr.msk.bf16.mxu0 %vm7181_vm1, %v7182_v12 }
0x191f   : > { %5636 = vmatprep.subr.bf16.mxu0 %v7182_v12 }
0x1922   : > { %5637 = vmatpush3.bf16.msra.mxu0 %v6249_v17 }
0x1923   : > { %5638 = vmatprep.subr.bf16.mxu0 %v7182_v12 }
0x1926   : > { %5639 = vmatpush3.bf16.msra.mxu0 %v6250_v18 }
0x1927   : > { %5640 = vmatprep.subr.bf16.mxu0 %v7182_v12 }
0x192a   : > { %5641 = vmatpush3.bf16.msra.mxu0 %v6251_v19 }
0x192b   : > { %5642 = vmatprep.subr.bf16.mxu0 %v7182_v12 }
0x192e   : > { %5643 = vmatpush3.bf16.msra.mxu0 %v6252_v20 }
0x192f   : > { %5644 = vmatprep.subr.bf16.mxu0 %v7182_v12 }
0x1932   : > { %5645 = vmatpush3.bf16.msra.mxu0 %v6253_v21 }
0x1933   : > { %5646 = vmatprep.subr.bf16.mxu0 %v7182_v12 }
0x1936   : > { %5647 = vmatpush3.bf16.msra.mxu0 %v6254_v22 }
0x1937   : > { %5648 = vmatprep.subr.bf16.mxu0 %v7182_v12 }
0x193a   : > { %5649 = vmatpush3.bf16.msra.mxu0 %v6255_v23 }
0x19f0   : > { %v4156_v24 = vpop.f32.mrb[24].mxu0 }
0x19f1   : > { %v4163_v25 = vrot.slane %v4156_v24, %v8108_v54  ;;  %v5633_v26 = vpop.f32.mrb[25].mxu0  ;;  %v4290_v54 = vld [vmem:[#allocation42 + $0x1] sm:$0x1] }
0x19f3   : > { %v4164_v28 = vmul.f32 %v4163_v25, %v4005_v0 }
0x19f5   : > { %v4172_v30 = vmul.f32 %v5077_v27, %v4164_v28 }
0x19f7   : > { %v4180_v31 = vadd.f32 %v5078_v29, %v4172_v30 }
0x19f9   : > { %v4181_v32 = vmul.f32 0.2, %v4180_v31 }
0x19fb   : > { %v4182_v33 = vmax.f32 %v4180_v31, %v4181_v32 }
0x19fd   : > { %v4183_v34 = vpack.c.bf16 %v4182_v33, %v4182_v33 }
0x19ff   : > { %5651 = vmatmul.mubr.bf16.vlgmr.msra.gmra.mrb[28].mxu0 %v4183_v34 }
0x1ad2   : > { %v4282_v35 = vpop.f32.mrb[28].mxu0 }
0x1ad3   : > { %4446 = vrot.lane.b32.xlu0 %v4282_v35, %s7184_s2  ;;  %4292 = vrot.lane.b32.xlu1 %v4282_v35, %s7185_s1  ;;  %v5652_v36 = vpop.f32.mrb[29].mxu0  ;;  %s7028_s2 = scalar_lea.vmem %s7027_s15, 32 }
0x1ad4   : > { %v4285_v37 = vpop.f32.mrb[30].mxu0  ;;  %p7030_p3 = scmp.lt.s32.totalorder %s7028_s2, %s7022_s4 }
0x1ad5   : > { %v5653_v38 = vpop.f32.mrb[31].mxu0 }
0x1ad6   : > { %p7031_p5 = por %p7030_p3, %p7029_p11 }
0x1ad7   : > { %4526 = vrot.lane.b32.xlu1 %v4282_v35, %s7186_s30 }
0x1ad8   : > { %p7032_p7 = pnand %p7031_p5, %p7025_p10 }
0x1b45   : > { %v4293_v39 = vpop.permute.xlu1 %4292  ;;  %v4447_v41 = vpop.permute.xlu0 %4446 }
0x1b46   : > { %5655 = vmatpush3.msk.msra.mxu1 %vm3597_vm9, %v4293_v39 }
0x1b47   : > { %5657 = vmatmul.mubr.msk.f32.vlgmr.msra.gmra.mrb[34].mxu1 %vm3593_vm10, %v4290_v54  ;;  %5659 = vmatprep.subr.mxu1 %v7182_v12 }
0x1b48   : > { %5660 = vmatpush3.msk.msra.mxu1 %vm3597_vm9, %v4282_v35  ;;  %5661 = vmatprep.mubr.msk.f32.mxu1 %vm7181_vm1, %v7182_v12 }
0x1b49   : > { %5664 = vmatprep.subr.mxu1 %v7182_v12  ;;  %v4527_v43 = vpop.permute.xlu1 %4526 }
0x1b4b   : > { %5662 = vmatmul.mubr.msk.f32.vlgmr.msra.gmra.mrb[36].mxu1 %vm3593_vm10, %v4288_v40 }
0x1b4c   : > { %5665 = vmatpush3.msk.msra.mxu1 %vm3597_vm9, %v4447_v41  ;;  %5666 = vmatprep.mubr.msk.f32.mxu1 %vm7181_vm1, %v7182_v12 }
0x1b4d   : > { %5669 = vmatprep.subr.mxu1 %v7182_v12 }
0x1b4f   : > { %5667 = vmatmul.mubr.msk.f32.vlgmr.msra.gmra.mrb[38].mxu1 %vm3593_vm10, %v4445_v42 }
0x1b50   : > { %5670 = vmatpush3.msk.msra.mxu1 %vm3597_vm9, %v4527_v43  ;;  %5671 = vmatprep.mubr.msk.f32.mxu1 %vm7181_vm1, %v7182_v12 }
0x1b53   : > { %5672 = vmatmul.mubr.msk.f32.vlgmr.msra.gmra.mrb[40].mxu1 %vm3593_vm10, %v4525_v44 }
0x1c1a   : > { %v4365_v45 = vpop.f32.mrb[34].mxu1 }
0x1c1b   : > { %v5658_v46 = vpop.f32.mrb[35].mxu1 }
0x1c1e   : > { %v4440_v47 = vpop.f32.mrb[36].mxu1 }
0x1c1f   : > { %v4441_v48 = vadd.f32 %v4440_v47, %v4365_v45  ;;  %v5663_v49 = vpop.f32.mrb[37].mxu1 }
0x1c22   : > { %v4519_v1 = vpop.f32.mrb[38].mxu1 }
0x1c23   : > { %v4523_v50 = vadd.f32 %v4519_v1, %v4441_v48  ;;  %v5668_v51 = vpop.f32.mrb[39].mxu1 }
0x1c26   : > { %v4599_v52 = vpop.f32.mrb[40].mxu1 }
0x1c27   : > { %v4603_v55 = vadd.f32 %v4599_v52, %v4523_v50  ;;  %v5673_v12 = vpop.f32.mrb[41].mxu1 }
0x1c29   : > { %v4605_v56 = vadd.f32 %v4604_v53, %v4603_v55 }
0x1c2b   : > { %4607 = vst.msk [vmem:[%s1223_s5] sm:$0x1] %vm4606_vm11, %v4605_v56 }
0x1c2c   : > { %7035 = shalt.err (!%p7032_p7)
}
0x1c2d   : > { %s7036_s10 = scalar_lea.hbm %s8341_s27, 16  ;;  %s7040_s13 = scalar_lea.hbm %s8563_s17, 32 }
0x1c2e   : > { %p7037_p6 = scmp.ne.s32.totalorder %s8341_s27, %s7036_s10  ;;  %p7041_p1 = scmp.lt.u32.totalorder %s8341_s27, %s8563_s17 }
0x1c2f   : > { %p7042_p13 = scmp.lt.u32.totalorder %s7040_s13, %s7036_s10  ;;  %p7044_p2 = scmp.lt.u32.totalorder %s7036_s10, %s8341_s27 }
0x1c30   : > { %p7038_p9 = pnand %p7037_p6, %p8564_p8 }
0x1c31   : > { %p7043_p0 = por %p7042_p13, %p7041_p1 }
0x1c32   : > { %p7039_p12 = pneg %p7038_p9 }
0x1c33   : > { %p7045_p4 = por %p7044_p2, %p7043_p0 }
0x1c35   : > { %p7046_p10 = pnand %p7045_p4, %p7039_p12 }
0x1c37   : > { %7049 = shalt.err (!%p7046_p10)
}
0x1c38   : > { %5971 = dma.vmem_to_hbm [thread:$0]  (%p8564_p8), %s8343_s9, 16, %s8341_s27, %s4609_s18  }
0x1c39 PF: > { %s8565_s29 = sld [smem:[#allocation61_spill]]  ;;  %s8566_s4 = sld [smem:[#allocation64_spill]] }
0x1c3a   : > { %p8567_p11 = scmp.ne.s32.totalorder %s8530_s6, 0 }
0x1c3f   : > { %s4633_s7 = sand.u32 1, %s8565_s29   ;;  %p8568_p3 = scmp.ge.s32.totalorder %s8566_s4, 2 }
0x1c40   : > { %s4634_s15 = scalar_lea.sflag [#allocation5], %s4633_s7 }
0x1c41   : > { %p6057_p5 = pnand %p8568_p3, %p8567_p11 }
0x1c43   : > { %7123 = dma.done.wait (!%p6057_p5), %s4634_s15, 16  }
0x1c44   : > { %7125 = vsyncadd (!%p6057_p5), %s4634_s15, 4294967280  ;;  %s8569_s9 = sld [smem:[#allocation62_spill]]  ;;  %s8570_s27 = sld [smem:[#allocation63_spill]] }
0x1c45   : > { %p56_p7 = scmp.ge.s32.totalorder %s7926_s3, 4   ;;  %s8571_s30 = smov %s7937_s16 }
0x1c47   :  { %58 = sbr.rel (!%p56_p7) target bundleno = 42 (0x2a), region = 294 }
0x1c4e   :  { %4638 = vsyncpa [#allocation4], 1 }
0x1c4f   :  { %4640 = vsyncpa [#allocation4 + $0x1], 1 }
0x1c50   :  { %4641 = vsyncpa [#allocation7], 1 }
0x1c51   :  { %4642 = vsyncpa [#allocation10], 1 }
0x1c52   :  { %4643 = vsyncpa [#allocation13], 1 }
0x1c53   :  { %4644 = vsyncpa [#allocation16], 1 }
0x1c54   :  { %4645 = vsyncpa [#allocation19], 1 }
0x1c55   :  { %4646 = vsyncpa [#allocation22], 1 }
0x1c56   :  { %4647 = vsyncpa [#allocation25], 1 }
0x1c57   :  { %4648 = vsyncpa [#allocation28], 1 }
0x1c58   :  { %4649 = vsyncpa [#allocation31], 1 }
0x1c59   :  { %4650 = vsyncpa [#allocation34], 1 }
0x1c5a   :  { %4651 = vsyncpa [#allocation37], 1 }
0x1c5b   :  { %4652 = vsyncpa [#allocation40], 1 }
0x1c5c   :  { %4653 = vsyncpa [#allocation43], 1 }
0x1c5d   :  { %4654 = vsyncpa [#allocation5], 1 }
0x1c5e   :  { %4656 = vsyncpa [#allocation5 + $0x1], 1 }

</bundles_post_ra>
